<compile_context>
chip_gen: v7x
topology: tpu7x:2x2x1
jax: 0.10.0
libtpu: 0.0.40
codegen_flags: <defaults>
</compile_context>

<pallas_src>
import math

import jax
import jax.numpy as jnp
from jax.experimental import pallas as pl
from jax.experimental.pallas import tpu as pltpu

# ---------------------------------------------------------------- config ----
B = 2                       # batch
C = 3                       # image channels
IMG = 32                    # image size
PATCH = 8                   # patch size
GRIDP = IMG // PATCH        # 4
NP = GRIDP * GRIDP          # 16 patches
N = NP + 1                  # +cls token = 17 tokens per image
NPAD = 24                   # sublane-aligned per-image token rows (17 -> 24)
D = 128                     # hidden dim
H = 4                       # attention heads
HD = D // H                 # 32 head dim
DEPTH = 2                   # transformer blocks
DM = 4 * D                  # mlp hidden (ratio 4)
CH = 256                    # EnhancedViT classifier hidden dim
NC = 2                      # num classes
PDIM = C * PATCH * PATCH    # 192
EPS = 1e-6
SCALE = 1.0 / math.sqrt(HD)
NEG = -1e9                  # additive mask for padded token rows


def _layernorm(x, w, b):
    mu = jnp.mean(x, axis=-1, keepdims=True)
    var = jnp.mean((x - mu) ** 2, axis=-1, keepdims=True)
    return (x - mu) * jax.lax.rsqrt(var + EPS) * w + b


# ---------------------------------------------------------------- kernel ----
def vit_kernel(patches_ref, tok_init_ref, w_pe_ref,
               w_qkv_ref, w_proj_ref, w_fc1_ref, w_fc2_ref,
               lvec_ref, b_fc1_ref,
               final_ref, w_c1_ref, b_c1_ref, w_c2_ref,
               out_ref, x_ref):
    f32 = jnp.float32
    bf16 = jnp.bfloat16
    l = pl.program_id(1)

    # ---- layer 0 only: patch embedding (conv-as-matmul) into persistent VMEM
    @pl.when(l == 0)
    def _():
        pe = jnp.dot(patches_ref[...], w_pe_ref[...],
                     preferred_element_type=f32)
        x_ref[...] = pe + tok_init_ref[...]            # (NPAD, D)

    x = x_ref[...]

    # per-layer small vectors packed in one slab: (9, D)
    lvec = lvec_ref[...]
    ln1_w, ln1_b = lvec[0:1], lvec[1:2]
    ln2_w, ln2_b = lvec[2:3], lvec[3:4]
    b_q, b_k, b_v = lvec[4:5], lvec[5:6], lvec[6:7]
    b_proj, b_fc2 = lvec[7:8], lvec[8:9]

    # additive key mask for the padded token rows (generated in-kernel)
    col_ids = jax.lax.broadcasted_iota(jnp.int32, (NPAD, NPAD), 1)
    attn_mask = jnp.where(col_ids < N, 0.0, NEG).astype(f32)

    # ----- multi-head self-attention -----
    xn = _layernorm(x, ln1_w, ln1_b).astype(bf16)
    qkv = jnp.dot(xn, w_qkv_ref[...], preferred_element_type=f32)
    # 1/sqrt(HD) is pre-folded into the Q columns of w_qkv and b_q.
    q = (qkv[:, 0 * D:1 * D] + b_q).astype(bf16)
    k = (qkv[:, 1 * D:2 * D] + b_k).astype(bf16)
    v = (qkv[:, 2 * D:3 * D] + b_v).astype(bf16)

    heads = []
    for h in range(H):                                 # tiny static unroll
        qh = q[:, h * HD:(h + 1) * HD]
        kh = k[:, h * HD:(h + 1) * HD]
        vh = v[:, h * HD:(h + 1) * HD]
        s = jax.lax.dot_general(qh, kh, (((1,), (1,)), ((), ())),
                                preferred_element_type=f32) + attn_mask
        s = s - jnp.max(s, axis=-1, keepdims=True)
        e = jnp.exp(s)
        p = (e * pl.reciprocal(jnp.sum(e, axis=-1, keepdims=True),
                               approx=True)).astype(bf16)
        heads.append(jnp.dot(p, vh, preferred_element_type=f32))
    attn_cat = jnp.concatenate(heads, axis=-1).astype(bf16)    # (NPAD, D)
    attn_out = jnp.dot(attn_cat, w_proj_ref[...],
                       preferred_element_type=f32) + b_proj
    x = x + attn_out

    # ----- MLP -----
    xn2 = _layernorm(x, ln2_w, ln2_b).astype(bf16)
    h1 = jnp.dot(xn2, w_fc1_ref[...],
                 preferred_element_type=f32) + b_fc1_ref[...]
    # TODO(synk): timm ViT uses exact (erf) GELU; tanh approximation used here
    # for robust Mosaic lowering.
    g = jax.nn.gelu(h1, approximate=True).astype(bf16)
    h2 = jnp.dot(g, w_fc2_ref[...], preferred_element_type=f32) + b_fc2
    x = x + h2
    x_ref[...] = x

    # ---- last layer only: final norm + attention pooling + classifier ----
    @pl.when(l == DEPTH - 1)
    def _():
        fin = final_ref[...]                           # (6, D)
        lnf_w, lnf_b = fin[0:1], fin[1:2]
        w_attn = fin[2:3]
        cls_ln_w, cls_ln_b = fin[3:4], fin[4:5]
        b_c2 = fin[5:6]

        tokens = _layernorm(x, lnf_w, lnf_b)           # (NPAD, D)

        # Attention pooling over the N valid token rows.  The scalar bias of
        # the 1-unit attention Linear is dropped: softmax is shift-invariant.
        sc = jnp.sum(tokens * w_attn, axis=-1, keepdims=True)     # (NPAD, 1)
        row_ids = jax.lax.broadcasted_iota(jnp.int32, (NPAD, 1), 0)
        sc = jnp.where(row_ids < N, sc, NEG)
        sc = sc - jnp.max(sc, axis=0, keepdims=True)
        e = jnp.exp(sc)
        wts = e * pl.reciprocal(jnp.sum(e, axis=0, keepdims=True), approx=True)
        pooled = jnp.sum(wts * tokens, axis=0, keepdims=True)     # (1, D)

        # classifier: LN -> Linear -> ReLU -> Linear (dropout = eval no-op)
        z = _layernorm(pooled, cls_ln_w, cls_ln_b).astype(bf16)
        hc = jnp.dot(z, w_c1_ref[...],
                     preferred_element_type=f32) + b_c1_ref[...]
        hc = jnp.maximum(hc, 0.0).astype(bf16)
        logits = jnp.dot(hc, w_c2_ref[...],
                         preferred_element_type=f32) + b_c2       # (1, 128)
        out_ref[...] = jnp.broadcast_to(logits, (8, 128)).astype(out_ref.dtype)


def vit_forward_pallas(inputs):
    in_specs = [
        pl.BlockSpec((None, NPAD, PDIM), lambda b, l: (b, 0, 0)),   # patches
        pl.BlockSpec((NPAD, D), lambda b, l: (0, 0)),               # tok_init
        pl.BlockSpec((PDIM, D), lambda b, l: (0, 0)),               # w_pe
        pl.BlockSpec((None, D, 3 * D), lambda b, l: (l, 0, 0)),     # w_qkv
        pl.BlockSpec((None, D, D), lambda b, l: (l, 0, 0)),         # w_proj
        pl.BlockSpec((None, D, DM), lambda b, l: (l, 0, 0)),        # w_fc1
        pl.BlockSpec((None, DM, D), lambda b, l: (l, 0, 0)),        # w_fc2
        pl.BlockSpec((None, 9, D), lambda b, l: (l, 0, 0)),         # lvec slab
        pl.BlockSpec((None, 1, DM), lambda b, l: (l, 0, 0)),        # b_fc1
        pl.BlockSpec((6, D), lambda b, l: (0, 0)),                  # final slab
        pl.BlockSpec((D, CH), lambda b, l: (0, 0)),                 # w_c1
        pl.BlockSpec((1, CH), lambda b, l: (0, 0)),                 # b_c1
        pl.BlockSpec((CH, D), lambda b, l: (0, 0)),                 # w_c2 (pad)
    ]
    out_pad = pl.pallas_call(
        vit_kernel,
        out_shape=jax.ShapeDtypeStruct((B, 8, 128), jnp.float32),
        grid=(B, DEPTH),
        in_specs=in_specs,
        out_specs=pl.BlockSpec((None, 8, 128), lambda b, l: (b, 0, 0)),
        scratch_shapes=[pltpu.VMEM((NPAD, D), jnp.float32)],
        compiler_params=pltpu.CompilerParams(
            dimension_semantics=("parallel", "arbitrary")),
        cost_estimate=pl.CostEstimate(flops=43_000_000,
                                      transcendentals=60_000,
                                      bytes_accessed=900_000),
    )(*inputs)
    return out_pad[:, 0, :NC]


# ------------------------------------------------------------ params/glue ---
def make_params(key):
    keys = jax.random.split(key, 20)

    def nrm(k, shape):
        return jax.random.normal(k, shape, jnp.float32) * 0.02

    p = {}
    p["w_pe"] = nrm(keys[0], (D, C, PATCH, PATCH))   # conv weight (D, C, p, p)
    p["b_pe"] = nrm(keys[1], (D,))
    p["cls"] = nrm(keys[2], (D,))
    p["pos"] = nrm(keys[3], (N, D))
    p["ln1_w"] = jnp.ones((DEPTH, D), jnp.float32)
    p["ln1_b"] = jnp.zeros((DEPTH, D), jnp.float32)
    p["w_qkv"] = nrm(keys[4], (DEPTH, D, 3 * D))
    p["b_qkv"] = nrm(keys[5], (DEPTH, 3 * D))
    p["w_proj"] = nrm(keys[6], (DEPTH, D, D))
    p["b_proj"] = nrm(keys[7], (DEPTH, D))
    p["ln2_w"] = jnp.ones((DEPTH, D), jnp.float32)
    p["ln2_b"] = jnp.zeros((DEPTH, D), jnp.float32)
    p["w_fc1"] = nrm(keys[8], (DEPTH, D, DM))
    p["b_fc1"] = nrm(keys[9], (DEPTH, DM))
    p["w_fc2"] = nrm(keys[10], (DEPTH, DM, D))
    p["b_fc2"] = nrm(keys[11], (DEPTH, D))
    p["lnf_w"] = jnp.ones((D,), jnp.float32)
    p["lnf_b"] = jnp.zeros((D,), jnp.float32)
    # EnhancedViT head: attention pooling + classifier
    p["w_attn"] = nrm(keys[12], (D,))
    p["b_attn"] = nrm(keys[13], (1,))
    p["cls_ln_w"] = jnp.ones((D,), jnp.float32)
    p["cls_ln_b"] = jnp.zeros((D,), jnp.float32)
    p["w_c1"] = nrm(keys[14], (D, CH))
    p["b_c1"] = nrm(keys[15], (CH,))
    p["w_c2"] = nrm(keys[16], (CH, NC))
    p["b_c2"] = nrm(keys[17], (NC,))
    return p


def extract_patches(x):
    # x: (B, C, H, W) NCHW -> (B, num_patches, C*p*p), patch vec order (C, ph, pw)
    xb = x.reshape(B, C, GRIDP, PATCH, GRIDP, PATCH)
    xb = xb.transpose(0, 2, 4, 1, 3, 5)   # (B, gh, gw, C, ph, pw)
    return xb.reshape(B, NP, PDIM)


def prep_weights(params):
    """bf16-cast / scale-folded weights shared by kernel inputs and reference."""
    f32, bf16 = jnp.float32, jnp.bfloat16
    qkv_scale = jnp.concatenate(
        [jnp.full((D,), SCALE, f32), jnp.ones((2 * D,), f32)], axis=0)
    w = {}
    w["w_pe"] = params["w_pe"].reshape(D, PDIM).T.astype(bf16)      # (PDIM, D)
    w["w_qkv"] = (params["w_qkv"] * qkv_scale[None, None, :]).astype(bf16)
    b_qkv = params["b_qkv"] * qkv_scale[None, :]
    w["b_q"] = b_qkv[:, 0 * D:1 * D]
    w["b_k"] = b_qkv[:, 1 * D:2 * D]
    w["b_v"] = b_qkv[:, 2 * D:3 * D]
    w["w_proj"] = params["w_proj"].astype(bf16)
    w["w_fc1"] = params["w_fc1"].astype(bf16)
    w["w_fc2"] = params["w_fc2"].astype(bf16)
    w["w_c1"] = params["w_c1"].astype(bf16)
    w["w_c2_pad"] = (jnp.zeros((CH, D), f32)
                     .at[:, :NC].set(params["w_c2"]).astype(bf16))
    return w


def build_inputs(params, x):
    f32, bf16 = jnp.float32, jnp.bfloat16
    w = prep_weights(params)

    # per-image padded token slab: row 0 = cls (zero patch), rows 1..16 =
    # patches, rows 17..23 = padding (zeros, masked in-kernel).
    patches = extract_patches(x)                                   # (B, NP, PDIM)
    patches_pad = jnp.zeros((B, NPAD, PDIM), f32).at[:, 1:N, :].set(patches)
    patches_pad = patches_pad.astype(bf16)

    tok_init = jnp.zeros((NPAD, D), f32)
    tok_init = tok_init.at[0, :].set(params["cls"] + params["pos"][0])
    tok_init = tok_init.at[1:N, :].set(params["pos"][1:] + params["b_pe"][None, :])

    # per-layer D-wide vectors collapsed into one slab: (DEPTH, 9, D)
    lvec = jnp.stack([
        params["ln1_w"], params["ln1_b"],
        params["ln2_w"], params["ln2_b"],
        w["b_q"], w["b_k"], w["b_v"],
        params["b_proj"], params["b_fc2"],
    ], axis=1).astype(f32)

    b_fc1 = params["b_fc1"].reshape(DEPTH, 1, DM)

    b_c2_pad = jnp.zeros((D,), f32).at[:NC].set(params["b_c2"])
    final_slab = jnp.stack([
        params["lnf_w"], params["lnf_b"], params["w_attn"],
        params["cls_ln_w"], params["cls_ln_b"], b_c2_pad,
    ], axis=0)                                                     # (6, D)

    return [
        patches_pad, tok_init, w["w_pe"],
        w["w_qkv"], w["w_proj"], w["w_fc1"], w["w_fc2"],
        lvec, b_fc1,
        final_slab, w["w_c1"], params["b_c1"].reshape(1, CH), w["w_c2_pad"],
    ]


def vit_reference(params, x):
    """Pure-JAX reference (unpadded, per-image), mirroring the bf16 casts."""
    f32, bf16 = jnp.float32, jnp.bfloat16
    w = prep_weights(params)

    patches = extract_patches(x).astype(bf16)                      # (B, NP, PDIM)
    pe = jnp.einsum('bpk,kd->bpd', patches, w["w_pe"],
                    preferred_element_type=f32) + params["b_pe"]
    cls_tok = jnp.broadcast_to(params["cls"][None, None, :], (B, 1, D))
    xt = jnp.concatenate([cls_tok, pe], axis=1) + params["pos"][None]   # (B,N,D)

    for l in range(DEPTH):
        xn = _layernorm(xt, params["ln1_w"][l], params["ln1_b"][l]).astype(bf16)
        qkv = jnp.einsum('bnd,dk->bnk', xn, w["w_qkv"][l],
                         preferred_element_type=f32)
        q = (qkv[..., 0 * D:1 * D] + w["b_q"][l]).astype(bf16)
        k = (qkv[..., 1 * D:2 * D] + w["b_k"][l]).astype(bf16)
        v = (qkv[..., 2 * D:3 * D] + w["b_v"][l]).astype(bf16)
        q = q.reshape(B, N, H, HD)
        k = k.reshape(B, N, H, HD)
        v = v.reshape(B, N, H, HD)
        s = jnp.einsum('bqhd,bkhd->bhqk', q, k, preferred_element_type=f32)
        p = jax.nn.softmax(s, axis=-1).astype(bf16)
        o = jnp.einsum('bhqk,bkhd->bqhd', p, v,
                       preferred_element_type=f32).reshape(B, N, D).astype(bf16)
        xt = xt + jnp.einsum('bnd,dk->bnk', o, w["w_proj"][l],
                             preferred_element_type=f32) + params["b_proj"][l]
        xn2 = _layernorm(xt, params["ln2_w"][l], params["ln2_b"][l]).astype(bf16)
        h1 = jnp.einsum('bnd,dk->bnk', xn2, w["w_fc1"][l],
                        preferred_element_type=f32) + params["b_fc1"][l]
        g = jax.nn.gelu(h1, approximate=True).astype(bf16)
        xt = xt + jnp.einsum('bnk,kd->bnd', g, w["w_fc2"][l],
                             preferred_element_type=f32) + params["b_fc2"][l]

    tokens = _layernorm(xt, params["lnf_w"], params["lnf_b"])      # (B, N, D)
    sc = jnp.sum(tokens * params["w_attn"][None, None, :], axis=-1,
                 keepdims=True) + params["b_attn"][0]
    wts = jax.nn.softmax(sc, axis=1)
    pooled = jnp.sum(wts * tokens, axis=1)                         # (B, D)
    z = _layernorm(pooled, params["cls_ln_w"], params["cls_ln_b"]).astype(bf16)
    hc = jax.nn.relu(jnp.dot(z, w["w_c1"], preferred_element_type=f32)
                     + params["b_c1"]).astype(bf16)
    return jnp.dot(hc, params["w_c2"].astype(bf16),
                   preferred_element_type=f32) + params["b_c2"]


# ----------------------------------------------------------------- main -----
if __name__ == "__main__":
    key = jax.random.PRNGKey(0)
    pkey, xkey = jax.random.split(key)
    params = make_params(pkey)
    x = jax.random.normal(xkey, (B, C, IMG, IMG), jnp.float32)

    inputs = build_inputs(params, x)
    out = vit_forward_pallas(inputs)
    out = jax.block_until_ready(out)

    ref = vit_reference(params, x)
    assert out.shape == (B, NC), out.shape
    if not jnp.allclose(out, ref, atol=1e-2, rtol=2e-2):
        raise AssertionError(f"kernel/reference mismatch:\n{out}\nvs\n{ref}")
    print("KERNEL_OK")
</pallas_src>

<mosaic_0001>
module attributes {stable_mosaic.version = 11 : i64} {
  func.func @vit_kernel(%arg0: i32, %arg1: i32, %arg2: memref<1x24x192xbf16, #tpu.memory_space<vmem>>, %arg3: memref<24x128xf32, #tpu.memory_space<vmem>>, %arg4: memref<192x128xbf16, #tpu.memory_space<vmem>>, %arg5: memref<1x128x384xbf16, #tpu.memory_space<vmem>>, %arg6: memref<1x128x128xbf16, #tpu.memory_space<vmem>>, %arg7: memref<1x128x512xbf16, #tpu.memory_space<vmem>>, %arg8: memref<1x512x128xbf16, #tpu.memory_space<vmem>>, %arg9: memref<1x9x128xf32, #tpu.memory_space<vmem>>, %arg10: memref<1x1x512xf32, #tpu.memory_space<vmem>>, %arg11: memref<6x128xf32, #tpu.memory_space<vmem>>, %arg12: memref<128x256xbf16, #tpu.memory_space<vmem>>, %arg13: memref<1x256xf32, #tpu.memory_space<vmem>>, %arg14: memref<256x128xbf16, #tpu.memory_space<vmem>>, %arg15: memref<1x8x128xf32, #tpu.memory_space<vmem>>, %arg16: memref<24x128xf32, #tpu.memory_space<vmem>>) attributes {dimension_semantics = [#tpu.dimension_semantics<parallel>, #tpu.dimension_semantics<arbitrary>], iteration_bounds = array<i64: 2, 2>, scalar_prefetch = 0 : i64, scratch_operands = 1 : i64, tpu.core_type = #tpu.core_type<tc>, window_params = [{transform_indices = @transform_0, window_bounds = array<i64: 1, 24, 192>}, {pipeline_mode = #tpu.pipeline_mode<synchronous>, transform_indices = @transform_1, window_bounds = array<i64: 24, 128>}, {pipeline_mode = #tpu.pipeline_mode<synchronous>, transform_indices = @transform_2, window_bounds = array<i64: 192, 128>}, {transform_indices = @transform_3, window_bounds = array<i64: 1, 128, 384>}, {transform_indices = @transform_4, window_bounds = array<i64: 1, 128, 128>}, {transform_indices = @transform_5, window_bounds = array<i64: 1, 128, 512>}, {transform_indices = @transform_6, window_bounds = array<i64: 1, 512, 128>}, {transform_indices = @transform_7, window_bounds = array<i64: 1, 9, 128>}, {transform_indices = @transform_8, window_bounds = array<i64: 1, 1, 512>}, {pipeline_mode = #tpu.pipeline_mode<synchronous>, transform_indices = @transform_9, window_bounds = array<i64: 6, 128>}, {pipeline_mode = #tpu.pipeline_mode<synchronous>, transform_indices = @transform_10, window_bounds = array<i64: 128, 256>}, {pipeline_mode = #tpu.pipeline_mode<synchronous>, transform_indices = @transform_11, window_bounds = array<i64: 1, 256>}, {pipeline_mode = #tpu.pipeline_mode<synchronous>, transform_indices = @transform_12, window_bounds = array<i64: 256, 128>}, {transform_indices = @transform_13, window_bounds = array<i64: 1, 8, 128>}]} {
    %c0_i32 = arith.constant 0 : i32
    %0 = arith.cmpi eq, %arg1, %c0_i32 : i32
    %1 = arith.extui %0 : i1 to i32
    %c0_i32_0 = arith.constant 0 : i32
    %2 = arith.cmpi ne, %1, %c0_i32_0 : i32
    scf.if %2 {
      %c0_58 = arith.constant 0 : index
      %c0_59 = arith.constant 0 : index
      %c0_60 = arith.constant 0 : index
      %189 = vector.load %arg2[%c0_58, %c0_59, %c0_60] : memref<1x24x192xbf16, #tpu.memory_space<vmem>>, vector<1x24x192xbf16>
      %190 = vector.shape_cast %189 : vector<1x24x192xbf16> to vector<24x192xbf16>
      %c0_61 = arith.constant 0 : index
      %c0_62 = arith.constant 0 : index
      %191 = vector.load %arg4[%c0_61, %c0_62] : memref<192x128xbf16, #tpu.memory_space<vmem>>, vector<192x128xbf16>
      %cst_63 = arith.constant dense<0.000000e+00> : vector<24x128xf32>
      %192 = tpu.matmul %190, %191, %cst_63 {dimension_numbers = #tpu.dot_dimension_numbers<[1], [0], [0], [1], [0, 0, 1, 1], [], []>} : vector<24x192xbf16>, vector<192x128xbf16>, vector<24x128xf32> -> vector<24x128xf32>
      %c0_64 = arith.constant 0 : index
      %c0_65 = arith.constant 0 : index
      %193 = vector.load %arg3[%c0_64, %c0_65] : memref<24x128xf32, #tpu.memory_space<vmem>>, vector<24x128xf32>
      %194 = arith.addf %192, %193 : vector<24x128xf32>
      %c0_66 = arith.constant 0 : index
      %c0_67 = arith.constant 0 : index
      %195 = vector.load %arg16[%c0_66, %c0_67] : memref<24x128xf32, #tpu.memory_space<vmem>>, vector<24x128xf32>
      tpu.vector_store %arg16[%c0_66, %c0_67], %194 {strides = array<i32>} : memref<24x128xf32, #tpu.memory_space<vmem>>, vector<24x128xf32>,
    } else {
    }
    %c0 = arith.constant 0 : index
    %c0_1 = arith.constant 0 : index
    %3 = vector.load %arg16[%c0, %c0_1] : memref<24x128xf32, #tpu.memory_space<vmem>>, vector<24x128xf32>
    %c0_2 = arith.constant 0 : index
    %c0_3 = arith.constant 0 : index
    %c0_4 = arith.constant 0 : index
    %4 = vector.load %arg9[%c0_2, %c0_3, %c0_4] : memref<1x9x128xf32, #tpu.memory_space<vmem>>, vector<1x9x128xf32>
    %5 = vector.shape_cast %4 : vector<1x9x128xf32> to vector<9x128xf32>
    %6 = vector.extract_strided_slice %5 {offsets = [0, 0], sizes = [1, 128], strides = [1, 1]} : vector<9x128xf32> to vector<1x128xf32>
    %7 = vector.extract_strided_slice %5 {offsets = [1, 0], sizes = [1, 128], strides = [1, 1]} : vector<9x128xf32> to vector<1x128xf32>
    %8 = vector.extract_strided_slice %5 {offsets = [2, 0], sizes = [1, 128], strides = [1, 1]} : vector<9x128xf32> to vector<1x128xf32>
    %9 = vector.extract_strided_slice %5 {offsets = [3, 0], sizes = [1, 128], strides = [1, 1]} : vector<9x128xf32> to vector<1x128xf32>
    %10 = vector.extract_strided_slice %5 {offsets = [4, 0], sizes = [1, 128], strides = [1, 1]} : vector<9x128xf32> to vector<1x128xf32>
    %11 = vector.extract_strided_slice %5 {offsets = [5, 0], sizes = [1, 128], strides = [1, 1]} : vector<9x128xf32> to vector<1x128xf32>
    %12 = vector.extract_strided_slice %5 {offsets = [6, 0], sizes = [1, 128], strides = [1, 1]} : vector<9x128xf32> to vector<1x128xf32>
    %13 = vector.extract_strided_slice %5 {offsets = [7, 0], sizes = [1, 128], strides = [1, 1]} : vector<9x128xf32> to vector<1x128xf32>
    %14 = vector.extract_strided_slice %5 {offsets = [8, 0], sizes = [1, 128], strides = [1, 1]} : vector<9x128xf32> to vector<1x128xf32>
    %15 = tpu.iota {dimensions = array<i32: 1>} : vector<24x24xi32>
    %c17_i32 = arith.constant 17 : i32
    %16 = vector.broadcast %c17_i32 : i32 to vector<24x24xi32>
    %17 = arith.cmpi slt, %15, %16 : vector<24x24xi32>
    %cst = arith.constant 0.000000e+00 : f32
    %cst_5 = arith.constant -1.000000e+09 : f32
    %18 = vector.broadcast %cst : f32 to vector<24x24xf32>
    %19 = vector.broadcast %cst_5 : f32 to vector<24x24xf32>
    %20 = arith.select %17, %18, %19 : vector<24x24xi1>, vector<24x24xf32>
    %cst_6 = arith.constant dense<0.000000e+00> : vector<24xf32>
    %21 = vector.multi_reduction <add>, %3, %cst_6 [1] : vector<24x128xf32> to vector<24xf32>
    %22 = vector.shape_cast %21 : vector<24xf32> to vector<24x1xf32>
    %cst_7 = arith.constant 1.280000e+02 : f32
    %23 = vector.broadcast %cst_7 : f32 to vector<24x1xf32>
    %24 = arith.divf %22, %23 : vector<24x1xf32>
    %25 = vector.broadcast %24 : vector<24x1xf32> to vector<24x128xf32>
    %26 = arith.subf %3, %25 : vector<24x128xf32>
    %27 = arith.mulf %26, %26 : vector<24x128xf32>
    %cst_8 = arith.constant dense<0.000000e+00> : vector<24xf32>
    %28 = vector.multi_reduction <add>, %27, %cst_8 [1] : vector<24x128xf32> to vector<24xf32>
    %29 = vector.shape_cast %28 : vector<24xf32> to vector<24x1xf32>
    %cst_9 = arith.constant 1.280000e+02 : f32
    %30 = vector.broadcast %cst_9 : f32 to vector<24x1xf32>
    %31 = arith.divf %29, %30 : vector<24x1xf32>
    %32 = vector.broadcast %24 : vector<24x1xf32> to vector<24x128xf32>
    %33 = arith.subf %3, %32 : vector<24x128xf32>
    %cst_10 = arith.constant 9.99999997E-7 : f32
    %34 = vector.broadcast %cst_10 : f32 to vector<24x1xf32>
    %35 = arith.addf %31, %34 : vector<24x1xf32>
    %36 = math.rsqrt %35 : vector<24x1xf32>
    %37 = vector.broadcast %36 : vector<24x1xf32> to vector<24x128xf32>
    %38 = arith.mulf %33, %37 : vector<24x128xf32>
    %39 = vector.broadcast %6 : vector<1x128xf32> to vector<24x128xf32>
    %40 = arith.mulf %38, %39 : vector<24x128xf32>
    %41 = vector.broadcast %7 : vector<1x128xf32> to vector<24x128xf32>
    %42 = arith.addf %40, %41 : vector<24x128xf32>
    %43 = arith.truncf %42 : vector<24x128xf32> to vector<24x128xbf16>
    %c0_11 = arith.constant 0 : index
    %c0_12 = arith.constant 0 : index
    %c0_13 = arith.constant 0 : index
    %44 = vector.load %arg5[%c0_11, %c0_12, %c0_13] : memref<1x128x384xbf16, #tpu.memory_space<vmem>>, vector<1x128x384xbf16>
    %45 = vector.shape_cast %44 : vector<1x128x384xbf16> to vector<128x384xbf16>
    %cst_14 = arith.constant dense<0.000000e+00> : vector<24x384xf32>
    %46 = tpu.matmul %43, %45, %cst_14 {dimension_numbers = #tpu.dot_dimension_numbers<[1], [0], [0], [1], [0, 0, 1, 1], [], []>} : vector<24x128xbf16>, vector<128x384xbf16>, vector<24x384xf32> -> vector<24x384xf32>
    %47 = vector.extract_strided_slice %46 {offsets = [0, 0], sizes = [24, 128], strides = [1, 1]} : vector<24x384xf32> to vector<24x128xf32>
    %48 = vector.broadcast %10 : vector<1x128xf32> to vector<24x128xf32>
    %49 = arith.addf %47, %48 : vector<24x128xf32>
    %50 = arith.truncf %49 : vector<24x128xf32> to vector<24x128xbf16>
    %51 = vector.extract_strided_slice %46 {offsets = [0, 128], sizes = [24, 128], strides = [1, 1]} : vector<24x384xf32> to vector<24x128xf32>
    %52 = vector.broadcast %11 : vector<1x128xf32> to vector<24x128xf32>
    %53 = arith.addf %51, %52 : vector<24x128xf32>
    %54 = arith.truncf %53 : vector<24x128xf32> to vector<24x128xbf16>
    %55 = vector.extract_strided_slice %46 {offsets = [0, 256], sizes = [24, 128], strides = [1, 1]} : vector<24x384xf32> to vector<24x128xf32>
    %56 = vector.broadcast %12 : vector<1x128xf32> to vector<24x128xf32>
    %57 = arith.addf %55, %56 : vector<24x128xf32>
    %58 = arith.truncf %57 : vector<24x128xf32> to vector<24x128xbf16>
    %59 = vector.extract_strided_slice %50 {offsets = [0, 0], sizes = [24, 32], strides = [1, 1]} : vector<24x128xbf16> to vector<24x32xbf16>
    %60 = vector.extract_strided_slice %54 {offsets = [0, 0], sizes = [24, 32], strides = [1, 1]} : vector<24x128xbf16> to vector<24x32xbf16>
    %61 = vector.extract_strided_slice %58 {offsets = [0, 0], sizes = [24, 32], strides = [1, 1]} : vector<24x128xbf16> to vector<24x32xbf16>
    %cst_15 = arith.constant dense<0.000000e+00> : vector<24x24xf32>
    %62 = tpu.matmul %59, %60, %cst_15 {dimension_numbers = #tpu.dot_dimension_numbers<[1], [1], [0], [0], [0, 0, 1, 0], [], []>} : vector<24x32xbf16>, vector<24x32xbf16>, vector<24x24xf32> -> vector<24x24xf32>
    %63 = arith.addf %62, %20 : vector<24x24xf32>
    %cst_16 = arith.constant dense<0xFF800000> : vector<24xf32>
    %64 = vector.multi_reduction <maximumf>, %63, %cst_16 [1] : vector<24x24xf32> to vector<24xf32>
    %65 = vector.shape_cast %64 : vector<24xf32> to vector<24x1xf32>
    %66 = vector.broadcast %65 : vector<24x1xf32> to vector<24x24xf32>
    %67 = arith.subf %63, %66 : vector<24x24xf32>
    %68 = math.exp %67 : vector<24x24xf32>
    %cst_17 = arith.constant dense<0.000000e+00> : vector<24xf32>
    %69 = vector.multi_reduction <add>, %68, %cst_17 [1] : vector<24x24xf32> to vector<24xf32>
    %70 = vector.shape_cast %69 : vector<24xf32> to vector<24x1xf32>
    %71 = tpu.reciprocal %70 {approx = true} : vector<24x1xf32> -> vector<24x1xf32>
    %72 = vector.broadcast %71 : vector<24x1xf32> to vector<24x24xf32>
    %73 = arith.mulf %68, %72 : vector<24x24xf32>
    %74 = arith.truncf %73 : vector<24x24xf32> to vector<24x24xbf16>
    %cst_18 = arith.constant dense<0.000000e+00> : vector<24x32xf32>
    %75 = tpu.matmul %74, %61, %cst_18 {dimension_numbers = #tpu.dot_dimension_numbers<[1], [0], [0], [1], [0, 0, 1, 1], [], []>} : vector<24x24xbf16>, vector<24x32xbf16>, vector<24x32xf32> -> vector<24x32xf32>
    %76 = vector.extract_strided_slice %50 {offsets = [0, 32], sizes = [24, 32], strides = [1, 1]} : vector<24x128xbf16> to vector<24x32xbf16>
    %77 = vector.extract_strided_slice %54 {offsets = [0, 32], sizes = [24, 32], strides = [1, 1]} : vector<24x128xbf16> to vector<24x32xbf16>
    %78 = vector.extract_strided_slice %58 {offsets = [0, 32], sizes = [24, 32], strides = [1, 1]} : vector<24x128xbf16> to vector<24x32xbf16>
    %cst_19 = arith.constant dense<0.000000e+00> : vector<24x24xf32>
    %79 = tpu.matmul %76, %77, %cst_19 {dimension_numbers = #tpu.dot_dimension_numbers<[1], [1], [0], [0], [0, 0, 1, 0], [], []>} : vector<24x32xbf16>, vector<24x32xbf16>, vector<24x24xf32> -> vector<24x24xf32>
    %80 = arith.addf %79, %20 : vector<24x24xf32>
    %cst_20 = arith.constant dense<0xFF800000> : vector<24xf32>
    %81 = vector.multi_reduction <maximumf>, %80, %cst_20 [1] : vector<24x24xf32> to vector<24xf32>
    %82 = vector.shape_cast %81 : vector<24xf32> to vector<24x1xf32>
    %83 = vector.broadcast %82 : vector<24x1xf32> to vector<24x24xf32>
    %84 = arith.subf %80, %83 : vector<24x24xf32>
    %85 = math.exp %84 : vector<24x24xf32>
    %cst_21 = arith.constant dense<0.000000e+00> : vector<24xf32>
    %86 = vector.multi_reduction <add>, %85, %cst_21 [1] : vector<24x24xf32> to vector<24xf32>
    %87 = vector.shape_cast %86 : vector<24xf32> to vector<24x1xf32>
    %88 = tpu.reciprocal %87 {approx = true} : vector<24x1xf32> -> vector<24x1xf32>
    %89 = vector.broadcast %88 : vector<24x1xf32> to vector<24x24xf32>
    %90 = arith.mulf %85, %89 : vector<24x24xf32>
    %91 = arith.truncf %90 : vector<24x24xf32> to vector<24x24xbf16>
    %cst_22 = arith.constant dense<0.000000e+00> : vector<24x32xf32>
    %92 = tpu.matmul %91, %78, %cst_22 {dimension_numbers = #tpu.dot_dimension_numbers<[1], [0], [0], [1], [0, 0, 1, 1], [], []>} : vector<24x24xbf16>, vector<24x32xbf16>, vector<24x32xf32> -> vector<24x32xf32>
    %93 = vector.extract_strided_slice %50 {offsets = [0, 64], sizes = [24, 32], strides = [1, 1]} : vector<24x128xbf16> to vector<24x32xbf16>
    %94 = vector.extract_strided_slice %54 {offsets = [0, 64], sizes = [24, 32], strides = [1, 1]} : vector<24x128xbf16> to vector<24x32xbf16>
    %95 = vector.extract_strided_slice %58 {offsets = [0, 64], sizes = [24, 32], strides = [1, 1]} : vector<24x128xbf16> to vector<24x32xbf16>
    %cst_23 = arith.constant dense<0.000000e+00> : vector<24x24xf32>
    %96 = tpu.matmul %93, %94, %cst_23 {dimension_numbers = #tpu.dot_dimension_numbers<[1], [1], [0], [0], [0, 0, 1, 0], [], []>} : vector<24x32xbf16>, vector<24x32xbf16>, vector<24x24xf32> -> vector<24x24xf32>
    %97 = arith.addf %96, %20 : vector<24x24xf32>
    %cst_24 = arith.constant dense<0xFF800000> : vector<24xf32>
    %98 = vector.multi_reduction <maximumf>, %97, %cst_24 [1] : vector<24x24xf32> to vector<24xf32>
    %99 = vector.shape_cast %98 : vector<24xf32> to vector<24x1xf32>
    %100 = vector.broadcast %99 : vector<24x1xf32> to vector<24x24xf32>
    %101 = arith.subf %97, %100 : vector<24x24xf32>
    %102 = math.exp %101 : vector<24x24xf32>
    %cst_25 = arith.constant dense<0.000000e+00> : vector<24xf32>
    %103 = vector.multi_reduction <add>, %102, %cst_25 [1] : vector<24x24xf32> to vector<24xf32>
    %104 = vector.shape_cast %103 : vector<24xf32> to vector<24x1xf32>
    %105 = tpu.reciprocal %104 {approx = true} : vector<24x1xf32> -> vector<24x1xf32>
    %106 = vector.broadcast %105 : vector<24x1xf32> to vector<24x24xf32>
    %107 = arith.mulf %102, %106 : vector<24x24xf32>
    %108 = arith.truncf %107 : vector<24x24xf32> to vector<24x24xbf16>
    %cst_26 = arith.constant dense<0.000000e+00> : vector<24x32xf32>
    %109 = tpu.matmul %108, %95, %cst_26 {dimension_numbers = #tpu.dot_dimension_numbers<[1], [0], [0], [1], [0, 0, 1, 1], [], []>} : vector<24x24xbf16>, vector<24x32xbf16>, vector<24x32xf32> -> vector<24x32xf32>
    %110 = vector.extract_strided_slice %50 {offsets = [0, 96], sizes = [24, 32], strides = [1, 1]} : vector<24x128xbf16> to vector<24x32xbf16>
    %111 = vector.extract_strided_slice %54 {offsets = [0, 96], sizes = [24, 32], strides = [1, 1]} : vector<24x128xbf16> to vector<24x32xbf16>
    %112 = vector.extract_strided_slice %58 {offsets = [0, 96], sizes = [24, 32], strides = [1, 1]} : vector<24x128xbf16> to vector<24x32xbf16>
    %cst_27 = arith.constant dense<0.000000e+00> : vector<24x24xf32>
    %113 = tpu.matmul %110, %111, %cst_27 {dimension_numbers = #tpu.dot_dimension_numbers<[1], [1], [0], [0], [0, 0, 1, 0], [], []>} : vector<24x32xbf16>, vector<24x32xbf16>, vector<24x24xf32> -> vector<24x24xf32>
    %114 = arith.addf %113, %20 : vector<24x24xf32>
    %cst_28 = arith.constant dense<0xFF800000> : vector<24xf32>
    %115 = vector.multi_reduction <maximumf>, %114, %cst_28 [1] : vector<24x24xf32> to vector<24xf32>
    %116 = vector.shape_cast %115 : vector<24xf32> to vector<24x1xf32>
    %117 = vector.broadcast %116 : vector<24x1xf32> to vector<24x24xf32>
    %118 = arith.subf %114, %117 : vector<24x24xf32>
    %119 = math.exp %118 : vector<24x24xf32>
    %cst_29 = arith.constant dense<0.000000e+00> : vector<24xf32>
    %120 = vector.multi_reduction <add>, %119, %cst_29 [1] : vector<24x24xf32> to vector<24xf32>
    %121 = vector.shape_cast %120 : vector<24xf32> to vector<24x1xf32>
    %122 = tpu.reciprocal %121 {approx = true} : vector<24x1xf32> -> vector<24x1xf32>
    %123 = vector.broadcast %122 : vector<24x1xf32> to vector<24x24xf32>
    %124 = arith.mulf %119, %123 : vector<24x24xf32>
    %125 = arith.truncf %124 : vector<24x24xf32> to vector<24x24xbf16>
    %cst_30 = arith.constant dense<0.000000e+00> : vector<24x32xf32>
    %126 = tpu.matmul %125, %112, %cst_30 {dimension_numbers = #tpu.dot_dimension_numbers<[1], [0], [0], [1], [0, 0, 1, 1], [], []>} : vector<24x24xbf16>, vector<24x32xbf16>, vector<24x32xf32> -> vector<24x32xf32>
    %127 = tpu.concatenate %75, %92, %109, %126 in 1 : vector<24x32xf32>, vector<24x32xf32>, vector<24x32xf32>, vector<24x32xf32> -> vector<24x128xf32>
    %128 = arith.truncf %127 : vector<24x128xf32> to vector<24x128xbf16>
    %c0_31 = arith.constant 0 : index
    %c0_32 = arith.constant 0 : index
    %c0_33 = arith.constant 0 : index
    %129 = vector.load %arg6[%c0_31, %c0_32, %c0_33] : memref<1x128x128xbf16, #tpu.memory_space<vmem>>, vector<1x128x128xbf16>
    %130 = vector.shape_cast %129 : vector<1x128x128xbf16> to vector<128x128xbf16>
    %cst_34 = arith.constant dense<0.000000e+00> : vector<24x128xf32>
    %131 = tpu.matmul %128, %130, %cst_34 {dimension_numbers = #tpu.dot_dimension_numbers<[1], [0], [0], [1], [0, 0, 1, 1], [], []>} : vector<24x128xbf16>, vector<128x128xbf16>, vector<24x128xf32> -> vector<24x128xf32>
    %132 = vector.broadcast %13 : vector<1x128xf32> to vector<24x128xf32>
    %133 = arith.addf %131, %132 : vector<24x128xf32>
    %134 = arith.addf %3, %133 : vector<24x128xf32>
    %cst_35 = arith.constant dense<0.000000e+00> : vector<24xf32>
    %135 = vector.multi_reduction <add>, %134, %cst_35 [1] : vector<24x128xf32> to vector<24xf32>
    %136 = vector.shape_cast %135 : vector<24xf32> to vector<24x1xf32>
    %cst_36 = arith.constant 1.280000e+02 : f32
    %137 = vector.broadcast %cst_36 : f32 to vector<24x1xf32>
    %138 = arith.divf %136, %137 : vector<24x1xf32>
    %139 = vector.broadcast %138 : vector<24x1xf32> to vector<24x128xf32>
    %140 = arith.subf %134, %139 : vector<24x128xf32>
    %141 = arith.mulf %140, %140 : vector<24x128xf32>
    %cst_37 = arith.constant dense<0.000000e+00> : vector<24xf32>
    %142 = vector.multi_reduction <add>, %141, %cst_37 [1] : vector<24x128xf32> to vector<24xf32>
    %143 = vector.shape_cast %142 : vector<24xf32> to vector<24x1xf32>
    %cst_38 = arith.constant 1.280000e+02 : f32
    %144 = vector.broadcast %cst_38 : f32 to vector<24x1xf32>
    %145 = arith.divf %143, %144 : vector<24x1xf32>
    %146 = vector.broadcast %138 : vector<24x1xf32> to vector<24x128xf32>
    %147 = arith.subf %134, %146 : vector<24x128xf32>
    %cst_39 = arith.constant 9.99999997E-7 : f32
    %148 = vector.broadcast %cst_39 : f32 to vector<24x1xf32>
    %149 = arith.addf %145, %148 : vector<24x1xf32>
    %150 = math.rsqrt %149 : vector<24x1xf32>
    %151 = vector.broadcast %150 : vector<24x1xf32> to vector<24x128xf32>
    %152 = arith.mulf %147, %151 : vector<24x128xf32>
    %153 = vector.broadcast %8 : vector<1x128xf32> to vector<24x128xf32>
    %154 = arith.mulf %152, %153 : vector<24x128xf32>
    %155 = vector.broadcast %9 : vector<1x128xf32> to vector<24x128xf32>
    %156 = arith.addf %154, %155 : vector<24x128xf32>
    %157 = arith.truncf %156 : vector<24x128xf32> to vector<24x128xbf16>
    %c0_40 = arith.constant 0 : index
    %c0_41 = arith.constant 0 : index
    %c0_42 = arith.constant 0 : index
    %158 = vector.load %arg7[%c0_40, %c0_41, %c0_42] : memref<1x128x512xbf16, #tpu.memory_space<vmem>>, vector<1x128x512xbf16>
    %159 = vector.shape_cast %158 : vector<1x128x512xbf16> to vector<128x512xbf16>
    %cst_43 = arith.constant dense<0.000000e+00> : vector<24x512xf32>
    %160 = tpu.matmul %157, %159, %cst_43 {dimension_numbers = #tpu.dot_dimension_numbers<[1], [0], [0], [1], [0, 0, 1, 1], [], []>} : vector<24x128xbf16>, vector<128x512xbf16>, vector<24x512xf32> -> vector<24x512xf32>
    %c0_44 = arith.constant 0 : index
    %c0_45 = arith.constant 0 : index
    %c0_46 = arith.constant 0 : index
    %161 = vector.load %arg10[%c0_44, %c0_45, %c0_46] : memref<1x1x512xf32, #tpu.memory_space<vmem>>, vector<1x1x512xf32>
    %162 = vector.shape_cast %161 : vector<1x1x512xf32> to vector<1x512xf32>
    %163 = vector.broadcast %162 : vector<1x512xf32> to vector<24x512xf32>
    %164 = arith.addf %160, %163 : vector<24x512xf32>
    %165 = arith.mulf %164, %164 : vector<24x512xf32>
    %166 = arith.mulf %164, %165 : vector<24x512xf32>
    %cst_47 = arith.constant 4.471500e-02 : f32
    %167 = vector.broadcast %cst_47 : f32 to vector<24x512xf32>
    %168 = arith.mulf %167, %166 : vector<24x512xf32>
    %169 = arith.addf %164, %168 : vector<24x512xf32>
    %cst_48 = arith.constant 0.797884583 : f32
    %170 = vector.broadcast %cst_48 : f32 to vector<24x512xf32>
    %171 = arith.mulf %170, %169 : vector<24x512xf32>
    %172 = math.tanh %171 : vector<24x512xf32>
    %cst_49 = arith.constant 1.000000e+00 : f32
    %173 = vector.broadcast %cst_49 : f32 to vector<24x512xf32>
    %174 = arith.addf %173, %172 : vector<24x512xf32>
    %cst_50 = arith.constant 5.000000e-01 : f32
    %175 = vector.broadcast %cst_50 : f32 to vector<24x512xf32>
    %176 = arith.mulf %175, %174 : vector<24x512xf32>
    %177 = arith.mulf %164, %176 : vector<24x512xf32>
    %178 = arith.truncf %177 : vector<24x512xf32> to vector<24x512xbf16>
    %c0_51 = arith.constant 0 : index
    %c0_52 = arith.constant 0 : index
    %c0_53 = arith.constant 0 : index
    %179 = vector.load %arg8[%c0_51, %c0_52, %c0_53] : memref<1x512x128xbf16, #tpu.memory_space<vmem>>, vector<1x512x128xbf16>
    %180 = vector.shape_cast %179 : vector<1x512x128xbf16> to vector<512x128xbf16>
    %cst_54 = arith.constant dense<0.000000e+00> : vector<24x128xf32>
    %181 = tpu.matmul %178, %180, %cst_54 {dimension_numbers = #tpu.dot_dimension_numbers<[1], [0], [0], [1], [0, 0, 1, 1], [], []>} : vector<24x512xbf16>, vector<512x128xbf16>, vector<24x128xf32> -> vector<24x128xf32>
    %182 = vector.broadcast %14 : vector<1x128xf32> to vector<24x128xf32>
    %183 = arith.addf %181, %182 : vector<24x128xf32>
    %184 = arith.addf %134, %183 : vector<24x128xf32>
    %c0_55 = arith.constant 0 : index
    %c0_56 = arith.constant 0 : index
    %185 = vector.load %arg16[%c0_55, %c0_56] : memref<24x128xf32, #tpu.memory_space<vmem>>, vector<24x128xf32>
    tpu.vector_store %arg16[%c0_55, %c0_56], %184 {strides = array<i32>} : memref<24x128xf32, #tpu.memory_space<vmem>>, vector<24x128xf32>,
    %c1_i32 = arith.constant 1 : i32
    %186 = arith.cmpi eq, %arg1, %c1_i32 : i32
    %187 = arith.extui %186 : i1 to i32
    %c0_i32_57 = arith.constant 0 : i32
    %188 = arith.cmpi ne, %187, %c0_i32_57 : i32
    scf.if %188 {
      %c0_58 = arith.constant 0 : index
      %c0_59 = arith.constant 0 : index
      %189 = vector.load %arg11[%c0_58, %c0_59] : memref<6x128xf32, #tpu.memory_space<vmem>>, vector<6x128xf32>
      %190 = vector.extract_strided_slice %189 {offsets = [0, 0], sizes = [1, 128], strides = [1, 1]} : vector<6x128xf32> to vector<1x128xf32>
      %191 = vector.extract_strided_slice %189 {offsets = [1, 0], sizes = [1, 128], strides = [1, 1]} : vector<6x128xf32> to vector<1x128xf32>
      %192 = vector.extract_strided_slice %189 {offsets = [2, 0], sizes = [1, 128], strides = [1, 1]} : vector<6x128xf32> to vector<1x128xf32>
      %193 = vector.extract_strided_slice %189 {offsets = [3, 0], sizes = [1, 128], strides = [1, 1]} : vector<6x128xf32> to vector<1x128xf32>
      %194 = vector.extract_strided_slice %189 {offsets = [4, 0], sizes = [1, 128], strides = [1, 1]} : vector<6x128xf32> to vector<1x128xf32>
      %195 = vector.extract_strided_slice %189 {offsets = [5, 0], sizes = [1, 128], strides = [1, 1]} : vector<6x128xf32> to vector<1x128xf32>
      %cst_60 = arith.constant dense<0.000000e+00> : vector<24xf32>
      %196 = vector.multi_reduction <add>, %184, %cst_60 [1] : vector<24x128xf32> to vector<24xf32>
      %197 = vector.shape_cast %196 : vector<24xf32> to vector<24x1xf32>
      %cst_61 = arith.constant 1.280000e+02 : f32
      %198 = vector.broadcast %cst_61 : f32 to vector<24x1xf32>
      %199 = arith.divf %197, %198 : vector<24x1xf32>
      %200 = vector.broadcast %199 : vector<24x1xf32> to vector<24x128xf32>
      %201 = arith.subf %184, %200 : vector<24x128xf32>
      %202 = arith.mulf %201, %201 : vector<24x128xf32>
      %cst_62 = arith.constant dense<0.000000e+00> : vector<24xf32>
      %203 = vector.multi_reduction <add>, %202, %cst_62 [1] : vector<24x128xf32> to vector<24xf32>
      %204 = vector.shape_cast %203 : vector<24xf32> to vector<24x1xf32>
      %cst_63 = arith.constant 1.280000e+02 : f32
      %205 = vector.broadcast %cst_63 : f32 to vector<24x1xf32>
      %206 = arith.divf %204, %205 : vector<24x1xf32>
      %207 = vector.broadcast %199 : vector<24x1xf32> to vector<24x128xf32>
      %208 = arith.subf %184, %207 : vector<24x128xf32>
      %cst_64 = arith.constant 9.99999997E-7 : f32
      %209 = vector.broadcast %cst_64 : f32 to vector<24x1xf32>
      %210 = arith.addf %206, %209 : vector<24x1xf32>
      %211 = math.rsqrt %210 : vector<24x1xf32>
      %212 = vector.broadcast %211 : vector<24x1xf32> to vector<24x128xf32>
      %213 = arith.mulf %208, %212 : vector<24x128xf32>
      %214 = vector.broadcast %190 : vector<1x128xf32> to vector<24x128xf32>
      %215 = arith.mulf %213, %214 : vector<24x128xf32>
      %216 = vector.broadcast %191 : vector<1x128xf32> to vector<24x128xf32>
      %217 = arith.addf %215, %216 : vector<24x128xf32>
      %218 = vector.broadcast %192 : vector<1x128xf32> to vector<24x128xf32>
      %219 = arith.mulf %217, %218 : vector<24x128xf32>
      %cst_65 = arith.constant dense<0.000000e+00> : vector<24xf32>
      %220 = vector.multi_reduction <add>, %219, %cst_65 [1] : vector<24x128xf32> to vector<24xf32>
      %221 = vector.shape_cast %220 : vector<24xf32> to vector<24x1xf32>
      %222 = tpu.iota {dimensions = array<i32: 0>} : vector<24x1xi32>
      %c17_i32_66 = arith.constant 17 : i32
      %223 = vector.broadcast %c17_i32_66 : i32 to vector<24x1xi32>
      %224 = arith.cmpi slt, %222, %223 : vector<24x1xi32>
      %cst_67 = arith.constant -1.000000e+09 : f32
      %225 = vector.broadcast %cst_67 : f32 to vector<24x1xf32>
      %226 = arith.select %224, %221, %225 : vector<24x1xi1>, vector<24x1xf32>
      %cst_68 = arith.constant dense<0xFF800000> : vector<1xf32>
      %227 = vector.multi_reduction <maximumf>, %226, %cst_68 [0] : vector<24x1xf32> to vector<1xf32>
      %228 = vector.shape_cast %227 : vector<1xf32> to vector<1x1xf32>
      %229 = vector.broadcast %228 : vector<1x1xf32> to vector<24x1xf32>
      %230 = arith.subf %226, %229 : vector<24x1xf32>
      %231 = math.exp %230 : vector<24x1xf32>
      %cst_69 = arith.constant dense<0.000000e+00> : vector<1xf32>
      %232 = vector.multi_reduction <add>, %231, %cst_69 [0] : vector<24x1xf32> to vector<1xf32>
      %233 = vector.shape_cast %232 : vector<1xf32> to vector<1x1xf32>
      %234 = tpu.reciprocal %233 {approx = true} : vector<1x1xf32> -> vector<1x1xf32>
      %235 = vector.broadcast %234 : vector<1x1xf32> to vector<24x1xf32>
      %236 = arith.mulf %231, %235 : vector<24x1xf32>
      %237 = vector.broadcast %236 : vector<24x1xf32> to vector<24x128xf32>
      %238 = arith.mulf %237, %217 : vector<24x128xf32>
      %cst_70 = arith.constant dense<0.000000e+00> : vector<128xf32>
      %239 = vector.multi_reduction <add>, %238, %cst_70 [0] : vector<24x128xf32> to vector<128xf32>
      %240 = vector.shape_cast %239 : vector<128xf32> to vector<1x128xf32>
      %cst_71 = arith.constant dense<0.000000e+00> : vector<1xf32>
      %241 = vector.multi_reduction <add>, %240, %cst_71 [1] : vector<1x128xf32> to vector<1xf32>
      %242 = vector.shape_cast %241 : vector<1xf32> to vector<1x1xf32>
      %cst_72 = arith.constant 1.280000e+02 : f32
      %243 = vector.broadcast %cst_72 : f32 to vector<1x1xf32>
      %244 = arith.divf %242, %243 : vector<1x1xf32>
      %245 = vector.broadcast %244 : vector<1x1xf32> to vector<1x128xf32>
      %246 = arith.subf %240, %245 : vector<1x128xf32>
      %247 = arith.mulf %246, %246 : vector<1x128xf32>
      %cst_73 = arith.constant dense<0.000000e+00> : vector<1xf32>
      %248 = vector.multi_reduction <add>, %247, %cst_73 [1] : vector<1x128xf32> to vector<1xf32>
      %249 = vector.shape_cast %248 : vector<1xf32> to vector<1x1xf32>
      %cst_74 = arith.constant 1.280000e+02 : f32
      %250 = vector.broadcast %cst_74 : f32 to vector<1x1xf32>
      %251 = arith.divf %249, %250 : vector<1x1xf32>
      %252 = vector.broadcast %244 : vector<1x1xf32> to vector<1x128xf32>
      %253 = arith.subf %240, %252 : vector<1x128xf32>
      %cst_75 = arith.constant 9.99999997E-7 : f32
      %254 = vector.broadcast %cst_75 : f32 to vector<1x1xf32>
      %255 = arith.addf %251, %254 : vector<1x1xf32>
      %256 = math.rsqrt %255 : vector<1x1xf32>
      %257 = vector.broadcast %256 : vector<1x1xf32> to vector<1x128xf32>
      %258 = arith.mulf %253, %257 : vector<1x128xf32>
      %259 = arith.mulf %258, %193 : vector<1x128xf32>
      %260 = arith.addf %259, %194 : vector<1x128xf32>
      %261 = arith.truncf %260 : vector<1x128xf32> to vector<1x128xbf16>
      %c0_76 = arith.constant 0 : index
      %c0_77 = arith.constant 0 : index
      %262 = vector.load %arg12[%c0_76, %c0_77] : memref<128x256xbf16, #tpu.memory_space<vmem>>, vector<128x256xbf16>
      %cst_78 = arith.constant dense<0.000000e+00> : vector<1x256xf32>
      %263 = tpu.matmul %261, %262, %cst_78 {dimension_numbers = #tpu.dot_dimension_numbers<[1], [0], [0], [1], [0, 0, 1, 1], [], []>} : vector<1x128xbf16>, vector<128x256xbf16>, vector<1x256xf32> -> vector<1x256xf32>
      %c0_79 = arith.constant 0 : index
      %c0_80 = arith.constant 0 : index
      %264 = vector.load %arg13[%c0_79, %c0_80] : memref<1x256xf32, #tpu.memory_space<vmem>>, vector<1x256xf32>
      %265 = arith.addf %263, %264 : vector<1x256xf32>
      %cst_81 = arith.constant 0.000000e+00 : f32
      %266 = vector.broadcast %cst_81 : f32 to vector<1x256xf32>
      %267 = arith.maximumf %265, %266 : vector<1x256xf32>
      %268 = arith.truncf %267 : vector<1x256xf32> to vector<1x256xbf16>
      %c0_82 = arith.constant 0 : index
      %c0_83 = arith.constant 0 : index
      %269 = vector.load %arg14[%c0_82, %c0_83] : memref<256x128xbf16, #tpu.memory_space<vmem>>, vector<256x128xbf16>
      %cst_84 = arith.constant dense<0.000000e+00> : vector<1x128xf32>
      %270 = tpu.matmul %268, %269, %cst_84 {dimension_numbers = #tpu.dot_dimension_numbers<[1], [0], [0], [1], [0, 0, 1, 1], [], []>} : vector<1x256xbf16>, vector<256x128xbf16>, vector<1x128xf32> -> vector<1x128xf32>
      %271 = arith.addf %270, %195 : vector<1x128xf32>
      %272 = vector.shape_cast %271 : vector<1x128xf32> to vector<1x128xf32>
      %273 = vector.broadcast %272 : vector<1x128xf32> to vector<8x128xf32>
      %c0_85 = arith.constant 0 : index
      %c0_86 = arith.constant 0 : index
      %c0_87 = arith.constant 0 : index
      %274 = vector.load %arg15[%c0_85, %c0_86, %c0_87] : memref<1x8x128xf32, #tpu.memory_space<vmem>>, vector<1x8x128xf32>
      %275 = vector.shape_cast %274 : vector<1x8x128xf32> to vector<8x128xf32>
      %276 = vector.shape_cast %273 : vector<8x128xf32> to vector<1x8x128xf32>
      tpu.vector_store %arg15[%c0_85, %c0_86, %c0_87], %276 {strides = array<i32>} : memref<1x8x128xf32, #tpu.memory_space<vmem>>, vector<1x8x128xf32>,
    } else {
    }
    return
  }
  func.func @transform_0(%arg0: i32, %arg1: i32) -> (i32, i32, i32) {
    %c0_i32 = arith.constant 0 : i32
    %c0_i32_0 = arith.constant 0 : i32
    %c0_i32_1 = arith.constant 0 : i32
    return %arg0, %c0_i32, %c0_i32_0 : i32, i32, i32
  }
  func.func @transform_1(%arg0: i32, %arg1: i32) -> (i32, i32) {
    %c0_i32 = arith.constant 0 : i32
    %c0_i32_0 = arith.constant 0 : i32
    %c0_i32_1 = arith.constant 0 : i32
    return %c0_i32, %c0_i32_0 : i32, i32
  }
  func.func @transform_2(%arg0: i32, %arg1: i32) -> (i32, i32) {
    %c0_i32 = arith.constant 0 : i32
    %c0_i32_0 = arith.constant 0 : i32
    %c0_i32_1 = arith.constant 0 : i32
    return %c0_i32, %c0_i32_0 : i32, i32
  }
  func.func @transform_3(%arg0: i32, %arg1: i32) -> (i32, i32, i32) {
    %c0_i32 = arith.constant 0 : i32
    %c0_i32_0 = arith.constant 0 : i32
    %c0_i32_1 = arith.constant 0 : i32
    return %arg1, %c0_i32, %c0_i32_0 : i32, i32, i32
  }
  func.func @transform_4(%arg0: i32, %arg1: i32) -> (i32, i32, i32) {
    %c0_i32 = arith.constant 0 : i32
    %c0_i32_0 = arith.constant 0 : i32
    %c0_i32_1 = arith.constant 0 : i32
    return %arg1, %c0_i32, %c0_i32_0 : i32, i32, i32
  }
  func.func @transform_5(%arg0: i32, %arg1: i32) -> (i32, i32, i32) {
    %c0_i32 = arith.constant 0 : i32
    %c0_i32_0 = arith.constant 0 : i32
    %c0_i32_1 = arith.constant 0 : i32
    return %arg1, %c0_i32, %c0_i32_0 : i32, i32, i32
  }
  func.func @transform_6(%arg0: i32, %arg1: i32) -> (i32, i32, i32) {
    %c0_i32 = arith.constant 0 : i32
    %c0_i32_0 = arith.constant 0 : i32
    %c0_i32_1 = arith.constant 0 : i32
    return %arg1, %c0_i32, %c0_i32_0 : i32, i32, i32
  }
  func.func @transform_7(%arg0: i32, %arg1: i32) -> (i32, i32, i32) {
    %c0_i32 = arith.constant 0 : i32
    %c0_i32_0 = arith.constant 0 : i32
    %c0_i32_1 = arith.constant 0 : i32
    return %arg1, %c0_i32, %c0_i32_0 : i32, i32, i32
  }
  func.func @transform_8(%arg0: i32, %arg1: i32) -> (i32, i32, i32) {
    %c0_i32 = arith.constant 0 : i32
    %c0_i32_0 = arith.constant 0 : i32
    %c0_i32_1 = arith.constant 0 : i32
    return %arg1, %c0_i32, %c0_i32_0 : i32, i32, i32
  }
  func.func @transform_9(%arg0: i32, %arg1: i32) -> (i32, i32) {
    %c0_i32 = arith.constant 0 : i32
    %c0_i32_0 = arith.constant 0 : i32
    %c0_i32_1 = arith.constant 0 : i32
    return %c0_i32, %c0_i32_0 : i32, i32
  }
  func.func @transform_10(%arg0: i32, %arg1: i32) -> (i32, i32) {
    %c0_i32 = arith.constant 0 : i32
    %c0_i32_0 = arith.constant 0 : i32
    %c0_i32_1 = arith.constant 0 : i32
    return %c0_i32, %c0_i32_0 : i32, i32
  }
  func.func @transform_11(%arg0: i32, %arg1: i32) -> (i32, i32) {
    %c0_i32 = arith.constant 0 : i32
    %c0_i32_0 = arith.constant 0 : i32
    %c0_i32_1 = arith.constant 0 : i32
    return %c0_i32, %c0_i32_0 : i32, i32
  }
  func.func @transform_12(%arg0: i32, %arg1: i32) -> (i32, i32) {
    %c0_i32 = arith.constant 0 : i32
    %c0_i32_0 = arith.constant 0 : i32
    %c0_i32_1 = arith.constant 0 : i32
    return %c0_i32, %c0_i32_0 : i32, i32
  }
  func.func @transform_13(%arg0: i32, %arg1: i32) -> (i32, i32, i32) {
    %c0_i32 = arith.constant 0 : i32
    %c0_i32_0 = arith.constant 0 : i32
    %c0_i32_1 = arith.constant 0 : i32
    return %arg0, %c0_i32, %c0_i32_0 : i32, i32, i32
  }
}

</mosaic_0001>

<bundles_post_ra>
// kernel: tpu_custom_call.1
= control target key start
LH: loop header
LB: loop body
LE: loop exit
PB: predicated region body
PF: predicated region fallthrough
CT: control target
= control target key end

     0   :  { %s5969_s0 = inlined_call_operand.vmem [shape: bf16[2,24,192], index: 0, kind: input, shape index: {}]   ;;  %s5970_s1 = inlined_call_operand.hbm [shape: f32[24,128], index: 1, kind: input, shape index: {}]   ;;  %s5971_s2 = inlined_call_operand.hbm [shape: bf16[192,128], index: 2, kind: input, shape index: {}]   ;;  %s5972_s3 = inlined_call_operand.hbm [shape: bf16[2,128,384], index: 3, kind: input, shape index: {}]   ;;  %s5973_s4 = inlined_call_operand.hbm [shape: bf16[2,128,128], index: 4, kind: input, shape index: {}]   ;;  %s5974_s5 = inlined_call_operand.hbm [shape: bf16[2,128,512], index: 5, kind: input, shape index: {}]   ;;  %s5975_s6 = inlined_call_operand.hbm [shape: bf16[2,512,128], index: 6, kind: input, shape index: {}]   ;;  %s5976_s7 = inlined_call_operand.vmem [shape: f32[2,9,128], index: 7, kind: input, shape index: {}]   ;;  %s5977_s8 = inlined_call_operand.vmem [shape: f32[2,1,512], index: 8, kind: input, shape index: {}]   ;;  %s5978_s9 = inlined_call_operand.vmem [shape: f32[6,128], index: 9, kind: input, shape index: {}]   ;;  %s5979_s10 = inlined_call_operand.hbm [shape: bf16[128,256], index: 10, kind: input, shape index: {}]   ;;  %s5980_s11 = inlined_call_operand.vmem [shape: f32[1,256], index: 11, kind: input, shape index: {}]   ;;  %s5981_s12 = inlined_call_operand.hbm [shape: bf16[256,128], index: 12, kind: input, shape index: {}]   ;;  %s5982_s13 = inlined_call_operand.hbm [shape: f32[2,8,128], index: 13, kind: output, shape index: {}]  }
   0x1   :  { %6016 = sst [smem:[#allocation35_spill]] %s5969_s0 }
   0x2   :  { %6017 = sst [smem:[#allocation36_spill]] %s5970_s1 }
   0x3   :  { %6018 = sst [smem:[#allocation37_spill]] %s5971_s2 }
   0x4   :  { %6019 = sst [smem:[#allocation38_spill]] %s5972_s3 }
   0x5   :  { %6020 = sst [smem:[#allocation39_spill]] %s5973_s4 }
   0x6   :  { %6021 = sst [smem:[#allocation40_spill]] %s5976_s7 }
   0x7   :  { %6022 = sst [smem:[#allocation41_spill]] %s5977_s8 }
   0x8   :  { %6023 = sst [smem:[#allocation42_spill]] %s5978_s9 }
   0x9   :  { %6024 = sst [smem:[#allocation43_spill]] %s5980_s11 }
   0xa   :  { %6025 = sst [smem:[#allocation44_spill]] %s5982_s13 }
   0xb   :  { %18 = vsyncpa [#allocation4], 0 }
   0xc   :  { %19 = vsyncpa [#allocation7], 0 }
   0xd   :  { %20 = vsyncpa [#allocation14], 0 }
   0xe   :  { %21 = vsyncpa [#allocation5], 0 }
   0xf   :  { %23 = vsyncpa [#allocation5 + $0x1], 0  ;;  %s4994_s25 = smov 0   ;;  %s4996_s26 = smov 0  }
  0x10   :  { %s4998_s27 = smov 0   ;;  %s5000_s28 = smov 0  }
  0x11   :  { %s5002_s29 = smov 0   ;;  %s5004_s30 = smov 0  }
  0x12   :  { %s5006_s14 = smov 0   ;;  %s5008_s15 = smov 0  }
  0x13   :  { %s5010_s16 = smov 0   ;;  %s5012_s17 = smov 0  }
  0x14   :  { %s5014_s18 = smov 0  }
  0x15 LB: > { %6026 = sst [smem:[#allocation22_spill]] %s4858_s25  ;;  %s5048_s19 = sadd.s32 4294967295, %s4898_s18   ;;  %s4898_s18 = sphi %s5014_s18, %s29_s18   ;;  %s4894_s17 = sphi %s5012_s17, %s6098_s17   ;;  %s4890_s16 = sphi %s5010_s16, %s6102_s16   ;;  %s4886_s15 = sphi %s5008_s15, %s6096_s15   ;;  %s4882_s14 = sphi %s5006_s14, %s6101_s14   ;;  %s4878_s30 = sphi %s5004_s30, %s6095_s30   ;;  %s4874_s29 = sphi %s5002_s29, %s6100_s29   ;;  %s4870_s28 = sphi %s5000_s28, %s6099_s28   ;;  %s4866_s27 = sphi %s4998_s27, %s6093_s27   ;;  %s4862_s26 = sphi %s4996_s26, %s6092_s26   ;;  %s4858_s25 = sphi %s4994_s25, %s6091_s25  }
  0x16   : > { %6027 = sst [smem:[#allocation23_spill]] %s4862_s26  ;;  %s3582_s20 = sadd.s32 4294967294, %s4898_s18  }
  0x17   : > { %6028 = sst [smem:[#allocation24_spill]] %s4866_s27  ;;  %p129_p0 = scmp.ne.s32.totalorder %s4874_s29, %s4870_s28 }
  0x18   : > { %6029 = sst [smem:[#allocation25_spill]] %s4878_s30  ;;  %p5988_p1 = scmp.eq.s32.totalorder %s5048_s19, 0 }
  0x19   : > { %6030 = sst [smem:[#allocation26_spill]] %s4882_s14  ;;  %p366_p2 = scmp.ne.s32.totalorder %s4866_s27, %s4862_s26 }
  0x1a   : > { %6031 = sst [smem:[#allocation27_spill]] %s4886_s15  ;;  %p5058_p3 = por %p5988_p1, %p129_p0 }
  0x1b   : > { %6032 = sst [smem:[#allocation28_spill]] %s4894_s17  ;;  %p367_p4 = scmp.eq.s32.totalorder %s5048_s19, 3 }
  0x1c   : > { %s6033_s22 = scalar_select %p5058_p3, 1, 0 }
  0x1d   : > { %p372_p5 = scmp.ne.s32.totalorder %s4862_s26, %s4858_s25  ;;  %p373_p6 = scmp.eq.s32.totalorder %s3582_s20, 3 }
  0x1e   : > { %p5065_p7 = por %p367_p4, %p366_p2  ;;  %p3583_p8 = scmp.ge.s32.totalorder %s4898_s18, 1 }
  0x1f   : > { %p5070_p9 = por %p373_p6, %p372_p5  ;;  %p380_p10 = scmp.lt.s32.totalorder %s4898_s18, 5 }
  0x20   : > { %s6034_s23 = scalar_select %p5065_p7, 1, 0 }
  0x21   : > { %s6036_s24 = scalar_select %p5070_p9, 1, 0 }
  0x22   : > { %6035 = sst [smem:[#allocation29_spill]] %s6034_s23  ;;  %p5075_p11 = pnand %p3583_p8, %p380_p10 }
  0x23   : > { %6037 = sst [smem:[#allocation30_spill]] %s6036_s24  ;;  %s4900_s21 = smov [#allocation3]  }
  0x24   : > { %s6038_s28 = scalar_select %p5075_p11, 1, 0 }
  0x25   : > { %s392_s13 = sshll.u32 %s4900_s21, 4  ;;  %p4085_p12 = pneg %p5075_p11  ;;  %s393_s13 = int_to_ptr.vmem [resolvable:$true] %s392_s13 }
  0x26   : > { %s6040_s1 = sld [smem:[#allocation36_spill]] }
  0x27   : > { %p5083_p13 = pnand %p4085_p12, %p5988_p1 }
  0x29   : > { %s6039_s20 = scalar_select %p5083_p13, 1, 0 }
  0x2a   : > { %p5095_p2 = pneg %p5083_p13 }
  0x2c   : > { %s4528_s24 = scalar_lea.hbm %s6040_s1, 384 }
  0x2d   : > { %p4529_p0 = scmp.ne.s32.totalorder %s6040_s1, %s4528_s24  ;;  %p4535_p6 = scmp.lt.u32.totalorder %s4528_s24, %s6040_s1 }
  0x2e   : > { %s6041_s21 = scalar_select %p5095_p2, 1, 0 }
  0x2f   : > { %p4531_p4 = pnand %p5095_p2, %p4529_p0 }
  0x31   : > { %p4532_p5 = pneg %p4531_p4 }
  0x33   : > { %p4537_p8 = pnand %p4535_p6, %p4532_p5 }
  0x35   : > { %4540 = shalt.err (!%p4537_p8)
}
  0x36   : > { %s4541_s25 = scalar_lea.vmem %s393_s13, 384  ;;  %p4549_p9 = scmp.lt.s32.totalorder %s393_s13, %s393_s13 }
  0x37   : > { %p4542_p10 = scmp.ne.s32.totalorder %s393_s13, %s4541_s25  ;;  %p4550_p7 = scmp.lt.s32.totalorder %s4541_s25, %s4541_s25 }
  0x39   : > { %p4544_p12 = pnand %p4542_p10, %p5095_p2  ;;  %p4551_p3 = por %p4550_p7, %p4549_p9 }
  0x3b   : > { %p4545_p1 = pneg %p4544_p12 }
  0x3d   : > { %p4552_p11 = pnand %p4551_p3, %p4545_p1 }
  0x3f   : > { %4555 = shalt.err (!%p4552_p11)
}
  0x40   : > { %s5992_s9 = smov 128   ;;  %s5993_s7 = smov 8  }
  0x41   : > { %4088 = dma.hbm_to_vmem [thread:$0]  (!%p5083_p13), %s6040_s1, 384, %s393_s13, [#allocation4], %s5992_s9, %s5992_s9, %s5993_s7  }
  0x42   : > { %s38_s23 = sadd.s32 1, %s4890_s16  ;;  %s41_s24 = sadd.s32 1, %s4894_s17 }
  0x43   : > { %p39_p1 = scmp.ge.s32.totalorder %s38_s23, 2  ;;  %s116_s25 = sadd.s32 1, %s4878_s30 }
  0x44   : > { %p123_p3 = scmp.ne.s32.totalorder %s4878_s30, %s4874_s29  ;;  %p124_p7 = scmp.eq.s32.totalorder %s4898_s18, 0 }
  0x45   : > { %s6104_s23 = smov (%p39_p1, %s38_s23), 0  ;;  %s6106_s24 = smov (!%p39_p1, %s41_s24), %s4894_s17 }
  0x46   : > { %6042 = sst [smem:[#allocation31_spill]] %s6104_s23  ;;  %s113_s0 = ssub.s32 %s4890_s16, %s6104_s23 }
  0x47   : > { %p43_p9 = scmp.ge.s32.totalorder %s6106_s24, 2  ;;  %p114_p11 = scmp.eq.s32.totalorder %s113_s0, 0 }
  0x48   : > { %p125_p0 = por %p124_p7, %p123_p3  ;;  %p4119_p4 = scmp.lt.s32.totalorder %s4898_s18, 4 }
  0x49   : > { %s6108_s24 = smov (%p43_p9, %s6106_s24), 0  ;;  %s459_s11 = sand.u32 1, %s4898_s18  }
  0x4a   : > { %6043 = sst [smem:[#allocation32_spill]] %s6108_s24  ;;  %s353_s8 = ssub.s32 %s4894_s17, %s6108_s24 }
  0x4b   : > { %s5129_s13 = scalar_select %p114_p11, %s4878_s30, %s116_s25  }
  0x4c   : > { %p354_p5 = scmp.eq.s32.totalorder %s353_s8, 0  ;;  %s5135_s9 = sand.u32 1, %s4878_s30  }
  0x4d   : > { %6044 = sst [smem:[#allocation33_spill]] %s5129_s13  ;;  %s4056_s7 = smul.u32 3072, %s4890_s16 }
  0x4e   : > { %s6045_s1 = sadd.s32 1, %s4866_s27  ;;  %s4055_s23 = smul.u32 192, %s5135_s9 }
  0x4f   : > { %s5141_s14 = scalar_select %p354_p5, %s4866_s27, %s6045_s1  }
  0x50   : > { %s6047_s3 = sld [smem:[#allocation38_spill]]  ;;  %p5149_p6 = pnand %p4119_p4, %p125_p0 }
  0x51   : > { %6046 = sst [smem:[#allocation34_spill]] %s5141_s14  ;;  %s463_s8 = scalar_lea.vmem [#allocation8], %s4055_s23 }
  0x52   : > { %s6048_s25 = scalar_select %p5149_p6, 1, 0 }
  0x53   : > { %s470_s24 = sshll.u32 %s463_s8, 4  ;;  %s5155_s1 = scalar_lea.sflag [#allocation4], %s459_s11  ;;  %s5153_s24 = int_to_ptr.vmem [resolvable:$true] %s470_s24 }
  0x54   : > { %p5161_p10 = pneg %p5149_p6 }
  0x56   : > { %s5147_s26 = scalar_lea.hbm %s6047_s3, %s4056_s7  ;;  %s4561_s23 = scalar_lea.hbm %s6047_s3, 6144 }
  0x57   : > { %s4556_s17 = scalar_lea.hbm %s5147_s26, 3072  ;;  %p4562_p3 = scmp.lt.u32.totalorder %s5147_s26, %s6047_s3 }
  0x58   : > { %p4557_p8 = scmp.ne.s32.totalorder %s5147_s26, %s4556_s17  ;;  %p4563_p7 = scmp.lt.u32.totalorder %s4561_s23, %s4556_s17 }
  0x59   : > { %p4565_p11 = scmp.lt.u32.totalorder %s4556_s17, %s5147_s26 }
  0x5a   : > { %p4559_p12 = pnand %p5161_p10, %p4557_p8  ;;  %p4564_p9 = por %p4563_p7, %p4562_p3 }
  0x5c   : > { %p4560_p1 = pneg %p4559_p12  ;;  %p4566_p0 = por %p4565_p11, %p4564_p9 }
  0x5e   : > { %p4567_p4 = pnand %p4566_p0, %p4560_p1 }
  0x60   : > { %4570 = shalt.err (!%p4567_p4)
}
  0x61   : > { %s4571_s11 = scalar_lea.vmem %s5153_s24, 3072  ;;  %s4903_s7 = smov [#allocation8]  }
  0x62   : > { %p4572_p5 = scmp.ne.s32.totalorder %s5153_s24, %s4571_s11  ;;  %s4576_s0 = sshll.u32 %s4903_s7, 4  ;;  %s4577_s0 = int_to_ptr.vmem [resolvable:$false] %s4576_s0 }
  0x63   : > { %s4578_s13 = scalar_lea.vmem %s4577_s0, 6144  ;;  %p4579_p13 = scmp.lt.s32.totalorder %s5153_s24, %s4577_s0 }
  0x64   : > { %p4574_p8 = pnand %p4572_p5, %p5161_p10  ;;  %p4580_p2 = scmp.lt.s32.totalorder %s4578_s13, %s4571_s11 }
  0x66   : > { %p4575_p12 = pneg %p4574_p8  ;;  %p4581_p3 = por %p4580_p2, %p4579_p13 }
  0x68   : > { %p4582_p7 = pnand %p4581_p3, %p4575_p12 }
  0x6a   : > { %4585 = shalt.err (!%p4582_p7)
}
  0x6b   : > { %s4904_s17 = smov 192   ;;  %s4905_s23 = smov 12  }
  0x6c   : > { %4101 = dma.hbm_to_vmem [thread:$0]  (!%p5149_p6), %s5147_s26, 3072, %s5153_s24, %s5155_s1, %s4904_s17, %s4904_s17, %s4905_s23  }
  0x6d   : > { %s3590_s8 = sshll.u32 %s5135_s9, 6  ;;  %s3781_s7 = sshll.u32 %s4890_s16, 10 }
  0x6e   : > { %s6050_s4 = sld [smem:[#allocation39_spill]]  ;;  %s484_s0 = scalar_lea.vmem [#allocation9], %s3590_s8 }
  0x6f   : > { %s491_s13 = sshll.u32 %s484_s0, 4  ;;  %s5192_s13 = int_to_ptr.vmem [resolvable:$true] %s491_s13 }
  0x74   : > { %s5190_s11 = scalar_lea.hbm %s6050_s4, %s3781_s7  ;;  %s4591_s17 = scalar_lea.hbm %s6050_s4, 2048 }
  0x75   : > { %s4586_s14 = scalar_lea.hbm %s5190_s11, 1024  ;;  %p4592_p9 = scmp.lt.u32.totalorder %s5190_s11, %s6050_s4 }
  0x76   : > { %p4587_p13 = scmp.ne.s32.totalorder %s5190_s11, %s4586_s14  ;;  %p4593_p11 = scmp.lt.u32.totalorder %s4591_s17, %s4586_s14 }
  0x77   : > { %p4595_p4 = scmp.lt.u32.totalorder %s4586_s14, %s5190_s11 }
  0x78   : > { %p4589_p2 = pnand %p4587_p13, %p5161_p10  ;;  %p4594_p0 = por %p4593_p11, %p4592_p9 }
  0x7a   : > { %p4590_p1 = pneg %p4589_p2  ;;  %p4596_p5 = por %p4595_p4, %p4594_p0 }
  0x7c   : > { %p4597_p8 = pnand %p4596_p5, %p4590_p1 }
  0x7e   : > { %4600 = shalt.err (!%p4597_p8)
}
  0x7f   : > { %s4601_s23 = scalar_lea.vmem %s5192_s13, 1024  ;;  %s4906_s8 = smov [#allocation9]  }
  0x80   : > { %p4602_p12 = scmp.ne.s32.totalorder %s5192_s13, %s4601_s23  ;;  %s4606_s7 = sshll.u32 %s4906_s8, 4  ;;  %s4607_s7 = int_to_ptr.vmem [resolvable:$false] %s4606_s7 }
  0x81   : > { %s4608_s0 = scalar_lea.vmem %s4607_s7, 2048  ;;  %p4609_p13 = scmp.lt.s32.totalorder %s5192_s13, %s4607_s7 }
  0x82   : > { %p4604_p3 = pnand %p4602_p12, %p5161_p10  ;;  %p4610_p2 = scmp.lt.s32.totalorder %s4608_s0, %s4601_s23 }
  0x84   : > { %p4605_p7 = pneg %p4604_p3  ;;  %p4611_p9 = por %p4610_p2, %p4609_p13 }
  0x86   : > { %p4612_p11 = pnand %p4611_p9, %p4605_p7 }
  0x88   : > { %4615 = shalt.err (!%p4612_p11)
}
  0x89   : > { %s6011_s14 = smov 64   ;;  %s6013_s26 = smov 4  }
  0x8a   : > { %4104 = dma.hbm_to_vmem [thread:$0]  (!%p5149_p6), %s5190_s11, 1024, %s5192_s13, %s5155_s1, %s6011_s14, %s6011_s14, %s6013_s26  }
  0x8b   : > { %s4909_s24 = smov [#allocation6]   ;;  %s6009_s3 = sshll.u32 %s5135_s9, 8 }
  0x8c   : > { %s405_s17 = sshll.u32 %s4909_s24, 4  ;;  %s6051_s2 = sld [smem:[#allocation37_spill]]  ;;  %s406_s17 = int_to_ptr.vmem [resolvable:$true] %s405_s17 }
  0x8d   : > { %p6052_p0 = scmp.ne.s32.totalorder %s6041_s21, 0 }
  0x92   : > { %s4616_s8 = scalar_lea.hbm %s6051_s2, 1536 }
  0x93   : > { %p4617_p1 = scmp.ne.s32.totalorder %s6051_s2, %s4616_s8  ;;  %p4623_p8 = scmp.lt.u32.totalorder %s4616_s8, %s6051_s2 }
  0x95   : > { %p4619_p4 = pnand %p4617_p1, %p6052_p0 }
  0x97   : > { %p4620_p5 = pneg %p4619_p4 }
  0x99   : > { %p4625_p12 = pnand %p4623_p8, %p4620_p5 }
  0x9b   : > { %4628 = shalt.err (!%p4625_p12)
}
  0x9c   : > { %s4629_s11 = scalar_lea.vmem %s406_s17, 1536  ;;  %p4637_p2 = scmp.lt.s32.totalorder %s406_s17, %s406_s17 }
  0x9d   : > { %p4630_p3 = scmp.ne.s32.totalorder %s406_s17, %s4629_s11  ;;  %p4638_p9 = scmp.lt.s32.totalorder %s4629_s11, %s4629_s11 }
  0x9f   : > { %p4632_p7 = pnand %p4630_p3, %p6052_p0  ;;  %p4639_p11 = por %p4638_p9, %p4637_p2 }
  0xa1   : > { %p4633_p13 = pneg %p4632_p7 }
  0xa3   : > { %p4640_p6 = pnand %p4639_p11, %p4633_p13 }
  0xa5   : > { %4643 = shalt.err (!%p4640_p6)
}
  0xa6   : > { %p6053_p1 = scmp.ne.s32.totalorder %s6039_s20, 0  ;;  %s6010_s13 = sshll.u32 %s4890_s16, 12 }
  0xa7   : > { %s505_s24 = scalar_lea.vmem [#allocation10], %s6009_s3  ;;  %s5249_s7 = scalar_lea.hbm %s5974_s5, %s6010_s13 }
  0xa8   : > { %4091 = dma.hbm_to_vmem [thread:$0]  (!%p6053_p1), %s6051_s2, 1536, %s406_s17, [#allocation7], %s6011_s14, %s6011_s14, %s6013_s26  }
  0xa9   : > { %s512_s30 = sshll.u32 %s505_s24, 4  ;;  %s4644_s0 = scalar_lea.hbm %s5249_s7, 4096  ;;  %s5251_s30 = int_to_ptr.vmem [resolvable:$true] %s512_s30 }
  0xaa   : > { %p4645_p6 = scmp.ne.s32.totalorder %s5249_s7, %s4644_s0  ;;  %s4649_s4 = scalar_lea.hbm %s5974_s5, 8192 }
  0xab   : > { %p4650_p8 = scmp.lt.u32.totalorder %s5249_s7, %s5974_s5  ;;  %p4651_p12 = scmp.lt.u32.totalorder %s4649_s4, %s4644_s0 }
  0xac   : > { %p4647_p4 = pnand %p4645_p6, %p5161_p10  ;;  %p4653_p7 = scmp.lt.u32.totalorder %s4644_s0, %s5249_s7 }
  0xad   : > { %p4652_p3 = por %p4651_p12, %p4650_p8 }
  0xae   : > { %p4648_p5 = pneg %p4647_p4 }
  0xaf   : > { %p4654_p13 = por %p4653_p7, %p4652_p3 }
  0xb1   : > { %p4655_p2 = pnand %p4654_p13, %p4648_p5 }
  0xb3   : > { %4658 = shalt.err (!%p4655_p2)
}
  0xb4   : > { %s4659_s23 = scalar_lea.vmem %s5251_s30, 4096  ;;  %s4910_s8 = smov [#allocation10]  }
  0xb5   : > { %p4660_p9 = scmp.ne.s32.totalorder %s5251_s30, %s4659_s23  ;;  %s4664_s17 = sshll.u32 %s4910_s8, 4  ;;  %s4665_s17 = int_to_ptr.vmem [resolvable:$false] %s4664_s17 }
  0xb6   : > { %s4666_s11 = scalar_lea.vmem %s4665_s17, 8192  ;;  %p4667_p4 = scmp.lt.s32.totalorder %s5251_s30, %s4665_s17 }
  0xb7   : > { %p4662_p11 = pnand %p4660_p9, %p5161_p10  ;;  %p4668_p1 = scmp.lt.s32.totalorder %s4666_s11, %s4659_s23 }
  0xb9   : > { %p4663_p6 = pneg %p4662_p11  ;;  %p4669_p8 = por %p4668_p1, %p4667_p4 }
  0xbb   : > { %p4670_p12 = pnand %p4669_p8, %p4663_p6 }
  0xbd   : > { %4673 = shalt.err (!%p4670_p12)
}
  0xbe   : > { %s4911_s0 = smov 256   ;;  %s4912_s4 = smov 16  }
  0xbf   : > { %p6054_p5 = scmp.ne.s32.totalorder %s6048_s25, 0  ;;  %s4913_s27 = smov [#allocation12]  }
  0xc0   : > { %s421_s24 = sshll.u32 %s4913_s27, 4  ;;  %s4914_s3 = smov [#allocation13]   ;;  %s422_s24 = int_to_ptr.vmem [resolvable:$true] %s421_s24 }
  0xc1   : > { %4107 = dma.hbm_to_vmem [thread:$0]  (!%p6054_p5), %s5249_s7, 4096, %s5251_s30, %s5155_s1, %s4911_s0, %s4911_s0, %s4912_s4  }
  0xc2   : > { %s437_s8 = sshll.u32 %s4914_s3, 4  ;;  %s4674_s11 = scalar_lea.hbm %s5979_s10, 2048  ;;  %s5275_s8 = int_to_ptr.vmem [resolvable:$true] %s437_s8 }
  0xc3   : > { %p4675_p1 = scmp.ne.s32.totalorder %s5979_s10, %s4674_s11  ;;  %p4681_p13 = scmp.lt.u32.totalorder %s4674_s11, %s5979_s10 }
  0xc5   : > { %p4677_p3 = pnand %p4675_p1, %p6052_p0 }
  0xc7   : > { %p4678_p7 = pneg %p4677_p3 }
  0xc9   : > { %p4683_p2 = pnand %p4681_p13, %p4678_p7 }
  0xcb   : > { %4686 = shalt.err (!%p4683_p2)
}
  0xcc   : > { %s4687_s3 = scalar_lea.vmem %s422_s24, 2048  ;;  %p4695_p4 = scmp.lt.s32.totalorder %s422_s24, %s422_s24 }
  0xcd   : > { %p4688_p9 = scmp.ne.s32.totalorder %s422_s24, %s4687_s3  ;;  %p4696_p8 = scmp.lt.s32.totalorder %s4687_s3, %s4687_s3 }
  0xcf   : > { %p4690_p11 = pnand %p4688_p9, %p6052_p0  ;;  %p4697_p12 = por %p4696_p8, %p4695_p4 }
  0xd1   : > { %p4691_p6 = pneg %p4690_p11 }
  0xd3   : > { %p4698_p5 = pnand %p4697_p12, %p4691_p6 }
  0xd5   : > { %4701 = shalt.err (!%p4698_p5)
}
  0xd6   : > { %p6055_p1 = scmp.ne.s32.totalorder %s6039_s20, 0  ;;  %s6056_s14 = smov 8  }
  0xd7   : > { %s6057_s13 = smov 128   ;;  %s4702_s27 = scalar_lea.hbm %s5981_s12, 2048 }
  0xd8   : > { %4094 = dma.hbm_to_vmem [thread:$0]  (!%p6055_p1), %s5979_s10, 2048, %s422_s24, [#allocation7], %s6057_s13, %s6057_s13, %s6056_s14  }
  0xd9   : > { %p4703_p3 = scmp.ne.s32.totalorder %s5981_s12, %s4702_s27  ;;  %p4709_p13 = scmp.lt.u32.totalorder %s4702_s27, %s5981_s12 }
  0xdb   : > { %p4705_p5 = pnand %p4703_p3, %p6052_p0 }
  0xdd   : > { %p4706_p7 = pneg %p4705_p5 }
  0xdf   : > { %p4711_p2 = pnand %p4709_p13, %p4706_p7 }
  0xe1   : > { %4714 = shalt.err (!%p4711_p2)
}
  0xe2   : > { %s4715_s24 = scalar_lea.vmem %s5275_s8, 2048  ;;  %p4723_p4 = scmp.lt.s32.totalorder %s5275_s8, %s5275_s8 }
  0xe3   : > { %p4716_p9 = scmp.ne.s32.totalorder %s5275_s8, %s4715_s24  ;;  %p4724_p8 = scmp.lt.s32.totalorder %s4715_s24, %s4715_s24 }
  0xe5   : > { %p4718_p11 = pnand %p4716_p9, %p6052_p0  ;;  %p4725_p12 = por %p4724_p8, %p4723_p4 }
  0xe7   : > { %p4719_p6 = pneg %p4718_p11 }
  0xe9   : > { %p4726_p3 = pnand %p4725_p12, %p4719_p6 }
  0xeb   : > { %4729 = shalt.err (!%p4726_p3)
}
  0xec   : > { %s6058_s3 = smov 4   ;;  %s6059_s14 = smov 64  }
  0xed   : > { %4097 = dma.hbm_to_vmem [thread:$0]  (!%p6055_p1), %s5981_s12, 2048, %s5275_s8, [#allocation14], %s6059_s14, %s6059_s14, %s6058_s3  }
  0xee   : > { %s6060_s21 = sshll.u32 %s4890_s16, 12  ;;  %s6061_s27 = sshll.u32 %s5135_s9, 8 }
  0xef   : > { %s5329_s4 = scalar_lea.hbm %s5975_s6, %s6060_s21  ;;  %s526_s20 = scalar_lea.vmem [#allocation11], %s6061_s27 }
  0xf0   : > { %s533_s23 = sshll.u32 %s526_s20, 4  ;;  %s4730_s17 = scalar_lea.hbm %s5329_s4, 4096  ;;  %s5333_s23 = int_to_ptr.vmem [resolvable:$true] %s533_s23 }
  0xf1   : > { %p4731_p0 = scmp.ne.s32.totalorder %s5329_s4, %s4730_s17  ;;  %s4735_s30 = scalar_lea.hbm %s5975_s6, 8192 }
  0xf2   : > { %p4736_p7 = scmp.lt.u32.totalorder %s5329_s4, %s5975_s6  ;;  %p4737_p13 = scmp.lt.u32.totalorder %s4735_s30, %s4730_s17 }
  0xf3   : > { %p4733_p5 = pnand %p4731_p0, %p5161_p10  ;;  %p4739_p9 = scmp.lt.u32.totalorder %s4730_s17, %s5329_s4 }
  0xf4   : > { %p4738_p2 = por %p4737_p13, %p4736_p7 }
  0xf5   : > { %p4734_p1 = pneg %p4733_p5 }
  0xf6   : > { %p4740_p11 = por %p4739_p9, %p4738_p2 }
  0xf8   : > { %p4741_p6 = pnand %p4740_p11, %p4734_p1 }
  0xfa   : > { %4744 = shalt.err (!%p4741_p6)
}
  0xfb   : > { %s4745_s9 = scalar_lea.vmem %s5333_s23, 4096  ;;  %s4915_s26 = smov [#allocation11]  }
  0xfc   : > { %p4746_p4 = scmp.ne.s32.totalorder %s5333_s23, %s4745_s9  ;;  %s4750_s21 = sshll.u32 %s4915_s26, 4  ;;  %s4751_s21 = int_to_ptr.vmem [resolvable:$false] %s4750_s21 }
  0xfd   : > { %s4752_s7 = scalar_lea.vmem %s4751_s21, 8192  ;;  %p4753_p3 = scmp.lt.s32.totalorder %s5333_s23, %s4751_s21 }
  0xfe   : > { %p4748_p8 = pnand %p4746_p4, %p5161_p10  ;;  %p4754_p0 = scmp.lt.s32.totalorder %s4752_s7, %s4745_s9 }
 0x100   : > { %p4749_p12 = pneg %p4748_p8  ;;  %p4755_p5 = por %p4754_p0, %p4753_p3 }
 0x102   : > { %p4756_p7 = pnand %p4755_p5, %p4749_p12 }
 0x104   : > { %4759 = shalt.err (!%p4756_p7)
}
 0x105   : > { %p6062_p1 = scmp.ne.s32.totalorder %s6048_s25, 0  ;;  %p6063_p10 = scmp.ne.s32.totalorder %s6038_s28, 0 }
 0x106   : > { %p6064_p13 = scmp.eq.s32.totalorder (!%p6063_p10), %s5048_s19, 0 }
 0x107   : > { %4110 = dma.hbm_to_vmem [thread:$0]  (!%p6062_p1), %s5329_s4, 4096, %s5333_s23, %s5155_s1, %s6059_s14, %s6059_s14, %s6058_s3  }
 0x108   : > { %560 = sbr.rel (%p6063_p10) target bundleno = 5460 (0x1554), region = 72 }
 0x10f   : > { %4833 = dma.done.wait (%p6064_p13), [#allocation4], 384   ;;  %p6065_p2 = pmov %p6064_p13 }
 0x111   : > { %4835 = vsyncadd (%p6065_p2), [#allocation4], 4294966912  ;;  %p6066_p9 = pmov %p6065_p2 }
 0x112   : > { %p6067_p11 = pmov %p6065_p2 }
 0x113   : > { %4837 = dma.done.wait (%p6066_p9), [#allocation7], 1536  }
 0x114   : > { %4839 = vsyncadd (%p6067_p11), [#allocation7], 4294965760  ;;  %s570_s25 = sand.u32 1, %s5048_s19   ;;  %s572_s1 = sand.u32 1, %s4874_s29  }
 0x115   : > { %s4057_s15 = smul.u32 192, %s572_s1  ;;  %s571_s28 = scalar_lea.sflag [#allocation4], %s570_s25 }
 0x116   : > { %p6068_p6 = scmp.ne.s32.totalorder %s6033_s22, 0 }
 0x117   : > { %s5372_s3 = scalar_lea.vmem [#allocation8], %s4057_s15 }
 0x118   : > { %4841 = dma.done.wait (%p6068_p6), %s571_s28, 12288  }
 0x119   : > { %4843 = vsyncadd (%p6068_p6), %s571_s28, 4294955008  ;;  %s3602_s14 = sshll.u32 %s572_s1, 6  ;;  %s3603_s0 = sshll.u32 %s572_s1, 8 }
 0x11a   : > { %s5378_s4 = scalar_lea.vmem [#allocation9], %s3602_s14  ;;  %s5380_s27 = scalar_lea.vmem [#allocation10], %s3603_s0 }
 0x11b   : > { %s5382_s20 = scalar_lea.vmem [#allocation11], %s3603_s0  ;;  %p6069_p4 = pmov %p6065_p2 }
 0x11c   : > { %p6070_p8 = pmov %p6065_p2 }
 0x11d   : > { %4845 = dma.done.wait (%p6069_p4), [#allocation7], 2048  }
 0x11e   : > { %4847 = vsyncadd (%p6070_p8), [#allocation7], 4294965248  ;;  %p6071_p12 = pmov %p6065_p2 }
 0x11f   : > { %p6072_p3 = pmov %p6065_p2 }
 0x120   : > { %4849 = dma.done.wait (%p6071_p12), [#allocation14], 2048  }
 0x121   : > { %4851 = vsyncadd (%p6072_p3), [#allocation14], 4294965248  ;;  %s6073_s22 = sld [smem:[#allocation23_spill]]  ;;  %s6074_s23 = sld [smem:[#allocation27_spill]] }
 0x122   : > { %s6075_s17 = sld [smem:[#allocation26_spill]]  ;;  %s6076_s21 = sld [smem:[#allocation35_spill]] }
 0x123   : > { %s6077_s15 = sld [smem:[#allocation40_spill]] }
 0x127   : > { %s6015_s8 = sand.u32 1, %s6073_s22   ;;  %p681_p0 = scmp.lt.s32.totalorder %s6074_s23, 1 }
 0x128   : > { %s5396_s11 = sshll.u32 %s6015_s8, 3  ;;  %p686_p5 = scmp.lt.s32.totalorder %s6075_s17, 1 }
 0x129   : > { %s6110_s23 = smov (!%p681_p0, %s6074_s23), 1  ;;  %s6078_s22 = sld [smem:[#allocation41_spill]] }
 0x12a   : > { %s687_s30 = scalar_select %p686_p5, %s6075_s17, 1 }
 0x12b   : > { %s4058_s24 = smul.u32 24, %s6110_s23  ;;  %s680_s2 = scalar_lea.vmem [#allocation15], %s5396_s11 }
 0x12c   : > { %s3784_s13 = sshll.u32 %s687_s30, 4  ;;  %s3611_s9 = sshll.u32 %s687_s30, 2 }
 0x12d   : > { %s5404_s7 = scalar_lea.vmem %s6076_s21, %s4058_s24  ;;  %s5409_s28 = scalar_lea.vmem %s6077_s15, %s3784_s13 }
 0x12e   : > { %p3612_p7 = scmp.ne.s32.totalorder %s6075_s17, 0 }
 0x12f   : > { %s5414_s8 = scalar_lea.vmem %s6078_s22, %s3611_s9  ;;  %v4232_v0 = vld [vmem:[#allocation6] sm:$0xff] (!%p3612_p7)   ;;  %v4916_v1 = vmov (!%p3612_p7), 0   ;;  %v4233_v2 = vld [vmem:[#allocation6 + $0x8] sm:$0xff] (!%p3612_p7)   ;;  %v4234_v3 = vld [vmem:[#allocation6 + $0x10] sm:$0xff] (!%p3612_p7)   ;;  %vm817_vm0 = vcmask (!%p3612_p7), 523264  }
 0x130   : > { %699 = sbr.rel (%p3612_p7) target bundleno = 569 (0x239), region = 108  ;;  %824 = vmatprep.subr.bf16.mxu0 (!%p3612_p7), %v4916_v1  ;;  %4019 = vmatprep.subr.bf16.mxu1 (!%p3612_p7), %v4916_v1  ;;  %v4235_v4 = vld [vmem:[#allocation6 + $0x18] sm:$0xff] (!%p3612_p7)   ;;  %v702_v6 = vld [vmem:[%s5404_s7 + $0x10] sm:$0xff] (!%p3612_p7)  ;;  %v4237_v9 = vld [vmem:[#allocation6 + $0x28] sm:$0xff] (!%p3612_p7)  }
 0x131   : > { %825 = vmatpush1.bf16.msra.mxu0 (!%p3612_p7), %v4232_v0  ;;  %4031 = vmatpush1.bf16.msra.mxu1 (!%p3612_p7), %v4232_v0  ;;  %v4246_v5 = vld [vmem:[%s5404_s7 + $0x4] ss:$8 sps:$4 sm:$0xff] (!%p3612_p7)   ;;  %v4236_v7 = vld [vmem:[#allocation6 + $0x20] sm:$0xff] (!%p3612_p7)   ;;  %v3616_v8 = vcombine.high (!%p3612_p7), %v702_v6, %v702_v6  ;;  %v4241_v13 = vld [vmem:[#allocation6 + $0x48] sm:$0xff] (!%p3612_p7)   ;;  %v3615_v17 = vcombine.low (!%p3612_p7), %v702_v6, %v702_v6 }
 0x132   : > { %826 = vmatprep.subr.bf16.mxu0 (!%p3612_p7), %v4916_v1  ;;  %4020 = vmatprep.subr.bf16.mxu1 (!%p3612_p7), %v4916_v1  ;;  %v4238_v10 = vld [vmem:[#allocation6 + $0x30] sm:$0xff] (!%p3612_p7)   ;;  %v4239_v11 = vld [vmem:[#allocation6 + $0x38] sm:$0xff] (!%p3612_p7)   ;;  %v4240_v12 = vld [vmem:[#allocation6 + $0x40] sm:$0xff] (!%p3612_p7)  }
 0x133   : > { %3629 = vmatprep.mubr.msk.bf16.mxu0 (!%p3612_p7), %vm817_vm0, %v4246_v5  ;;  %3630 = vmatprep.mubr.msk.bf16.mxu1 (!%p3612_p7), %vm817_vm0, %v3616_v8  ;;  %v4242_v14 = vld [vmem:[#allocation6 + $0x50] sm:$0xff] (!%p3612_p7)   ;;  %v4243_v15 = vld [vmem:[#allocation6 + $0x58] sm:$0xff] (!%p3612_p7)   ;;  %v727_v18 = vld [vmem:[#allocation3] sm:$0xff] (!%p3612_p7) }
 0x134   : > { %v4244_v16 = vld [vmem:[%s5404_s7] ss:$8 sps:$4 sm:$0xff] (!%p3612_p7)  }
 0x135   : > { %827 = vmatpush1.bf16.msra.mxu0 (!%p3612_p7), %v4233_v2  ;;  %4032 = vmatpush1.bf16.msra.mxu1 (!%p3612_p7), %v4233_v2  ;;  %v729_v19 = vld [vmem:[#allocation3 + $0x10] sm:$0xff] (!%p3612_p7)  ;;  %v728_v22 = vld [vmem:[#allocation3 + $0x8] sm:$0xff] (!%p3612_p7) }
 0x136   : > { %828 = vmatprep.subr.bf16.mxu0 (!%p3612_p7), %v4916_v1  ;;  %4021 = vmatprep.subr.bf16.mxu1 (!%p3612_p7), %v4916_v1 }
 0x139   : > { %829 = vmatpush1.bf16.msra.mxu0 %v4234_v3  ;;  %4033 = vmatpush1.bf16.msra.mxu1 %v4234_v3 }
 0x13a   : > { %830 = vmatprep.subr.bf16.mxu0 %v4916_v1  ;;  %4022 = vmatprep.subr.bf16.mxu1 %v4916_v1 }
 0x13d   : > { %831 = vmatpush1.bf16.msra.mxu0 %v4235_v4  ;;  %4034 = vmatpush1.bf16.msra.mxu1 %v4235_v4 }
 0x13e   : > { %832 = vmatprep.subr.bf16.mxu0 %v4916_v1  ;;  %4023 = vmatprep.subr.bf16.mxu1 %v4916_v1 }
 0x141   : > { %833 = vmatpush1.bf16.msra.mxu0 %v4236_v7  ;;  %4035 = vmatpush1.bf16.msra.mxu1 %v4236_v7 }
 0x142   : > { %834 = vmatprep.subr.bf16.mxu0 %v4916_v1  ;;  %4024 = vmatprep.subr.bf16.mxu1 %v4916_v1 }
 0x145   : > { %835 = vmatpush1.bf16.msra.mxu0 %v4237_v9  ;;  %4036 = vmatpush1.bf16.msra.mxu1 %v4237_v9 }
 0x146   : > { %836 = vmatprep.subr.bf16.mxu0 %v4916_v1  ;;  %4025 = vmatprep.subr.bf16.mxu1 %v4916_v1 }
 0x149   : > { %837 = vmatpush1.bf16.msra.mxu0 %v4238_v10  ;;  %4037 = vmatpush1.bf16.msra.mxu1 %v4238_v10 }
 0x14a   : > { %838 = vmatprep.subr.bf16.mxu0 %v4916_v1  ;;  %4026 = vmatprep.subr.bf16.mxu1 %v4916_v1 }
 0x14d   : > { %839 = vmatpush1.bf16.msra.mxu0 %v4239_v11  ;;  %4038 = vmatpush1.bf16.msra.mxu1 %v4239_v11 }
 0x14e   : > { %840 = vmatprep.subr.bf16.mxu0 %v4916_v1  ;;  %4027 = vmatprep.subr.bf16.mxu1 %v4916_v1 }
 0x151   : > { %841 = vmatpush1.bf16.msra.mxu0 %v4240_v12  ;;  %4039 = vmatpush1.bf16.msra.mxu1 %v4240_v12 }
 0x152   : > { %842 = vmatprep.subr.bf16.mxu0 %v4916_v1  ;;  %4028 = vmatprep.subr.bf16.mxu1 %v4916_v1 }
 0x155   : > { %843 = vmatpush1.bf16.msra.mxu0 %v4241_v13  ;;  %4040 = vmatpush1.bf16.msra.mxu1 %v4241_v13 }
 0x156   : > { %844 = vmatprep.subr.bf16.mxu0 %v4916_v1  ;;  %4029 = vmatprep.subr.bf16.mxu1 %v4916_v1 }
 0x159   : > { %845 = vmatpush1.bf16.msra.mxu0 %v4242_v14  ;;  %4041 = vmatpush1.bf16.msra.mxu1 %v4242_v14 }
 0x15a   : > { %846 = vmatprep.subr.bf16.mxu0 %v4916_v1  ;;  %4030 = vmatprep.subr.bf16.mxu1 %v4916_v1 }
 0x15d   : > { %847 = vmatpush1.bf16.msra.mxu0 %v4243_v15  ;;  %4042 = vmatpush1.bf16.msra.mxu1 %v4243_v15 }
 0x160   : > { %857 = vmatmul.mubr.bf16.vlgmr.msra.gmra.mrb[0].mxu0 %v4244_v16  ;;  %865 = vmatmul.mubr.bf16.vlgmr.msra.gmra.mrb[0].mxu1 %v3615_v17 }
 0x233   : > { %v858_v20 = vpop.f32.mrb[0].mxu0  ;;  %v866_v21 = vpop.f32.mrb[0].mxu1 }
 0x234   : > { %v859_v23 = vadd.f32 %v858_v20, %v727_v18  ;;  %v867_v24 = vadd.f32 %v866_v21, %v729_v19  ;;  %v860_v25 = vpop.f32.mrb[1].mxu0  ;;  %v868_v26 = vpop.f32.mrb[1].mxu1 }
 0x235   : > { %v861_v27 = vpop.f32.mrb[2].mxu0  ;;  %v869_v28 = vpop.f32.mrb[2].mxu1 }
 0x236   : > { %872 = vst [vmem:[#allocation2] sm:$0xff] %v859_v23  ;;  %874 = vst [vmem:[#allocation2 + $0x10] sm:$0xff] %v867_v24  ;;  %v862_v29 = vadd.f32 %v861_v27, %v728_v22  ;;  %v863_v30 = vpop.f32.mrb[3].mxu0  ;;  %v870_v31 = vpop.f32.mrb[3].mxu1 }
 0x238   : > { %873 = vst [vmem:[#allocation2 + $0x8] sm:$0xff] %v862_v29 }
 0x239 PF: > { %v4264_v35 = vld [vmem:[%s5372_s3 + $0x4] ss:$12 sps:$4 sm:$0xff]   ;;  %v4266_v36 = vld [vmem:[%s5372_s3] ss:$12 sps:$4 sm:$0xff]   ;;  %v4267_v37 = vld [vmem:[%s5372_s3 + $0x8] ss:$12 sps:$4 sm:$0xff]   ;;  %v880_v15 = vlaneseq }
 0x23a   : > { %v4268_v38 = vld [vmem:[%s5372_s3 + $0x1c] ss:$12 sps:$4 sm:$0xff]   ;;  %1094 = vmatprep.subr.bf16.mxu0 %v4264_v35  ;;  %3915 = vmatprep.subr.bf16.mxu1 %v4267_v37  ;;  %v4270_v51 = vld [vmem:[%s5372_s3 + $0x18] ss:$12 sps:$4 sm:$0xff]   ;;  %v4271_v52 = vld [vmem:[%s5372_s3 + $0x20] ss:$12 sps:$4 sm:$0xff]  }
 0x23b   : > { %1095 = vmatpush1.bf16.msra.mxu0 %v4266_v36  ;;  %3916 = vmatpush3.bf16.msra.mxu1 %v4267_v37  ;;  %v4272_v53 = vld [vmem:[%s5372_s3 + $0x34] ss:$12 sps:$4 sm:$0xff]   ;;  %v4274_v54 = vld [vmem:[%s5372_s3 + $0x30] ss:$12 sps:$4 sm:$0xff]   ;;  %v4275_v55 = vld [vmem:[%s5372_s3 + $0x38] ss:$12 sps:$4 sm:$0xff]  }
 0x23c   : > { %1096 = vmatprep.subr.bf16.mxu0 %v4268_v38  ;;  %3917 = vmatprep.subr.bf16.mxu1 %v4271_v52  ;;  %v4276_v56 = vld [vmem:[%s5372_s3 + $0x4c] ss:$12 sps:$4 sm:$0xff]   ;;  %v4278_v57 = vld [vmem:[%s5372_s3 + $0x48] ss:$12 sps:$4 sm:$0xff]   ;;  %v4279_v58 = vld [vmem:[%s5372_s3 + $0x50] ss:$12 sps:$4 sm:$0xff]  }
 0x23d   : > { %v875_v32 = vld [vmem:[#allocation2] sm:$0xff]  ;;  %v877_v33 = vld [vmem:[#allocation2 + $0x10] sm:$0xff]  ;;  %v4284_v62 = vld [vmem:[%s5372_s3 + $0x7c] ss:$12 sps:$4 sm:$0xff]   ;;  %v4917_v3 = vmov 0   ;;  %v5459_v18 = vshrl.u32 %v880_v15, 7 }
 0x23e   : > { %884 = vadd.xlane.f32.xlu0 %v875_v32  ;;  %888 = vadd.xlane.f32.xlu1 %v877_v33  ;;  %v4280_v59 = vld [vmem:[%s5372_s3 + $0x64] ss:$12 sps:$4 sm:$0xff]   ;;  %v4282_v60 = vld [vmem:[%s5372_s3 + $0x60] ss:$12 sps:$4 sm:$0xff]   ;;  %v4283_v61 = vld [vmem:[%s5372_s3 + $0x68] ss:$12 sps:$4 sm:$0xff]  }
 0x23f   : > { %v876_v34 = vld [vmem:[#allocation2 + $0x8] sm:$0xff]  ;;  %1097 = vmatpush1.bf16.msra.mxu0 %v4270_v51  ;;  %3918 = vmatpush3.bf16.msra.mxu1 %v4271_v52  ;;  %v4287_v63 = vld [vmem:[%s5372_s3 + $0x80] ss:$12 sps:$4 sm:$0xff]   ;;  %v4294_v7 = vld [vmem:[%s5372_s3 + $0xa8] ss:$12 sps:$4 sm:$0xff]   ;;  %v5462_v19 = vsub.s32 0, %v5459_v18 }
 0x240   : > { %1098 = vmatprep.subr.bf16.mxu0 %v4272_v53  ;;  %3919 = vmatprep.subr.bf16.mxu1 %v4275_v55  ;;  %v4286_v0 = vld [vmem:[%s5372_s3 + $0x78] ss:$12 sps:$4 sm:$0xff]   ;;  %v4288_v1 = vld [vmem:[%s5372_s3 + $0x94] ss:$12 sps:$4 sm:$0xff]   ;;  %v4290_v4 = vld [vmem:[%s5372_s3 + $0x90] ss:$12 sps:$4 sm:$0xff]  }
 0x241   : > { %v4291_v2 = vld [vmem:[%s5372_s3 + $0x98] ss:$12 sps:$4 sm:$0xff]   ;;  %1126 = vmatprep.mubr.bf16.mxu0 %v4917_v3  ;;  %v4295_v6 = vld [vmem:[%s5372_s3 + $0xb0] ss:$12 sps:$4 sm:$0xff]   ;;  %v5471_v24 = vsub.s32 1, %v5459_v18  ;;  %v1195_v38 = vsub.s32 4, %v5459_v18 }
 0x242   : > { %886 = vadd.xlane.f32.xlu0 %v876_v34  ;;  %v4292_v5 = vld [vmem:[%s5372_s3 + $0xac] ss:$12 sps:$4 sm:$0xff]   ;;  %v5465_v20 = vld [vmem:[%s5409_s28] sm:$0xff]  ;;  %vm1220_vm1 = vcmask 261120   ;;  %vm1323_vm2 = vcmask 1043456   ;;  %vm1281_vm4 = vcmask 195584  }
 0x243   : > { %1099 = vmatpush1.bf16.msra.mxu0 %v4274_v54  ;;  %3920 = vmatpush3.bf16.msra.mxu1 %v4275_v55  ;;  %v921_v23 = vrot.slane %v5465_v20, %v5462_v19  ;;  %v928_v30 = vrot.slane %v5465_v20, %v5471_v24  ;;  %s4919_s3 = smov 96   ;;  %s4920_s23 = smov 64   ;;  %vm1915_vm5 = vcmask 523264   ;;  %vm1919_vm6 = vcmask 785408  }
 0x244   : > { %1100 = vmatprep.subr.bf16.mxu0 %v4276_v56  ;;  %3921 = vmatprep.subr.bf16.mxu1 %v4279_v58  ;;  %s4921_s17 = smov 32  }
 0x247   : > { %1101 = vmatpush1.bf16.msra.mxu0 %v4278_v57  ;;  %3922 = vmatpush3.bf16.msra.mxu1 %v4279_v58 }
 0x248   : > { %1102 = vmatprep.subr.bf16.mxu0 %v4280_v59  ;;  %3923 = vmatprep.subr.bf16.mxu1 %v4283_v61 }
 0x24b   : > { %1103 = vmatpush1.bf16.msra.mxu0 %v4282_v60  ;;  %3924 = vmatpush3.bf16.msra.mxu1 %v4283_v61 }
 0x24c   : > { %1104 = vmatprep.subr.bf16.mxu0 %v4284_v62  ;;  %3925 = vmatprep.subr.bf16.mxu1 %v4287_v63 }
 0x24f   : > { %1105 = vmatpush1.bf16.msra.mxu0 %v4286_v0  ;;  %3926 = vmatpush3.bf16.msra.mxu1 %v4287_v63 }
 0x250   : > { %1106 = vmatprep.subr.bf16.mxu0 %v4288_v1  ;;  %3927 = vmatprep.subr.bf16.mxu1 %v4291_v2 }
 0x253   : > { %1107 = vmatpush1.bf16.msra.mxu0 %v4290_v4  ;;  %3928 = vmatpush3.bf16.msra.mxu1 %v4291_v2 }
 0x254   : > { %1108 = vmatprep.subr.bf16.mxu0 %v4292_v5  ;;  %3929 = vmatprep.subr.bf16.mxu1 %v4295_v6 }
 0x257   : > { %1109 = vmatpush1.bf16.msra.mxu0 %v4294_v7  ;;  %3930 = vmatpush3.bf16.msra.mxu1 %v4295_v6 }
 0x2cb   : > { %v885_v39 = vpop.xlane.xlu0 %884  ;;  %v889_v40 = vpop.xlane.xlu1 %888 }
 0x2cc   : > { %v891_v41 = vmul.f32 0.0078125, %v885_v39  ;;  %v893_v42 = vmul.f32 0.0078125, %v889_v40  ;;  %v1204_v39 = vsub.s32 5, %v5459_v18  ;;  %v1213_v40 = vsub.s32 6, %v5459_v18 }
 0x2ce   : > { %v5425_v43 = vsub.f32 %v875_v32, %v891_v41  ;;  %v5427_v44 = vsub.f32 %v877_v33, %v893_v42  ;;  %v1196_v41 = vrot.slane %v5465_v20, %v1195_v38 }
 0x2cf   : > { %v887_v45 = vpop.xlane.xlu0 %886 }
 0x2d0   : > { %v892_v46 = vmul.f32 0.0078125, %v887_v45  ;;  %v897_v47 = vmul.f32 %v5425_v43, %v5425_v43  ;;  %v899_v49 = vmul.f32 %v5427_v44, %v5427_v44 }
 0x2d2   : > { %v5431_v48 = vsub.f32 %v876_v34, %v892_v46  ;;  %900 = vadd.xlane.f32.xlu1 %v897_v47  ;;  %v1214_v46 = vrot.slane %v5465_v20, %v1213_v40 }
 0x2d4   : > { %v898_v50 = vmul.f32 %v5431_v48, %v5431_v48 }
 0x2d6   : > { %904 = vadd.xlane.f32.xlu1 %v899_v49  ;;  %902 = vadd.xlane.f32.xlu0 %v898_v50 }
 0x35f   : > { %v901_v8 = vpop.xlane.xlu1 %900 }
 0x360   : > { %v906_v9 = vmul.f32 0.0078125, %v901_v8 }
 0x362   : > { %v909_v10 = vadd.f32 1e-06, %v906_v9 }
 0x363   : > { %v905_v11 = vpop.xlane.xlu1 %904  ;;  %v903_v12 = vpop.xlane.xlu0 %902 }
 0x364   : > { %4384 = vrsqrt.f32 %v909_v10  ;;  %v908_v13 = vmul.f32 0.0078125, %v905_v11  ;;  %v907_v14 = vmul.f32 0.0078125, %v903_v12  ;;  %v881_v11 = vand.u32 127, %v880_v15 }
 0x365   : > { %v4918_v12 = vmov -1e+09  }
 0x366   : > { %v911_v16 = vadd.f32 1e-06, %v908_v13  ;;  %v910_v17 = vadd.f32 1e-06, %v907_v14  ;;  %vm882_vm3 = vcmp.lt.s32.totalorder %v881_v11, 17 }
 0x367   : > { %v5515_v13 = vsel %vm882_vm3, 0.0, %v4918_v12 }
 0x368   : > { %4386 = vrsqrt.f32 %v911_v16 }
 0x369   : > { %4388 = vrsqrt.f32 %v910_v17 }
 0x36e   : > { %v4385_v21 = vpop.eup %4384 }
 0x36f   : > { %v915_v22 = vmul.f32 %v4385_v21, %v5425_v43  ;;  %v1205_v43 = vrot.slane %v5465_v20, %v1204_v39 }
 0x371   : > { %v922_v29 = vmul.f32 %v921_v23, %v915_v22 }
 0x372   : > { %v4387_v25 = vpop.eup %4386 }
 0x373   : > { %v4389_v26 = vpop.eup %4388  ;;  %v917_v27 = vmul.f32 %v4387_v25, %v5427_v44  ;;  %v929_v34 = vadd.f32 %v928_v30, %v922_v29 }
 0x374   : > { %v916_v28 = vmul.f32 %v4389_v26, %v5431_v48 }
 0x375   : > { %v924_v31 = vmul.f32 %v921_v23, %v917_v27 }
 0x376   : > { %v923_v32 = vmul.f32 %v921_v23, %v916_v28 }
 0x377   : > { %v931_v33 = vadd.f32 %v928_v30, %v924_v31 }
 0x378   : > { %v930_v35 = vadd.f32 %v928_v30, %v923_v32 }
 0x379   : > { %v933_v36 = vpack.c.bf16 %v931_v33, %v931_v33 }
 0x37a   : > { %v932_v37 = vpack.c.bf16 %v930_v35, %v929_v34 }
 0x37c   : > { %1127 = vmatmul.mubr.bf16.vlgmr.msra.gmra.mrb[0].mxu0 %v932_v37  ;;  %3931 = vmatprep.mubr.bf16.mxu1 %v932_v37 }
 0x37d   : > { %3932 = vmatmul.mubr.bf16.vlgmr.msra.gmra.mrb[0].mxu1 %v933_v36  ;;  %1136 = vmatprep.mubr.bf16.mxu0 %v4917_v3 }
 0x384   : > { %1137 = vmatmul.mubr.bf16.gmra.mrb[4].mxu0 %v933_v36 }
 0x44f   : > { %v1128_v42 = vpop.f32.mrb[0].mxu0 }
 0x450   : > { %v1130_v44 = vpop.f32.mrb[1].mxu0  ;;  %v3933_v45 = vpop.f32.mrb[0].mxu1  ;;  %v1197_v49 = vadd.f32 %v1196_v41, %v1128_v42 }
 0x451   : > { %v1132_v47 = vpop.f32.mrb[2].mxu0  ;;  %v1179_v48 = vpop.f32.mrb[1].mxu1  ;;  %v1206_v53 = vadd.f32 %v1205_v43, %v1130_v44  ;;  %v1217_v56 = vadd.f32 %v3933_v45, %v1214_v46 }
 0x452   : > { %v1198_v50 = vadd.f32 %v1196_v41, %v1132_v47  ;;  %v1134_v51 = vpop.f32.mrb[3].mxu0  ;;  %v3934_v52 = vpop.f32.mrb[2].mxu1  ;;  %v1215_v58 = vadd.f32 %v1214_v46, %v1179_v48 }
 0x453   : > { %v1207_v54 = vadd.f32 %v1205_v43, %v1134_v51  ;;  %v1182_v55 = vpop.f32.mrb[3].mxu1  ;;  %v5496_v0 = vpack.c.bf16 %v1217_v56, %v1217_v56 }
 0x454   : > { %v5484_v57 = vpack.c.bf16 %v1198_v50, %v1197_v49  ;;  %v1216_v59 = vadd.f32 %v1214_v46, %v1182_v55 }
 0x455   : > { %v5486_v60 = vpack.c.bf16 %v1207_v54, %v1206_v53  ;;  %v1325_v7 = vsel %vm1323_vm2, %v5496_v0, 0 }
 0x456   : > { %v5488_v61 = vpack.c.bf16 %v1216_v59, %v1215_v58  ;;  %3939 = vmatprep.mubr.msk.bf16.mxu0 %vm1220_vm1, %v5484_v57 }
 0x457   : > { %v1138_v62 = vpop.f32.mrb[4].mxu0  ;;  %4043 = vmatprep.subr.msk.bf16.mxu0 %vm1220_vm1, %v5486_v60  ;;  %v1228_v63 = vsel %vm1220_vm1, %v5486_v60, 0 }
 0x458   : > { %v1140_v1 = vpop.f32.mrb[5].mxu0  ;;  %3936 = vmatpush3.bf16.xpose.msra.mxu0 %v1228_v63  ;;  %3943 = vmatprep.subr.bf16.mxu1 %v5488_v61  ;;  %v1199_v9 = vadd.f32 %v1196_v41, %v1138_v62 }
 0x459   : > { %v1208_v2 = vadd.f32 %v1205_v43, %v1140_v1  ;;  %v1142_v4 = vpop.f32.mrb[6].mxu0  ;;  %3944 = vmatpush3.bf16.msra.mxu1 %v5488_v61 }
 0x45a   : > { %v1143_v5 = vpop.f32.mrb[7].mxu0  ;;  %4045 = vmatprep.subr.msk.bf16.mxu1 %vm1323_vm2, %v5496_v0  ;;  %v5510_v10 = vpack.c.bf16 %v1199_v9, %v1199_v9 }
 0x45b   : > { %v5502_v6 = vpack.c.bf16 %v1208_v2, %v1208_v2 }
 0x45d   : > { %4044 = vmatprep.subr.msk.bf16.mxu0 %vm1220_vm1, %v5502_v6  ;;  %3946 = vmatpush3.bf16.msra.mxu1 %v1325_v7  ;;  %v1231_v8 = vsel %vm1220_vm1, %v5502_v6, 0 }
 0x460   : > { %3938 = vmatpush3.bf16.xpose.msra.mxu0 %v1231_v8 }
 0x467   : > { %3940 = vmatmul.mubr.msk.bf16.vlgmr.msra.gmra.mrb[8].mxu0 %vm1220_vm1, %v5510_v10 }
 0x53a   : > { %v3941_v14 = vpop.f32.mrb[8].mxu0 }
 0x53b   : > { %v1267_v16 = vpop.f32.mrb[9].mxu0  ;;  %v1276_v23 = vadd.f32 %v3941_v14, %v5515_v13 }
 0x53c   : > { %v1268_v17 = vadd.f32 %v1267_v16, %v5515_v13  ;;  %v3942_v21 = vpop.f32.mrb[10].mxu0 }
 0x53d   : > { %v1270_v22 = vpop.f32.mrb[11].mxu0  ;;  %v1288_v27 = vsel %vm1281_vm4, %v1276_v23, -inf }
 0x53e   : > { %v1271_v25 = vadd.f32 %v1270_v22, %v5515_v13  ;;  %v1282_v26 = vsel %vm1281_vm4, %v1268_v17, -inf }
 0x53f   : > { %1283 = vmax.xlane.f32.xlu0 %v1282_v26 }
 0x540   : > { %v1285_v15 = vsel %vm1281_vm4, %v1271_v25, -inf }
 0x541   : > { %1286 = vmax.xlane.f32.xlu1 %v1285_v15 }
 0x543   : > { %1289 = vmax.xlane.f32.xlu0 %v1288_v27 }
 0x5cc   : > { %v1284_v28 = vpop.xlane.xlu0 %1283 }
 0x5cd   : > { %v1291_v29 = vsub.f32 %v1268_v17, %v1284_v28 }
 0x5ce   : > { %v1287_v30 = vpop.xlane.xlu1 %1286 }
 0x5cf   : > { %v1294_v31 = vmul.f32 1.442695, %v1291_v29  ;;  %v1292_v32 = vsub.f32 %v1271_v25, %v1287_v30 }
 0x5d0   : > { %v1290_v33 = vpop.xlane.xlu0 %1289 }
 0x5d1   : > { %4390 = vpow2.f32 %v1294_v31  ;;  %v1296_v34 = vmul.f32 1.442695, %v1292_v32  ;;  %v1293_v35 = vsub.f32 %v1276_v23, %v1290_v33 }
 0x5d3   : > { %4392 = vpow2.f32 %v1296_v34  ;;  %v1298_v36 = vmul.f32 1.442695, %v1293_v35 }
 0x5d5   : > { %4394 = vpow2.f32 %v1298_v36 }
 0x5db   : > { %v4391_v37 = vpop.eup %4390 }
 0x5dc   : > { %v1300_v38 = vsel %vm1281_vm4, %v4391_v37, 0.0 }
 0x5dd   : > { %v4393_v39 = vpop.eup %4392  ;;  %1301 = vadd.xlane.f32.xlu1 %v1300_v38 }
 0x5de   : > { %v1303_v40 = vsel %vm1281_vm4, %v4393_v39, 0.0 }
 0x5df   : > { %v4395_v41 = vpop.eup %4394  ;;  %1304 = vadd.xlane.f32.xlu0 %v1303_v40 }
 0x5e0   : > { %v1306_v42 = vsel %vm1281_vm4, %v4395_v41, 0.0 }
 0x5e1   : > { %1307 = vadd.xlane.f32.xlu1 %v1306_v42 }
 0x5f2   : > { %1385 = vrot.lane.b32.xlu1 %v5502_v6, %s4919_s3 }
 0x5f5   : > { %1383 = vrot.lane.b32.xlu0 %v5486_v60, %s4919_s3 }
 0x5f6   : > { %1377 = vrot.lane.b32.xlu1 %v5484_v57, %s4919_s3 }
 0x5f9   : > { %1379 = vrot.lane.b32.xlu0 %v5510_v10, %s4919_s3 }
 0x5fa   : > { %1550 = vrot.lane.b32.xlu1 %v5486_v60, %s4920_s23 }
 0x5fd   : > { %1546 = vrot.lane.b32.xlu0 %v5484_v57, %s4920_s23 }
 0x5fe   : > { %1552 = vrot.lane.b32.xlu1 %v5502_v6, %s4920_s23 }
 0x602   : > { %1548 = vrot.lane.b32.xlu1 %v5510_v10, %s4920_s23 }
 0x66a   : > { %v1302_v43 = vpop.xlane.xlu1 %1301 }
 0x66b   : > { %4396 = vrcp.f32 %v1302_v43 }
 0x66c   : > { %v1305_v44 = vpop.xlane.xlu0 %1304 }
 0x66d   : > { %4398 = vrcp.f32 %v1305_v44 }
 0x66e   : > { %v1308_v45 = vpop.xlane.xlu1 %1307 }
 0x66f   : > { %4400 = vrcp.f32 %v1308_v45 }
 0x670   : > { %v1384_v46 = vpop.permute.xlu0 %1383 }
 0x671   : > { %4046 = vmatprep.subr.msk.bf16.mxu1 %vm1220_vm1, %v1384_v46  ;;  %v1394_v56 = vsel %vm1220_vm1, %v1384_v46, 0 }
 0x672   : > { %v1386_v49 = vpop.permute.xlu1 %1385 }
 0x673   : > { %v1397_v59 = vsel %vm1220_vm1, %v1386_v49, 0 }
 0x674   : > { %v1380_v63 = vpop.permute.xlu0 %1379 }
 0x675   : > { %v4397_v47 = vpop.eup %4396 }
 0x676   : > { %v1312_v50 = vmul.f32 %v4397_v47, %v4391_v37  ;;  %v1378_v58 = vpop.permute.xlu1 %1377 }
 0x677   : > { %v4399_v48 = vpop.eup %4398 }
 0x678   : > { %v1313_v51 = vmul.f32 %v4399_v48, %v4393_v39  ;;  %v1547_v1 = vpop.permute.xlu0 %1546 }
 0x679   : > { %v4401_v52 = vpop.eup %4400 }
 0x67a   : > { %v1314_v53 = vmul.f32 %v4401_v52, %v4395_v41  ;;  %v1315_v54 = vpack.c.bf16 %v1313_v51, %v1312_v50  ;;  %v1551_v62 = vpop.permute.xlu1 %1550 }
 0x67b   : > { %v1561_v2 = vsel %vm1220_vm1, %v1551_v62, 0 }
 0x67c   : > { %3947 = vmatprep.mubr.msk.bf16.mxu1 %vm1281_vm4, %v1315_v54  ;;  %v1316_v55 = vpack.c.bf16 %v1314_v53, %v1314_v53 }
 0x67e   : > { %3948 = vmatmul.mubr.msk.bf16.vlgmr.msra.gmra.mrb[4].mxu1 %vm1281_vm4, %v1316_v55  ;;  %v1553_v4 = vpop.permute.xlu1 %1552 }
 0x67f   : > { %3952 = vmatpush3.bf16.xpose.msra.mxu1 %v1394_v56  ;;  %3955 = vmatprep.mubr.msk.bf16.mxu1 %vm1220_vm1, %v1378_v58  ;;  %v1564_v5 = vsel %vm1220_vm1, %v1553_v4, 0 }
 0x680   : > { %4047 = vmatprep.subr.msk.bf16.mxu1 %vm1220_vm1, %v1386_v49 }
 0x682   : > { %v1549_v7 = vpop.permute.xlu1 %1548 }
 0x687   : > { %3954 = vmatpush3.bf16.xpose.msra.mxu1 %v1397_v59 }
 0x688   : > { %4049 = vmatprep.subr.msk.bf16.mxu1 %vm1220_vm1, %v1551_v62 }
 0x68e   : > { %3956 = vmatmul.mubr.msk.bf16.vlgmr.msra.gmra.mrb[8].mxu1 %vm1220_vm1, %v1380_v63 }
 0x68f   : > { %3968 = vmatpush3.bf16.xpose.msra.mxu1 %v1561_v2  ;;  %3971 = vmatprep.mubr.msk.bf16.mxu1 %vm1220_vm1, %v1547_v1 }
 0x690   : > { %4050 = vmatprep.subr.msk.bf16.mxu1 %vm1220_vm1, %v1553_v4 }
 0x697   : > { %3970 = vmatpush3.bf16.xpose.msra.mxu1 %v1564_v5 }
 0x69e   : > { %3972 = vmatmul.mubr.msk.bf16.vlgmr.msra.gmra.mrb[12].mxu1 %vm1220_vm1, %v1549_v7 }
 0x751   : > { %v5556_v8 = vpop.f32.mrb[4].mxu1 }
 0x752   : > { %v5558_v9 = vpop.f32.mrb[5].mxu1 }
 0x753   : > { %v3950_v11 = vpop.f32.mrb[6].mxu1 }
 0x754   : > { %v5560_v12 = vpop.f32.mrb[7].mxu1 }
 0x761   : > { %v3957_v14 = vpop.f32.mrb[8].mxu1 }
 0x762   : > { %v1433_v16 = vpop.f32.mrb[9].mxu1  ;;  %v1442_v48 = vadd.f32 %v3957_v14, %v5515_v13 }
 0x763   : > { %v3958_v17 = vpop.f32.mrb[10].mxu1  ;;  %v1434_v47 = vadd.f32 %v1433_v16, %v5515_v13 }
 0x764   : > { %v1436_v21 = vpop.f32.mrb[11].mxu1  ;;  %v1453_v50 = vsel %vm1281_vm4, %v1442_v48, -inf }
 0x765   : > { %v1447_v49 = vsel %vm1281_vm4, %v1434_v47, -inf }
 0x771   : > { %v3973_v22 = vpop.f32.mrb[12].mxu1 }
 0x772   : > { %v1600_v23 = vpop.f32.mrb[13].mxu1  ;;  %v1609_v27 = vadd.f32 %v3973_v22, %v5515_v13 }
 0x773   : > { %v1601_v25 = vadd.f32 %v1600_v23, %v5515_v13  ;;  %v3974_v26 = vpop.f32.mrb[14].mxu1 }
 0x774   : > { %v1603_v15 = vpop.f32.mrb[15].mxu1  ;;  %v1620_v31 = vsel %vm1281_vm4, %v1609_v27, -inf }
 0x775   : > { %v1604_v28 = vadd.f32 %v1603_v15, %v5515_v13  ;;  %v1614_v29 = vsel %vm1281_vm4, %v1601_v25, -inf }
 0x776   : > { %1615 = vmax.xlane.f32.xlu0 %v1614_v29 }
 0x777   : > { %v1617_v30 = vsel %vm1281_vm4, %v1604_v28, -inf }
 0x778   : > { %1618 = vmax.xlane.f32.xlu1 %v1617_v30 }
 0x77a   : > { %1621 = vmax.xlane.f32.xlu0 %v1620_v31 }
 0x803   : > { %v1616_v32 = vpop.xlane.xlu0 %1615 }
 0x804   : > { %v1623_v33 = vsub.f32 %v1601_v25, %v1616_v32 }
 0x805   : > { %v1619_v34 = vpop.xlane.xlu1 %1618 }
 0x806   : > { %v1626_v35 = vmul.f32 1.442695, %v1623_v33  ;;  %v1624_v36 = vsub.f32 %v1604_v28, %v1619_v34 }
 0x807   : > { %v1622_v37 = vpop.xlane.xlu0 %1621 }
 0x808   : > { %4402 = vpow2.f32 %v1626_v35  ;;  %v1628_v38 = vmul.f32 1.442695, %v1624_v36  ;;  %v1625_v39 = vsub.f32 %v1609_v27, %v1622_v37 }
 0x80a   : > { %4404 = vpow2.f32 %v1628_v38  ;;  %v1630_v40 = vmul.f32 1.442695, %v1625_v39 }
 0x80c   : > { %4406 = vpow2.f32 %v1630_v40 }
 0x812   : > { %v4403_v41 = vpop.eup %4402 }
 0x813   : > { %v1632_v42 = vsel %vm1281_vm4, %v4403_v41, 0.0 }
 0x814   : > { %v4405_v43 = vpop.eup %4404  ;;  %1633 = vadd.xlane.f32.xlu0 %v1632_v42 }
 0x815   : > { %v1635_v45 = vsel %vm1281_vm4, %v4405_v43, 0.0 }
 0x816   : > { %v4407_v44 = vpop.eup %4406 }
 0x817   : > { %v1638_v46 = vsel %vm1281_vm4, %v4407_v44, 0.0 }
 0x818   : > { %1636 = vadd.xlane.f32.xlu0 %v1635_v45  ;;  %1639 = vadd.xlane.f32.xlu1 %v1638_v46 }
 0x829   : > { %1651 = vrot.lane.b32.xlu1 %v5496_v0, %s4920_s23 }
 0x82d   : > { %1715 = vrot.lane.b32.xlu1 %v5486_v60, %s4921_s17  ;;  %v1437_v60 = vadd.f32 %v1436_v21, %v5515_v13 }
 0x82e   : > { %1649 = vrot.lane.b32.xlu0 %v5488_v61, %s4920_s23 }
 0x831   : > { %1717 = vrot.lane.b32.xlu1 %v5502_v6, %s4921_s17  ;;  %v1450_v6 = vsel %vm1281_vm4, %v1437_v60, -inf }
 0x832   : > { %1711 = vrot.lane.b32.xlu0 %v5484_v57, %s4921_s17 }
 0x835   : > { %1713 = vrot.lane.b32.xlu1 %v5510_v10, %s4921_s17 }
 0x851   : > { %1448 = vmax.xlane.f32.xlu0 %v1447_v49 }
 0x855   : > { %1454 = vmax.xlane.f32.xlu0 %v1453_v50 }
 0x859   : > { %1451 = vmax.xlane.f32.xlu1 %v1450_v6 }
 0x8a1   : > { %v1634_v51 = vpop.xlane.xlu0 %1633 }
 0x8a2   : > { %4408 = vrcp.f32 %v1634_v51 }
 0x8a5   : > { %v1640_v57 = vpop.xlane.xlu1 %1639  ;;  %v1637_v52 = vpop.xlane.xlu0 %1636 }
 0x8a6   : > { %4410 = vrcp.f32 %v1640_v57 }
 0x8a7   : > { %4412 = vrcp.f32 %v1637_v52 }
 0x8a9   : > { %v1652_v10 = vpop.permute.xlu1 %1651  ;;  %v1650_v53 = vpop.permute.xlu0 %1649 }
 0x8aa   : > { %3975 = vmatprep.subr.bf16.mxu1 %v1650_v53  ;;  %v1661_v54 = vsel %vm1323_vm2, %v1652_v10, 0 }
 0x8ab   : > { %3976 = vmatpush3.bf16.msra.mxu1 %v1650_v53 }
 0x8ac   : > { %4051 = vmatprep.subr.msk.bf16.mxu1 %vm1323_vm2, %v1652_v10  ;;  %v4409_v55 = vpop.eup %4408 }
 0x8ad   : > { %v1716_v56 = vpop.permute.xlu1 %1715  ;;  %v1644_v63 = vmul.f32 %v4409_v55, %v4403_v41  ;;  %v1712_v7 = vpop.permute.xlu0 %1711 }
 0x8ae   : > { %v1726_v5 = vsel %vm1220_vm1, %v1716_v56, 0 }
 0x8af   : > { %3978 = vmatpush3.bf16.msra.mxu1 %v1661_v54 }
 0x8b0   : > { %v4411_v58 = vpop.eup %4410  ;;  %4052 = vmatprep.subr.msk.bf16.mxu1 %vm1220_vm1, %v1716_v56 }
 0x8b1   : > { %v4413_v59 = vpop.eup %4412  ;;  %v1646_v62 = vmul.f32 %v4411_v58, %v4407_v44  ;;  %v1718_v11 = vpop.permute.xlu1 %1717 }
 0x8b2   : > { %v1645_v1 = vmul.f32 %v4413_v59, %v4405_v43  ;;  %v1729_v14 = vsel %vm1220_vm1, %v1718_v11, 0 }
 0x8b3   : > { %v1648_v2 = vpack.c.bf16 %v1646_v62, %v1646_v62 }
 0x8b4   : > { %v1647_v4 = vpack.c.bf16 %v1645_v1, %v1644_v63 }
 0x8b5   : > { %v1714_v16 = vpop.permute.xlu1 %1713 }
 0x8b6   : > { %3979 = vmatprep.mubr.msk.bf16.mxu1 %vm1281_vm4, %v1647_v4 }
 0x8b7   : > { %3980 = vmatmul.mubr.msk.bf16.vlgmr.msra.gmra.mrb[16].mxu1 %vm1281_vm4, %v1648_v2 }
 0x8b8   : > { %3987 = vmatprep.mubr.msk.bf16.mxu1 %vm1220_vm1, %v1712_v7  ;;  %3984 = vmatpush3.bf16.xpose.msra.mxu1 %v1726_v5 }
 0x8b9   : > { %4053 = vmatprep.subr.msk.bf16.mxu1 %vm1220_vm1, %v1718_v11 }
 0x8c0   : > { %3986 = vmatpush3.bf16.xpose.msra.mxu1 %v1729_v14 }
 0x8c7   : > { %3988 = vmatmul.mubr.msk.bf16.vlgmr.msra.gmra.mrb[20].mxu1 %vm1220_vm1, %v1714_v16 }
 0x8c8   : > { %2339 = vmatprep.mubr.bf16.mxu1 %v4917_v3 }
 0x8de   : > { %v1449_v23 = vpop.xlane.xlu0 %1448 }
 0x8df   : > { %v1456_v29 = vsub.f32 %v1434_v47, %v1449_v23 }
 0x8e1   : > { %v1459_v31 = vmul.f32 1.442695, %v1456_v29 }
 0x8e2   : > { %v1455_v30 = vpop.xlane.xlu0 %1454 }
 0x8e3   : > { %v1458_v32 = vsub.f32 %v1442_v48, %v1455_v30 }
 0x8e5   : > { %v1463_v33 = vmul.f32 1.442695, %v1458_v32 }
 0x8e6   : > { %v1452_v17 = vpop.xlane.xlu1 %1451 }
 0x8e7   : > { %v1457_v25 = vsub.f32 %v1437_v60, %v1452_v17 }
 0x8e9   : > { %v1461_v28 = vmul.f32 1.442695, %v1457_v25 }
 0x8eb   : > { %4414 = vpow2.f32 %v1461_v28 }
 0x8ec   : > { %4416 = vpow2.f32 %v1459_v31 }
 0x8ed   : > { %4418 = vpow2.f32 %v1463_v33 }
 0x8f5   : > { %v4415_v41 = vpop.eup %4414 }
 0x8f6   : > { %v1468_v44 = vsel %vm1281_vm4, %v4415_v41, 0.0  ;;  %v4417_v46 = vpop.eup %4416 }
 0x8f7   : > { %v1465_v47 = vsel %vm1281_vm4, %v4417_v46, 0.0  ;;  %v4419_v48 = vpop.eup %4418 }
 0x8f8   : > { %v1471_v49 = vsel %vm1281_vm4, %v4419_v48, 0.0 }
 0x98a   : > { %v5600_v21 = vpop.f32.mrb[16].mxu1 }
 0x98b   : > { %v5602_v22 = vpop.f32.mrb[17].mxu1 }
 0x98c   : > { %v3982_v26 = vpop.f32.mrb[18].mxu1 }
 0x98d   : > { %v5604_v15 = vpop.f32.mrb[19].mxu1 }
 0x98e   : > { %v4254_v27 = vpack.i.bf16 %v5604_v15, %v5602_v22 }
 0x99a   : > { %v3989_v34 = vpop.f32.mrb[20].mxu1 }
 0x99b   : > { %v1774_v35 = vadd.f32 %v3989_v34, %v5515_v13  ;;  %v1765_v36 = vpop.f32.mrb[21].mxu1 }
 0x99c   : > { %v1766_v37 = vadd.f32 %v1765_v36, %v5515_v13  ;;  %v3990_v38 = vpop.f32.mrb[22].mxu1 }
 0x99d   : > { %v1768_v39 = vpop.f32.mrb[23].mxu1  ;;  %v1785_v40 = vsel %vm1281_vm4, %v1774_v35, -inf }
 0x99e   : > { %v1769_v42 = vadd.f32 %v1768_v39, %v5515_v13  ;;  %1786 = vmax.xlane.f32.xlu1 %v1785_v40  ;;  %v1779_v43 = vsel %vm1281_vm4, %v1766_v37, -inf }
 0x99f   : > { %1780 = vmax.xlane.f32.xlu0 %v1779_v43  ;;  %v4298_v43 = vld [vmem:[%s5378_s4 + $0x10] sm:$0xff]  }
 0x9a0   : > { %v1782_v45 = vsel %vm1281_vm4, %v1769_v42, -inf }
 0x9a2   : > { %1469 = vadd.xlane.f32.xlu1 %v1468_v44  ;;  %v4299_v44 = vld [vmem:[%s5378_s4 + $0x18] sm:$0xff]  }
 0x9a3   : > { %1783 = vmax.xlane.f32.xlu0 %v1782_v45  ;;  %v4300_v45 = vld [vmem:[%s5378_s4 + $0x20] sm:$0xff]  }
 0x9a7   : > { %1466 = vadd.xlane.f32.xlu0 %v1465_v47  ;;  %v4302_v47 = vld [vmem:[%s5378_s4 + $0x30] sm:$0xff]  }
 0x9ab   : > { %1472 = vadd.xlane.f32.xlu0 %v1471_v49 }
 0xa2b   : > { %v1787_v60 = vpop.xlane.xlu1 %1786 }
 0xa2c   : > { %v1790_v13 = vsub.f32 %v1774_v35, %v1787_v60  ;;  %v1781_v50 = vpop.xlane.xlu0 %1780  ;;  %v4303_v60 = vld [vmem:[%s5378_s4 + $0x38] sm:$0xff]  }
 0xa2d   : > { %v1788_v6 = vsub.f32 %v1766_v37, %v1781_v50 }
 0xa2e   : > { %v1795_v51 = vmul.f32 1.442695, %v1790_v13 }
 0xa2f   : > { %v1791_v57 = vmul.f32 1.442695, %v1788_v6  ;;  %v1470_v10 = vpop.xlane.xlu1 %1469 }
 0xa30   : > { %4420 = vpow2.f32 %v1795_v51  ;;  %v1784_v52 = vpop.xlane.xlu0 %1783 }
 0xa31   : > { %v1789_v53 = vsub.f32 %v1769_v42, %v1784_v52  ;;  %4422 = vpow2.f32 %v1791_v57  ;;  %v4297_v42 = vld [vmem:[%s5378_s4 + $0x8] sm:$0xff]  }
 0xa32   : > { %4424 = vrcp.f32 %v1470_v10 }
 0xa33   : > { %v1793_v54 = vmul.f32 1.442695, %v1789_v53 }
 0xa34   : > { %v1467_v55 = vpop.xlane.xlu0 %1466 }
 0xa35   : > { %4426 = vpow2.f32 %v1793_v54 }
 0xa36   : > { %4428 = vrcp.f32 %v1467_v55 }
 0xa38   : > { %v1473_v14 = vpop.xlane.xlu0 %1472 }
 0xa39   : > { %4430 = vrcp.f32 %v1473_v14 }
 0xa3a   : > { %v4421_v56 = vpop.eup %4420 }
 0xa3b   : > { %v1803_v58 = vsel %vm1281_vm4, %v4421_v56, 0.0  ;;  %v4423_v59 = vpop.eup %4422 }
 0xa3c   : > { %1804 = vadd.xlane.f32.xlu1 %v1803_v58  ;;  %v4425_v62 = vpop.eup %4424  ;;  %v1797_v1 = vsel %vm1281_vm4, %v4423_v59, 0.0 }
 0xa3d   : > { %v1478_v7 = vmul.f32 %v4425_v62, %v4415_v41  ;;  %v4296_v41 = vld [vmem:[%s5378_s4] sm:$0xff]  }
 0xa3f   : > { %v4427_v63 = vpop.eup %4426 }
 0xa40   : > { %v4429_v2 = vpop.eup %4428  ;;  %1798 = vadd.xlane.f32.xlu1 %v1797_v1  ;;  %v1800_v4 = vsel %vm1281_vm4, %v4427_v63, 0.0 }
 0xa41   : > { %1801 = vadd.xlane.f32.xlu0 %v1800_v4  ;;  %v1477_v5 = vmul.f32 %v4429_v2, %v4417_v46  ;;  %v4301_v46 = vld [vmem:[%s5378_s4 + $0x28] sm:$0xff]   ;;  %s6079_s4 = sld [smem:[#allocation26_spill]] }
 0xa43   : > { %v1480_v11 = vpack.c.bf16 %v1478_v7, %v1477_v5  ;;  %v4431_v26 = vpop.eup %4430 }
 0xa44   : > { %v1479_v29 = vmul.f32 %v4431_v26, %v4419_v48 }
 0xa45   : > { %3963 = vmatprep.mubr.msk.bf16.mxu0 %vm1281_vm4, %v1480_v11 }
 0xa46   : > { %v1481_v32 = vpack.c.bf16 %v1479_v29, %v1479_v29 }
 0xa47   : > { %p3744_p1 = scmp.ne.s32.totalorder %s6079_s4, 1 }
 0xa48   : > { %s6081_s13 = sld [smem:[#allocation43_spill]] (!%p3744_p1) }
 0xa51   : > { %1486 = vrot.lane.b32.xlu1 %v5496_v0, %s4919_s3 }
 0xa55   : > { %1814 = vrot.lane.b32.xlu1 %v5488_v61, %s4921_s17 }
 0xa57   : > { %1484 = vrot.lane.b32.xlu0 %v5488_v61, %s4919_s3 }
 0xa59   : > { %1816 = vrot.lane.b32.xlu1 %v5496_v0, %s4921_s17 }
 0xac9   : > { %v1805_v16 = vpop.xlane.xlu1 %1804 }
 0xacd   : > { %v1799_v17 = vpop.xlane.xlu1 %1798 }
 0xace   : > { %4432 = vrcp.f32 %v1799_v17  ;;  %v1802_v23 = vpop.xlane.xlu0 %1801 }
 0xacf   : > { %4434 = vrcp.f32 %v1802_v23 }
 0xad0   : > { %4436 = vrcp.f32 %v1805_v16 }
 0xad1   : > { %v1487_v25 = vpop.permute.xlu1 %1486 }
 0xad2   : > { %v1485_v28 = vpop.permute.xlu0 %1484  ;;  %v1496_v30 = vsel %vm1323_vm2, %v1487_v25, 0 }
 0xad3   : > { %3959 = vmatprep.subr.bf16.mxu0 %v1485_v28 }
 0xad4   : > { %3960 = vmatpush3.bf16.msra.mxu0 %v1485_v28 }
 0xad5   : > { %4048 = vmatprep.subr.msk.bf16.mxu0 %vm1323_vm2, %v1487_v25  ;;  %v1815_v61 = vpop.permute.xlu1 %1814 }
 0xad8   : > { %v4433_v0 = vpop.eup %4432  ;;  %3962 = vmatpush3.bf16.msra.mxu0 %v1496_v30 }
 0xad9   : > { %v4435_v31 = vpop.eup %4434  ;;  %3991 = vmatprep.subr.bf16.mxu0 %v1815_v61  ;;  %v1809_v33 = vmul.f32 %v4433_v0, %v4423_v59  ;;  %v1817_v36 = vpop.permute.xlu1 %1816 }
 0xada   : > { %v4437_v34 = vpop.eup %4436  ;;  %v1810_v35 = vmul.f32 %v4435_v31, %v4427_v63  ;;  %v1826_v39 = vsel %vm1323_vm2, %v1817_v36, 0  ;;  %v4468_v31 = vld [vmem:[#allocation2] sm:$0xff] }
 0xadb   : > { %3964 = vmatmul.mubr.msk.bf16.vlgmr.msra.gmra.mrb[12].mxu0 %vm1281_vm4, %v1481_v32  ;;  %v1811_v38 = vmul.f32 %v4437_v34, %v4421_v56  ;;  %v4469_v34 = vld [vmem:[#allocation2 + $0x8] sm:$0xff] }
 0xadc   : > { %3992 = vmatpush3.bf16.msra.mxu0 %v1815_v61  ;;  %v1812_v37 = vpack.c.bf16 %v1810_v35, %v1809_v33 }
 0xadd   : > { %4054 = vmatprep.subr.msk.bf16.mxu0 %vm1323_vm2, %v1817_v36  ;;  %v1813_v40 = vpack.c.bf16 %v1811_v38, %v1811_v38  ;;  %v4306_v38 = vld [vmem:[%s5380_s27 + $0x4] ss:$16 sps:$4 sm:$0xff]  }
 0xade   : > { %3995 = vmatprep.mubr.msk.bf16.mxu0 %vm1281_vm4, %v1812_v37  ;;  %v4304_v37 = vld [vmem:[%s5380_s27] ss:$16 sps:$4 sm:$0xff]   ;;  %2307 = vmatprep.subr.bf16.mxu1 %v4306_v38  ;;  %v2086_v38 = vsub.s32 3, %v5459_v18 }
 0xadf   : > { %2308 = vmatpush1.bf16.msra.mxu1 %v4304_v37 }
 0xae0   : > { %3994 = vmatpush3.bf16.msra.mxu0 %v1826_v39  ;;  %v4307_v39 = vld [vmem:[%s5380_s27 + $0x8] ss:$16 sps:$4 sm:$0xff]  }
 0xae1   : > { %3999 = vmatprep.subr.bf16.mxu0 %v4296_v41 }
 0xae3   : > { %3996 = vmatmul.mubr.msk.bf16.vlgmr.msra.gmra.mrb[16].mxu0 %vm1281_vm4, %v1813_v40  ;;  %v4309_v40 = vld [vmem:[%s5380_s27 + $0xc] ss:$16 sps:$4 sm:$0xff]  }
 0xae4   : > { %4000 = vmatpush3.bf16.msra.mxu0 %v4296_v41  ;;  %v4312_v41 = vld [vmem:[%s5380_s27 + $0x24] ss:$16 sps:$4 sm:$0xff]  }
 0xae5   : > { %4001 = vmatprep.subr.bf16.mxu0 %v4297_v42  ;;  %2309 = vmatprep.subr.bf16.mxu1 %v4312_v41 }
 0xae8   : > { %4002 = vmatpush3.bf16.msra.mxu0 %v4297_v42  ;;  %v4315_v42 = vld [vmem:[%s5380_s27 + $0x2c] ss:$16 sps:$4 sm:$0xff]  }
 0xae9   : > { %4003 = vmatprep.subr.bf16.mxu0 %v4298_v43 }
 0xaec   : > { %4004 = vmatpush3.bf16.msra.mxu0 %v4298_v43  ;;  %v4310_v43 = vld [vmem:[%s5380_s27 + $0x20] ss:$16 sps:$4 sm:$0xff]  }
 0xaed   : > { %4005 = vmatprep.subr.bf16.mxu0 %v4299_v44  ;;  %2310 = vmatpush1.bf16.msra.mxu1 %v4310_v43 }
 0xaf0   : > { %4006 = vmatpush3.bf16.msra.mxu0 %v4299_v44  ;;  %v4313_v44 = vld [vmem:[%s5380_s27 + $0x28] ss:$16 sps:$4 sm:$0xff]  }
 0xaf1   : > { %4007 = vmatprep.subr.bf16.mxu0 %v4300_v45 }
 0xaf4   : > { %4008 = vmatpush3.bf16.msra.mxu0 %v4300_v45 }
 0xaf5   : > { %4009 = vmatprep.subr.bf16.mxu0 %v4301_v46 }
 0xaf8   : > { %4010 = vmatpush3.bf16.msra.mxu0 %v4301_v46 }
 0xaf9   : > { %4011 = vmatprep.subr.bf16.mxu0 %v4302_v47 }
 0xafc   : > { %4012 = vmatpush3.bf16.msra.mxu0 %v4302_v47 }
 0xafd   : > { %4013 = vmatprep.subr.bf16.mxu0 %v4303_v60 }
 0xb00   : > { %4014 = vmatpush3.bf16.msra.mxu0 %v4303_v60 }
 0xb01   : > { %2358 = vmatprep.subr.bf16.mxu0 %v4309_v40 }
 0xbae   : > { %v3965_v48 = vpop.f32.mrb[12].mxu0 }
 0xbaf   : > { %1883 = vrot.lane.b32.xlu1 %v3965_v48, %s4921_s17  ;;  %v1532_v49 = vpop.f32.mrb[13].mxu0 }
 0xbb0   : > { %v3966_v13 = vpop.f32.mrb[14].mxu0 }
 0xbb1   : > { %v1535_v50 = vpop.f32.mrb[15].mxu0 }
 0xbb2   : > { %v4249_v6 = vpack.i.bf16 %v1535_v50, %v1532_v49 }
 0xbb3   : > { %1895 = vrot.lane.b32.xlu1 %v5600_v21, %s4920_s23 }
 0xbb4   : > { %4250 = vrot.lane.b32.xlu0 %v4249_v6, %s4921_s17 }
 0xbb6   : > { %v3997_v51 = vpop.f32.mrb[16].mxu0 }
 0xbb7   : > { %1907 = vrot.lane.b32.xlu1 %v3997_v51, %s4919_s3  ;;  %v1862_v57 = vpop.f32.mrb[17].mxu0 }
 0xbb8   : > { %4255 = vrot.lane.b32.xlu0 %v4254_v27, %s4920_s23  ;;  %v3998_v52 = vpop.f32.mrb[18].mxu0 }
 0xbb9   : > { %v1865_v10 = vpop.f32.mrb[19].mxu0 }
 0xbba   : > { %v4259_v53 = vpack.i.bf16 %v1865_v10, %v1862_v57  ;;  %v4318_v10 = vld [vmem:[%s5380_s27 + $0x44] ss:$16 sps:$4 sm:$0xff]  }
 0xbbb   : > { %2311 = vmatprep.subr.bf16.mxu1 %v4318_v10  ;;  %v4358_v10 = vld [vmem:[%s5382_s20 + $0x8] sm:$0xff]  }
 0xbbc   : > { %4260 = vrot.lane.b32.xlu0 %v4259_v53, %s4919_s3  ;;  %v4321_v53 = vld [vmem:[%s5380_s27 + $0x4c] ss:$16 sps:$4 sm:$0xff]  }
 0xc21   : > { %v1884_v54 = vpop.permute.xlu1 %1883 }
 0xc22   : > { %v1914_v1 = vsel %vm1220_vm1, %v5556_v8, %v1884_v54  ;;  %v4316_v54 = vld [vmem:[%s5380_s27 + $0x40] ss:$16 sps:$4 sm:$0xff]  }
 0xc23   : > { %2312 = vmatpush1.bf16.msra.mxu1 %v4316_v54  ;;  %v4360_v54 = vld [vmem:[%s5382_s20 + $0x50] sm:$0xff]  }
 0xc25   : > { %v1896_v21 = vpop.permute.xlu1 %1895 }
 0xc26   : > { %v4251_v55 = vpop.permute.xlu0 %4250  ;;  %v1918_v15 = vsel %vm1915_vm5, %v1914_v1, %v1896_v21  ;;  %v4324_v21 = vld [vmem:[%s5380_s27 + $0x64] ss:$16 sps:$4 sm:$0xff]   ;;  %v4328_v1 = vld [vmem:[%s5380_s27 + $0x80] ss:$16 sps:$4 sm:$0xff]  }
 0xc27   : > { %v4253_v58 = vunpack.i.h.bf16 %v4251_v55  ;;  %v4252_v59 = vunpack.i.l.bf16 %v4251_v55  ;;  %v4319_v55 = vld [vmem:[%s5380_s27 + $0x48] ss:$16 sps:$4 sm:$0xff]   ;;  %2313 = vmatprep.subr.bf16.mxu1 %v4324_v21  ;;  %v4362_v21 = vld [vmem:[%s5382_s20 + $0x10] sm:$0xff]  }
 0xc29   : > { %v1908_v22 = vpop.permute.xlu1 %1907  ;;  %v1913_v2 = vsel %vm1220_vm1, %v5560_v12, %v4253_v58  ;;  %v1912_v4 = vsel %vm1220_vm1, %v5558_v9, %v4252_v59  ;;  %v1943_v12 = vsub.s32 7, %v5459_v18  ;;  %v4322_v58 = vld [vmem:[%s5380_s27 + $0x60] ss:$16 sps:$4 sm:$0xff]   ;;  %v4325_v59 = vld [vmem:[%s5380_s27 + $0x68] ss:$16 sps:$4 sm:$0xff]  }
 0xc2a   : > { %v4256_v56 = vpop.permute.xlu0 %4255  ;;  %v1922_v11 = vsel %vm1919_vm6, %v1918_v15, %v1908_v22  ;;  %2314 = vmatpush1.bf16.msra.mxu1 %v4322_v58  ;;  %v4331_v22 = vld [vmem:[%s5380_s27 + $0x88] ss:$16 sps:$4 sm:$0xff]   ;;  %v4336_v15 = vld [vmem:[%s5380_s27 + $0xa4] ss:$16 sps:$4 sm:$0xff]  }
 0xc2b   : > { %v4258_v62 = vunpack.i.h.bf16 %v4256_v56  ;;  %v4257_v63 = vunpack.i.l.bf16 %v4256_v56  ;;  %v1924_v25 = vpack.c.bf16 %v1922_v11, %v1922_v11  ;;  %v1944_v26 = vrot.slane %v5465_v20, %v1943_v12  ;;  %v4470_v20 = vld [vmem:[#allocation2 + $0x10] sm:$0xff]  ;;  %v4327_v56 = vld [vmem:[%s5380_s27 + $0x6c] ss:$16 sps:$4 sm:$0xff]  }
 0xc2c   : > { %v4340_v11 = vld [vmem:[%s5380_s27 + $0xc0] ss:$16 sps:$4 sm:$0xff]   ;;  %v4364_v58 = vld [vmem:[%s5382_s20 + $0x58] sm:$0xff]  }
 0xc2d   : > { %v1916_v14 = vsel %vm1915_vm5, %v1912_v4, %v4257_v63  ;;  %v1917_v16 = vsel %vm1915_vm5, %v1913_v2, %v4258_v62  ;;  %v4330_v62 = vld [vmem:[%s5380_s27 + $0x84] ss:$16 sps:$4 sm:$0xff]   ;;  %v4333_v63 = vld [vmem:[%s5380_s27 + $0x8c] ss:$16 sps:$4 sm:$0xff]   ;;  %v4334_v2 = vld [vmem:[%s5380_s27 + $0xa0] ss:$16 sps:$4 sm:$0xff]  }
 0xc2e   : > { %v4261_v27 = vpop.permute.xlu0 %4260  ;;  %2315 = vmatprep.subr.bf16.mxu1 %v4330_v62  ;;  %v4337_v4 = vld [vmem:[%s5380_s27 + $0xa8] ss:$16 sps:$4 sm:$0xff]  }
 0xc2f   : > { %v4263_v5 = vunpack.i.h.bf16 %v4261_v27  ;;  %v4262_v7 = vunpack.i.l.bf16 %v4261_v27  ;;  %2316 = vmatpush1.bf16.msra.mxu1 %v4328_v1  ;;  %v4339_v27 = vld [vmem:[%s5380_s27 + $0xac] ss:$16 sps:$4 sm:$0xff]   ;;  %v4368_v1 = vld [vmem:[%s5382_s20 + $0x60] sm:$0xff]  }
 0xc30   : > { %2317 = vmatprep.subr.bf16.mxu1 %v4336_v15  ;;  %v4366_v62 = vld [vmem:[%s5382_s20 + $0x18] sm:$0xff]   ;;  %v4370_v15 = vld [vmem:[%s5382_s20 + $0x20] sm:$0xff]  }
 0xc31   : > { %v1920_v17 = vsel %vm1919_vm6, %v1916_v14, %v4262_v7  ;;  %v1921_v8 = vsel %vm1919_vm6, %v1917_v16, %v4263_v5  ;;  %v4342_v5 = vld [vmem:[%s5380_s27 + $0xc4] ss:$16 sps:$4 sm:$0xff]   ;;  %v4345_v7 = vld [vmem:[%s5380_s27 + $0xcc] ss:$16 sps:$4 sm:$0xff]   ;;  %v4343_v14 = vld [vmem:[%s5380_s27 + $0xc8] ss:$16 sps:$4 sm:$0xff]  }
 0xc32   : > { %v1923_v23 = vpack.c.bf16 %v1921_v8, %v1920_v17  ;;  %v4348_v16 = vld [vmem:[%s5380_s27 + $0xe4] ss:$16 sps:$4 sm:$0xff]   ;;  %v4351_v17 = vld [vmem:[%s5380_s27 + $0xec] ss:$16 sps:$4 sm:$0xff]   ;;  %v4346_v8 = vld [vmem:[%s5380_s27 + $0xe0] ss:$16 sps:$4 sm:$0xff]  }
 0xc33   : > { %2318 = vmatpush1.bf16.msra.mxu1 %v4334_v2  ;;  %v4372_v2 = vld [vmem:[%s5382_s20 + $0x68] sm:$0xff]  }
 0xc34   : > { %4015 = vmatprep.mubr.bf16.mxu0 %v1923_v23  ;;  %2319 = vmatprep.subr.bf16.mxu1 %v4342_v5  ;;  %v4349_v23 = vld [vmem:[%s5380_s27 + $0xe8] ss:$16 sps:$4 sm:$0xff]  }
 0xc35   : > { %4016 = vmatmul.mubr.bf16.vlgmr.msra.gmra.mrb[20].mxu0 %v1924_v25  ;;  %v4374_v5 = vld [vmem:[%s5382_s20 + $0x28] sm:$0xff]  }
 0xc36   : > { %2390 = vmatprep.mubr.bf16.mxu0 %v4917_v3  ;;  %2359 = vmatpush1.bf16.msra.mxu0 %v4307_v39 }
 0xc37   : > { %2360 = vmatprep.subr.bf16.mxu0 %v4315_v42  ;;  %2320 = vmatpush1.bf16.msra.mxu1 %v4340_v11  ;;  %v4376_v11 = vld [vmem:[%s5382_s20 + $0x70] sm:$0xff]  }
 0xc38   : > { %2321 = vmatprep.subr.bf16.mxu1 %v4348_v16  ;;  %v4378_v16 = vld [vmem:[%s5382_s20 + $0x30] sm:$0xff]  }
 0xc3a   : > { %2361 = vmatpush1.bf16.msra.mxu0 %v4313_v44 }
 0xc3b   : > { %2362 = vmatprep.subr.bf16.mxu0 %v4321_v53  ;;  %2322 = vmatpush1.bf16.msra.mxu1 %v4346_v8  ;;  %v4359_v53 = vld [vmem:[%s5382_s20 + $0x88] sm:$0xff]   ;;  %v4380_v8 = vld [vmem:[%s5382_s20 + $0x78] sm:$0xff]  }
 0xc3e   : > { %2363 = vmatpush1.bf16.msra.mxu0 %v4319_v55  ;;  %v4361_v55 = vld [vmem:[%s5382_s20 + $0xd0] sm:$0xff]  }
 0xc3f   : > { %2364 = vmatprep.subr.bf16.mxu0 %v4327_v56  ;;  %v4363_v56 = vld [vmem:[%s5382_s20 + $0x90] sm:$0xff]  }
 0xc42   : > { %2365 = vmatpush1.bf16.msra.mxu0 %v4325_v59  ;;  %v4365_v59 = vld [vmem:[%s5382_s20 + $0xd8] sm:$0xff]  }
 0xc43   : > { %2366 = vmatprep.subr.bf16.mxu0 %v4333_v63  ;;  %v4367_v63 = vld [vmem:[%s5382_s20 + $0x98] sm:$0xff]  }
 0xc46   : > { %2367 = vmatpush1.bf16.msra.mxu0 %v4331_v22  ;;  %v4369_v22 = vld [vmem:[%s5382_s20 + $0xe0] sm:$0xff]  }
 0xc47   : > { %2368 = vmatprep.subr.bf16.mxu0 %v4339_v27  ;;  %v4371_v27 = vld [vmem:[%s5382_s20 + $0xa0] sm:$0xff]  }
 0xc4a   : > { %2369 = vmatpush1.bf16.msra.mxu0 %v4337_v4  ;;  %v4373_v4 = vld [vmem:[%s5382_s20 + $0xe8] sm:$0xff]  }
 0xc4b   : > { %2370 = vmatprep.subr.bf16.mxu0 %v4345_v7  ;;  %v4375_v7 = vld [vmem:[%s5382_s20 + $0xa8] sm:$0xff]  }
 0xc4e   : > { %2371 = vmatpush1.bf16.msra.mxu0 %v4343_v14  ;;  %v4377_v14 = vld [vmem:[%s5382_s20 + $0xf0] sm:$0xff]  }
 0xc4f   : > { %2372 = vmatprep.subr.bf16.mxu0 %v4351_v17  ;;  %v4379_v17 = vld [vmem:[%s5382_s20 + $0xb0] sm:$0xff]  }
 0xc52   : > { %2373 = vmatpush1.bf16.msra.mxu0 %v4349_v23  ;;  %v4381_v23 = vld [vmem:[%s5382_s20 + $0xf8] sm:$0xff]  }
 0xd08   : > { %v4017_v9 = vpop.f32.mrb[20].mxu0 }
 0xd09   : > { %v2027_v28 = vpop.f32.mrb[21].mxu0  ;;  %v2036_v0 = vadd.f32 %v4017_v9, %v1944_v26 }
 0xd0a   : > { %v2028_v29 = vadd.f32 %v2027_v28, %v1944_v26  ;;  %v4018_v61 = vpop.f32.mrb[22].mxu0 }
 0xd0b   : > { %v2030_v30 = vpop.f32.mrb[23].mxu0  ;;  %v5671_v36 = vadd.f32 %v4470_v20, %v2036_v0  ;;  %v4471_v20 = vld [vmem:[%s5409_s28] sm:$0xff] }
 0xd0c   : > { %v5666_v32 = vadd.f32 %v4468_v31, %v2028_v29  ;;  %v2031_v33 = vadd.f32 %v2030_v30, %v1944_v26  ;;  %v5723_v31 = vsub.s32 2, %v5459_v18  ;;  %v2087_v43 = vrot.slane %v4471_v20, %v2086_v38 }
 0xd0e   : > { %v5668_v35 = vadd.f32 %v4469_v34, %v2031_v33  ;;  %2044 = vadd.xlane.f32.xlu0 %v5666_v32  ;;  %v2080_v37 = vrot.slane %v4471_v20, %v5723_v31 }
 0xd10   : > { %2046 = vadd.xlane.f32.xlu1 %v5668_v35 }
 0xd12   : > { %2048 = vadd.xlane.f32.xlu0 %v5671_v36 }
 0xd9b   : > { %v2045_v45 = vpop.xlane.xlu0 %2044 }
 0xd9c   : > { %v2050_v46 = vmul.f32 0.0078125, %v2045_v45 }
 0xd9d   : > { %v2047_v47 = vpop.xlane.xlu1 %2046 }
 0xd9e   : > { %v5684_v48 = vsub.f32 %v5666_v32, %v2050_v46  ;;  %v2051_v49 = vmul.f32 0.0078125, %v2047_v47 }
 0xd9f   : > { %v2049_v60 = vpop.xlane.xlu0 %2048 }
 0xda0   : > { %v5687_v13 = vsub.f32 %v5668_v35, %v2051_v49  ;;  %v2052_v50 = vmul.f32 0.0078125, %v2049_v60  ;;  %v2056_v6 = vmul.f32 %v5684_v48, %v5684_v48 }
 0xda2   : > { %v5692_v51 = vsub.f32 %v5671_v36, %v2052_v50  ;;  %2059 = vadd.xlane.f32.xlu0 %v2056_v6  ;;  %v2057_v57 = vmul.f32 %v5687_v13, %v5687_v13  ;;  %v4352_v50 = vld [vmem:[%s5382_s20 + $0x40] sm:$0xff]  }
 0xda3   : > { %v4353_v6 = vld [vmem:[%s5382_s20 + $0xc0] sm:$0xff]   ;;  %3837 = vmatprep.subr.bf16.mxu1 %v4352_v50 }
 0xda4   : > { %v2058_v52 = vmul.f32 %v5692_v51, %v5692_v51  ;;  %3865 = vmatprep.subr.bf16.mxu0 %v4353_v6 }
 0xda6   : > { %2061 = vadd.xlane.f32.xlu0 %v2057_v57  ;;  %2063 = vadd.xlane.f32.xlu1 %v2058_v52  ;;  %v4355_v57 = vld [vmem:[%s5382_s20 + $0x80] sm:$0xff]   ;;  %v4356_v52 = vld [vmem:[%s5382_s20 + $0x48] sm:$0xff]  }
 0xe2f   : > { %v2060_v25 = vpop.xlane.xlu0 %2059 }
 0xe30   : > { %v2065_v12 = vmul.f32 0.0078125, %v2060_v25  ;;  %v4382_v25 = vld [vmem:[%s5382_s20 + $0x38] sm:$0xff]  }
 0xe32   : > { %v2068_v26 = vadd.f32 1e-06, %v2065_v12  ;;  %v4383_v12 = vld [vmem:[%s5382_s20 + $0xb8] sm:$0xff]  }
 0xe33   : > { %v2064_v9 = vpop.xlane.xlu1 %2063  ;;  %v2062_v28 = vpop.xlane.xlu0 %2061 }
 0xe34   : > { %4438 = vrsqrt.f32 %v2068_v26  ;;  %v2067_v29 = vmul.f32 0.0078125, %v2064_v9  ;;  %v2066_v61 = vmul.f32 0.0078125, %v2062_v28  ;;  %v2125_v26 = vld [vmem:[%s5414_s8] sm:$0xf]  ;;  %s6080_s8 = sld [smem:[#allocation42_spill]] (!%p3744_p1) }
 0xe35   : > { %v5769_v9 = vrot.slane %v2125_v26, %v5462_v19  ;;  %v5772_v28 = vrot.slane %v2125_v26, %v5723_v31 }
 0xe36   : > { %v2070_v30 = vadd.f32 1e-06, %v2067_v29  ;;  %v2069_v0 = vadd.f32 1e-06, %v2066_v61  ;;  %v5775_v29 = vrot.slane %v2125_v26, %v5471_v24  ;;  %v5779_v61 = vrot.slane %v2125_v26, %v2086_v38 }
 0xe38   : > { %4440 = vrsqrt.f32 %v2070_v30 }
 0xe39   : > { %4442 = vrsqrt.f32 %v2069_v0 }
 0xe3e   : > { %v4439_v33 = vpop.eup %4438 }
 0xe3f   : > { %v2074_v34 = vmul.f32 %v4439_v33, %v5684_v48 }
 0xe41   : > { %v2081_v42 = vmul.f32 %v2080_v37, %v2074_v34 }
 0xe42   : > { %v4441_v39 = vpop.eup %4440 }
 0xe43   : > { %v4443_v40 = vpop.eup %4442  ;;  %v2076_v45 = vmul.f32 %v4441_v39, %v5692_v51  ;;  %v2088_v46 = vadd.f32 %v2087_v43, %v2081_v42  ;;  %v4354_v51 = vld [vmem:[%s5382_s20] sm:$0xff]  }
 0xe44   : > { %v2075_v41 = vmul.f32 %v4443_v40, %v5687_v13 }
 0xe45   : > { %v2083_v49 = vmul.f32 %v2080_v37, %v2076_v45 }
 0xe46   : > { %v2082_v44 = vmul.f32 %v2080_v37, %v2075_v41 }
 0xe47   : > { %v2090_v60 = vadd.f32 %v2087_v43, %v2083_v49 }
 0xe48   : > { %v2089_v47 = vadd.f32 %v2087_v43, %v2082_v44 }
 0xe49   : > { %v2092_v13 = vpack.c.bf16 %v2090_v60, %v2090_v60 }
 0xe4a   : > { %v2091_v48 = vpack.c.bf16 %v2089_v47, %v2088_v46 }
 0xe4c   : > { %2340 = vmatmul.mubr.bf16.vlgmr.msra.gmra.mrb[24].mxu1 %v2091_v48  ;;  %2391 = vmatmul.mubr.bf16.vlgmr.msra.gmra.mrb[24].mxu0 %v2091_v48 }
 0xe4d   : > { %2349 = vmatprep.mubr.bf16.mxu1 %v4917_v3  ;;  %2400 = vmatprep.mubr.bf16.mxu0 %v4917_v3  ;;  %v4357_v3 = vld [vmem:[%s5382_s20 + $0xc8] sm:$0xff]  }
 0xe4e   : > { %3838 = vmatpush3.bf16.msra.mxu1 %v4354_v51  ;;  %3866 = vmatpush3.bf16.msra.mxu0 %v4355_v57 }
 0xe4f   : > { %3839 = vmatprep.subr.bf16.mxu1 %v4356_v52  ;;  %3867 = vmatprep.subr.bf16.mxu0 %v4357_v3 }
 0xe52   : > { %3840 = vmatpush3.bf16.msra.mxu1 %v4358_v10  ;;  %3868 = vmatpush3.bf16.msra.mxu0 %v4359_v53 }
 0xe53   : > { %3841 = vmatprep.subr.bf16.mxu1 %v4360_v54  ;;  %3869 = vmatprep.subr.bf16.mxu0 %v4361_v55 }
 0xe54   : > { %2350 = vmatmul.mubr.bf16.gmra.mrb[28].mxu1 %v2092_v13  ;;  %2401 = vmatmul.mubr.bf16.gmra.mrb[28].mxu0 %v2092_v13 }
 0xe56   : > { %3842 = vmatpush3.bf16.msra.mxu1 %v4362_v21  ;;  %3870 = vmatpush3.bf16.msra.mxu0 %v4363_v56 }
 0xe57   : > { %3843 = vmatprep.subr.bf16.mxu1 %v4364_v58  ;;  %3871 = vmatprep.subr.bf16.mxu0 %v4365_v59 }
 0xe5a   : > { %3844 = vmatpush3.bf16.msra.mxu1 %v4366_v62  ;;  %3872 = vmatpush3.bf16.msra.mxu0 %v4367_v63 }
 0xe5b   : > { %3845 = vmatprep.subr.bf16.mxu1 %v4368_v1  ;;  %3873 = vmatprep.subr.bf16.mxu0 %v4369_v22 }
 0xe5e   : > { %3846 = vmatpush3.bf16.msra.mxu1 %v4370_v15  ;;  %3874 = vmatpush3.bf16.msra.mxu0 %v4371_v27 }
 0xe5f   : > { %3847 = vmatprep.subr.bf16.mxu1 %v4372_v2  ;;  %3875 = vmatprep.subr.bf16.mxu0 %v4373_v4 }
 0xe62   : > { %3848 = vmatpush3.bf16.msra.mxu1 %v4374_v5  ;;  %3876 = vmatpush3.bf16.msra.mxu0 %v4375_v7 }
 0xe63   : > { %3849 = vmatprep.subr.bf16.mxu1 %v4376_v11  ;;  %3877 = vmatprep.subr.bf16.mxu0 %v4377_v14 }
 0xe66   : > { %3850 = vmatpush3.bf16.msra.mxu1 %v4378_v16  ;;  %3878 = vmatpush3.bf16.msra.mxu0 %v4379_v17 }
 0xe67   : > { %3851 = vmatprep.subr.bf16.mxu1 %v4380_v8  ;;  %3879 = vmatprep.subr.bf16.mxu0 %v4381_v23 }
 0xe6a   : > { %3852 = vmatpush3.bf16.msra.mxu1 %v4382_v25  ;;  %3880 = vmatpush3.bf16.msra.mxu0 %v4383_v12 }
 0xf1f   : > { %v2341_v30 = vpop.f32.mrb[24].mxu1  ;;  %v2392_v0 = vpop.f32.mrb[24].mxu0 }
 0xf20   : > { %v5782_v33 = vadd.f32 %v2341_v30, %v5769_v9  ;;  %v5785_v34 = vadd.f32 %v2392_v0, %v5772_v28  ;;  %v2343_v20 = vpop.f32.mrb[25].mxu1  ;;  %v2394_v37 = vpop.f32.mrb[25].mxu0 }
 0xf21   : > { %v5788_v39 = vadd.f32 %v2343_v20, %v5775_v29  ;;  %v5791_v40 = vadd.f32 %v2394_v37, %v5779_v61  ;;  %v2345_v41 = vpop.f32.mrb[26].mxu1  ;;  %v2396_v42 = vpop.f32.mrb[26].mxu0 }
 0xf22   : > { %v2409_v38 = vmul.f32 %v5782_v33, %v5782_v33  ;;  %v2411_v43 = vmul.f32 %v5785_v34, %v5785_v34  ;;  %v5798_v44 = vadd.f32 %v2345_v41, %v5769_v9  ;;  %v5801_v45 = vadd.f32 %v2396_v42, %v5772_v28  ;;  %v2347_v46 = vpop.f32.mrb[27].mxu1  ;;  %v2398_v47 = vpop.f32.mrb[27].mxu0 }
 0xf23   : > { %v2410_v48 = vmul.f32 %v5788_v39, %v5788_v39  ;;  %v2412_v49 = vmul.f32 %v5791_v40, %v5791_v40  ;;  %v5808_v60 = vadd.f32 %v2347_v46, %v5775_v29  ;;  %v5811_v13 = vadd.f32 %v2398_v47, %v5779_v61 }
 0xf24   : > { %v2421_v50 = vmul.f32 %v2409_v38, %v5782_v33  ;;  %v2423_v6 = vmul.f32 %v2411_v43, %v5785_v34  ;;  %v2413_v51 = vmul.f32 %v5798_v44, %v5798_v44  ;;  %v2415_v57 = vmul.f32 %v5801_v45, %v5801_v45 }
 0xf25   : > { %v2422_v52 = vmul.f32 %v2410_v48, %v5788_v39  ;;  %v2424_v3 = vmul.f32 %v2412_v49, %v5791_v40  ;;  %v2414_v10 = vmul.f32 %v5808_v60, %v5808_v60  ;;  %v2416_v53 = vmul.f32 %v5811_v13, %v5811_v13 }
 0xf26   : > { %v2433_v54 = vmul.f32 0.044715, %v2421_v50  ;;  %v2435_v55 = vmul.f32 0.044715, %v2423_v6  ;;  %v2425_v21 = vmul.f32 %v2413_v51, %v5798_v44  ;;  %v2427_v56 = vmul.f32 %v2415_v57, %v5801_v45 }
 0xf27   : > { %v2434_v58 = vmul.f32 0.044715, %v2422_v52  ;;  %v2436_v59 = vmul.f32 0.044715, %v2424_v3  ;;  %v2426_v62 = vmul.f32 %v2414_v10, %v5808_v60  ;;  %v2428_v63 = vmul.f32 %v2416_v53, %v5811_v13  ;;  %v2351_v1 = vpop.f32.mrb[28].mxu1  ;;  %v2402_v22 = vpop.f32.mrb[28].mxu0 }
 0xf28   : > { %v2445_v15 = vadd.f32 %v2433_v54, %v5782_v33  ;;  %v2447_v27 = vadd.f32 %v2435_v55, %v5785_v34  ;;  %v2437_v2 = vmul.f32 0.044715, %v2425_v21  ;;  %v2439_v4 = vmul.f32 0.044715, %v2427_v56  ;;  %v2353_v5 = vpop.f32.mrb[29].mxu1  ;;  %v2404_v7 = vpop.f32.mrb[29].mxu0 }
 0xf29   : > { %v2446_v11 = vadd.f32 %v2434_v58, %v5788_v39  ;;  %v2448_v14 = vadd.f32 %v2436_v59, %v5791_v40  ;;  %v2438_v16 = vmul.f32 0.044715, %v2426_v62  ;;  %v2440_v17 = vmul.f32 0.044715, %v2428_v63  ;;  %v2355_v8 = vpop.f32.mrb[30].mxu1  ;;  %v2406_v23 = vpop.f32.mrb[30].mxu0 }
 0xf2a   : > { %v2457_v25 = vmul.f32 0.7978846, %v2445_v15  ;;  %v2459_v12 = vmul.f32 0.7978846, %v2447_v27  ;;  %v2449_v26 = vadd.f32 %v2437_v2, %v5798_v44  ;;  %v2451_v30 = vadd.f32 %v2439_v4, %v5801_v45  ;;  %v2356_v0 = vpop.f32.mrb[31].mxu1  ;;  %v2407_v20 = vpop.f32.mrb[31].mxu0 }
 0xf2b   : > { %v2458_v37 = vmul.f32 0.7978846, %v2446_v11  ;;  %v2460_v41 = vmul.f32 0.7978846, %v2448_v14  ;;  %v2450_v42 = vadd.f32 %v2438_v16, %v5808_v60  ;;  %v2452_v38 = vadd.f32 %v2440_v17, %v5811_v13 }
 0xf2c   : > { %4444 = vtanh.f32 %v2457_v25  ;;  %v2461_v43 = vmul.f32 0.7978846, %v2449_v26  ;;  %v5838_v46 = vadd.f32 %v2351_v1, %v5769_v9  ;;  %v2463_v47 = vmul.f32 0.7978846, %v2451_v30 }
 0xf2d   : > { %4446 = vtanh.f32 %v2459_v12  ;;  %v2462_v48 = vmul.f32 0.7978846, %v2450_v42  ;;  %v5841_v49 = vadd.f32 %v2402_v22, %v5772_v28  ;;  %v5846_v6 = vadd.f32 %v2353_v5, %v5775_v29 }
 0xf2e   : > { %4448 = vtanh.f32 %v2458_v37  ;;  %v2417_v50 = vmul.f32 %v5838_v46, %v5838_v46  ;;  %v5849_v51 = vadd.f32 %v2404_v7, %v5779_v61  ;;  %v2464_v57 = vmul.f32 0.7978846, %v2452_v38 }
 0xf2f   : > { %4450 = vtanh.f32 %v2460_v41  ;;  %v2419_v9 = vmul.f32 %v5841_v49, %v5841_v49  ;;  %v2418_v28 = vmul.f32 %v5846_v6, %v5846_v6 }
 0xf30   : > { %4452 = vtanh.f32 %v2461_v43  ;;  %v2429_v52 = vmul.f32 %v2417_v50, %v5838_v46  ;;  %v2420_v3 = vmul.f32 %v5849_v51, %v5849_v51 }
 0xf31   : > { %4454 = vtanh.f32 %v2463_v47  ;;  %v2431_v29 = vmul.f32 %v2419_v9, %v5841_v49  ;;  %v2430_v10 = vmul.f32 %v2418_v28, %v5846_v6 }
 0xf32   : > { %4456 = vtanh.f32 %v2462_v48  ;;  %v2441_v61 = vmul.f32 0.044715, %v2429_v52  ;;  %v2432_v53 = vmul.f32 %v2420_v3, %v5849_v51 }
 0xf33   : > { %4458 = vtanh.f32 %v2464_v57  ;;  %v2443_v54 = vmul.f32 0.044715, %v2431_v29  ;;  %v2442_v21 = vmul.f32 0.044715, %v2430_v10 }
 0xf34   : > { %v2453_v55 = vadd.f32 %v2441_v61, %v5838_v46  ;;  %v2444_v56 = vmul.f32 0.044715, %v2432_v53 }
 0xf35   : > { %v2455_v58 = vadd.f32 %v2443_v54, %v5841_v49  ;;  %v2454_v63 = vadd.f32 %v2442_v21, %v5846_v6 }
 0xf36   : > { %v4445_v59 = vpop.eup %4444  ;;  %v2465_v62 = vmul.f32 0.7978846, %v2453_v55  ;;  %v2456_v1 = vadd.f32 %v2444_v56, %v5849_v51 }
 0xf37   : > { %v4447_v22 = vpop.eup %4446  ;;  %v2481_v15 = vadd.f32 1.0, %v4445_v59  ;;  %v2467_v27 = vmul.f32 0.7978846, %v2455_v58  ;;  %v2466_v5 = vmul.f32 0.7978846, %v2454_v63 }
 0xf38   : > { %v4449_v2 = vpop.eup %4448  ;;  %v2483_v4 = vadd.f32 1.0, %v4447_v22  ;;  %4460 = vtanh.f32 %v2465_v62  ;;  %v2468_v7 = vmul.f32 0.7978846, %v2456_v1 }
 0xf39   : > { %v4451_v11 = vpop.eup %4450  ;;  %4462 = vtanh.f32 %v2467_v27  ;;  %v2482_v14 = vadd.f32 1.0, %v4449_v2  ;;  %v2493_v23 = vmul.f32 0.5, %v2481_v15 }
 0xf3a   : > { %v4453_v16 = vpop.eup %4452  ;;  %4464 = vtanh.f32 %v2466_v5  ;;  %v2484_v17 = vadd.f32 1.0, %v4451_v11  ;;  %v2495_v26 = vmul.f32 0.5, %v2483_v4  ;;  %v3711_v11 = vld [vmem:[%s5409_s28 + $0x8] ss:$0 sm:$0xff] }
 0xf3b   : > { %v4455_v8 = vpop.eup %4454  ;;  %v2485_v25 = vadd.f32 1.0, %v4453_v16  ;;  %4466 = vtanh.f32 %v2468_v7  ;;  %v2494_v41 = vmul.f32 0.5, %v2482_v14  ;;  %v2505_v47 = vmul.f32 %v2493_v23, %v5782_v33 }
 0xf3c   : > { %v4457_v12 = vpop.eup %4456  ;;  %v2487_v30 = vadd.f32 1.0, %v4455_v8  ;;  %v2496_v43 = vmul.f32 0.5, %v2484_v17  ;;  %v2507_v57 = vmul.f32 %v2495_v26, %v5785_v34 }
 0xf3d   : > { %v4459_v0 = vpop.eup %4458  ;;  %v2497_v20 = vmul.f32 0.5, %v2485_v25  ;;  %v2486_v37 = vadd.f32 1.0, %v4457_v12  ;;  %v2506_v3 = vmul.f32 %v2494_v41, %v5788_v39 }
 0xf3e   : > { %v2499_v42 = vmul.f32 0.5, %v2487_v30  ;;  %v2488_v38 = vadd.f32 1.0, %v4459_v0  ;;  %v2508_v53 = vmul.f32 %v2496_v43, %v5791_v40 }
 0xf3f   : > { %v2509_v48 = vmul.f32 %v2497_v20, %v5798_v44  ;;  %v2498_v50 = vmul.f32 0.5, %v2486_v37 }
 0xf40   : > { %v2511_v9 = vmul.f32 %v2499_v42, %v5801_v45  ;;  %v2500_v52 = vmul.f32 0.5, %v2488_v38 }
 0xf41   : > { %v2517_v28 = vpack.c.bf16 %v2509_v48, %v2505_v47  ;;  %v2510_v29 = vmul.f32 %v2498_v50, %v5808_v60 }
 0xf42   : > { %v4461_v61 = vpop.eup %4460  ;;  %v2519_v10 = vpack.c.bf16 %v2511_v9, %v2507_v57  ;;  %v2512_v54 = vmul.f32 %v2500_v52, %v5811_v13 }
 0xf43   : > { %v4463_v33 = vpop.eup %4462  ;;  %v2518_v55 = vpack.c.bf16 %v2510_v29, %v2506_v3  ;;  %v2489_v44 = vadd.f32 1.0, %v4461_v61 }
 0xf44   : > { %v4465_v21 = vpop.eup %4464  ;;  %v2520_v56 = vpack.c.bf16 %v2512_v54, %v2508_v53  ;;  %v2491_v34 = vadd.f32 1.0, %v4463_v33 }
 0xf45   : > { %v4467_v58 = vpop.eup %4466  ;;  %2817 = vmatprep.mubr.bf16.mxu1 %v2518_v55  ;;  %v2490_v45 = vadd.f32 1.0, %v4465_v21  ;;  %v2501_v59 = vmul.f32 0.5, %v2489_v44 }
 0xf46   : > { %2865 = vmatprep.mubr.bf16.mxu0 %v2520_v56  ;;  %2818 = vmatmul.mubr.bf16.vlgmr.msra.gmra.mrb[32].mxu1 %v2517_v28  ;;  %v2492_v39 = vadd.f32 1.0, %v4467_v58  ;;  %v2503_v60 = vmul.f32 0.5, %v2491_v34 }
 0xf47   : > { %2866 = vmatmul.mubr.bf16.vlgmr.msra.gmra.mrb[32].mxu0 %v2519_v10  ;;  %v2502_v62 = vmul.f32 0.5, %v2490_v45  ;;  %v2513_v13 = vmul.f32 %v2501_v59, %v5838_v46 }
 0xf48   : > { %v2504_v40 = vmul.f32 0.5, %v2492_v39  ;;  %v2515_v1 = vmul.f32 %v2503_v60, %v5841_v49 }
 0xf49   : > { %v2514_v63 = vmul.f32 %v2502_v62, %v5846_v6  ;;  %v2521_v2 = vpack.c.bf16 %v2513_v13, %v2513_v13 }
 0xf4a   : > { %v2516_v22 = vmul.f32 %v2504_v40, %v5849_v51  ;;  %v2523_v4 = vpack.c.bf16 %v2515_v1, %v2515_v1 }
 0xf4b   : > { %v2522_v15 = vpack.c.bf16 %v2514_v63, %v2514_v63  ;;  %v5885_v63 = vld [vmem:[%s6080_s8] sm:$0x3f] (!%p3744_p1) }
 0xf4c   : > { %v2524_v27 = vpack.c.bf16 %v2516_v22, %v2516_v22  ;;  %v2928_v1 = vrot.slane (!%p3744_p1), %v5885_v63, %v5462_v19 }
 0xf4d   : > { %2825 = vmatprep.mubr.bf16.mxu1 %v2522_v15 }
 0xf4e   : > { %2873 = vmatprep.mubr.bf16.mxu0 %v2524_v27  ;;  %2826 = vmatmul.mubr.bf16.gmra.mrb[36].mxu1 %v2521_v2  ;;  %v2935_v27 = vrot.slane (!%p3744_p1), %v5885_v63, %v5471_v24 }
 0xf4f   : > { %2874 = vmatmul.mubr.bf16.gmra.mrb[36].mxu0 %v2523_v4  ;;  %v2942_v4 = vrot.slane (!%p3744_p1), %v5885_v63, %v5723_v31 }
0x1019   : > { %v3853_v5 = vpop.f32.mrb[32].mxu1 }
0x101a   : > { %v3881_v7 = vpop.f32.mrb[32].mxu0  ;;  %v3854_v14 = vpop.f32.mrb[33].mxu1 }
0x101b   : > { %v3855_v16 = vadd.f32 %v3854_v14, %v3853_v5  ;;  %v3882_v46 = vpop.f32.mrb[33].mxu0  ;;  %v3856_v17 = vpop.f32.mrb[34].mxu1 }
0x101c   : > { %v3883_v6 = vadd.f32 %v3882_v46, %v3881_v7  ;;  %v3884_v8 = vpop.f32.mrb[34].mxu0  ;;  %v3857_v49 = vpop.f32.mrb[35].mxu1 }
0x101d   : > { %v2820_v23 = vadd.f32 %v3855_v16, %v3711_v11  ;;  %v3858_v51 = vadd.f32 %v3857_v49, %v3856_v17  ;;  %v3885_v25 = vpop.f32.mrb[35].mxu0 }
0x101e   : > { %v3886_v12 = vadd.f32 %v3885_v25, %v3884_v8  ;;  %v2955_v25 = vadd.s32 (!%p3744_p1), 16, %v5459_v18 }
0x101f   : > { %v2868_v26 = vadd.f32 %v3883_v6, %v2820_v23  ;;  %v2823_v30 = vadd.f32 %v3858_v51, %v3711_v11 }
0x1020   : > { %vm2958_vm7 = vcmp.lt.s32.totalorder (!%p3744_p1), %v2955_v25, 17  ;;  %v4489_v25 = vld [vmem:[#allocation12 + $0x50] ss:$8 sps:$4 sm:$0xff] (!%p3744_p1)  }
0x1021   : > { %v2881_v0 = vadd.f32 %v2868_v26, %v5666_v32  ;;  %v2871_v20 = vadd.f32 %v3886_v12, %v2823_v30  ;;  %v3859_v37 = vpop.f32.mrb[36].mxu1 }
0x1022   : > { %v3887_v41 = vpop.f32.mrb[36].mxu0  ;;  %v3860_v42 = vpop.f32.mrb[37].mxu1 }
0x1023   : > { %2884 = vst [vmem:[#allocation2] sm:$0xff] %v2881_v0  ;;  %v2882_v38 = vadd.f32 %v2871_v20, %v5668_v35  ;;  %v3861_v43 = vadd.f32 %v3860_v42, %v3859_v37  ;;  %v3888_v47 = vpop.f32.mrb[37].mxu0  ;;  %v3862_v48 = vpop.f32.mrb[38].mxu1  ;;  %2892 = vadd.xlane.f32.xlu0 (!%p3744_p1), %v2881_v0 }
0x1024   : > { %v3889_v50 = vadd.f32 %v3888_v47, %v3887_v41  ;;  %v3890_v57 = vpop.f32.mrb[38].mxu0  ;;  %v3863_v9 = vpop.f32.mrb[39].mxu1 }
0x1025   : > { %2885 = vst [vmem:[#allocation2 + $0x8] sm:$0xff] %v2882_v38  ;;  %v2828_v52 = vadd.f32 %v3861_v43, %v3711_v11  ;;  %v3891_v28 = vpop.f32.mrb[39].mxu0  ;;  %2890 = sbr.rel (%p3744_p1) target bundleno = 5431 (0x1537), region = 112 }
0x1027   : > { %v2876_v3 = vadd.f32 %v3889_v50, %v2828_v52  ;;  %2894 = vadd.xlane.f32.xlu0 (!%p3744_p1), %v2882_v38 }
0x1029   : > { %v2883_v29 = vadd.f32 %v2876_v3, %v5671_v36 }
0x102b   : > { %2886 = vst [vmem:[#allocation2 + $0x10] sm:$0xff] %v2883_v29  ;;  %2896 = vadd.xlane.f32.xlu1 (!%p3744_p1), %v2883_v29 }
0x10b0   : > { %v2893_v32 = vpop.xlane.xlu0 %2892 }
0x10b1   : > { %v2898_v61 = vmul.f32 0.0078125, %v2893_v32 }
0x10b3   : > { %v2901_v53 = vsub.f32 %v2881_v0, %v2898_v61 }
0x10b4   : > { %v2895_v33 = vpop.xlane.xlu0 %2894 }
0x10b5   : > { %v2899_v55 = vmul.f32 0.0078125, %v2895_v33  ;;  %v2904_v44 = vmul.f32 %v2901_v53, %v2901_v53 }
0x10b7   : > { %v2902_v21 = vsub.f32 %v2882_v38, %v2899_v55  ;;  %2907 = vadd.xlane.f32.xlu1 %v2904_v44 }
0x10b8   : > { %v2897_v35 = vpop.xlane.xlu1 %2896 }
0x10b9   : > { %v2900_v10 = vmul.f32 0.0078125, %v2897_v35  ;;  %v2905_v36 = vmul.f32 %v2902_v21, %v2902_v21 }
0x10bb   : > { %v2903_v54 = vsub.f32 %v2883_v29, %v2900_v10  ;;  %2909 = vadd.xlane.f32.xlu0 %v2905_v36 }
0x10bd   : > { %v2906_v56 = vmul.f32 %v2903_v54, %v2903_v54 }
0x10bf   : > { %2911 = vadd.xlane.f32.xlu1 %v2906_v56 }
0x1144   : > { %v2908_v34 = vpop.xlane.xlu1 %2907 }
0x1145   : > { %v2913_v58 = vmul.f32 0.0078125, %v2908_v34 }
0x1147   : > { %v2916_v45 = vadd.f32 1e-06, %v2913_v58 }
0x1148   : > { %v2910_v39 = vpop.xlane.xlu0 %2909 }
0x1149   : > { %4512 = vrsqrt.f32 %v2916_v45  ;;  %v2914_v62 = vmul.f32 0.0078125, %v2910_v39 }
0x114b   : > { %v2917_v13 = vadd.f32 1e-06, %v2914_v62 }
0x114c   : > { %v2912_v59 = vpop.xlane.xlu1 %2911 }
0x114d   : > { %v2915_v60 = vmul.f32 0.0078125, %v2912_v59 }
0x114f   : > { %v2918_v40 = vadd.f32 1e-06, %v2915_v60 }
0x1151   : > { %4514 = vrsqrt.f32 %v2918_v40 }
0x1152   : > { %4516 = vrsqrt.f32 %v2917_v13 }
0x1153   : > { %v4513_v22 = vpop.eup %4512 }
0x1154   : > { %v2922_v15 = vmul.f32 %v4513_v22, %v2901_v53 }
0x1156   : > { %v2929_v2 = vmul.f32 %v2928_v1, %v2922_v15  ;;  %v4472_v15 = vld [vmem:[#allocation12 + $0x4] ss:$8 sps:$4 sm:$0xff]  }
0x1157   : > { %3132 = vmatprep.subr.bf16.mxu0 %v4472_v15 }
0x1158   : > { %v2936_v11 = vadd.f32 %v2935_v27, %v2929_v2  ;;  %v4475_v2 = vld [vmem:[#allocation12 + $0x14] ss:$8 sps:$4 sm:$0xff]  }
0x115a   : > { %v2943_v46 = vmul.f32 %v2942_v4, %v2936_v11 }
0x115b   : > { %v4515_v5 = vpop.eup %4514 }
0x115c   : > { %v4517_v7 = vpop.eup %4516  ;;  %v2924_v14 = vmul.f32 %v4515_v5, %v2903_v54  ;;  %2946 = vadd.xlane.f32.xlu0 %v2943_v46  ;;  %v4480_v46 = vld [vmem:[#allocation12 + $0x20] ss:$8 sps:$4 sm:$0xff]  }
0x115d   : > { %v2923_v16 = vmul.f32 %v4517_v7, %v2902_v21 }
0x115e   : > { %v2931_v17 = vmul.f32 %v2928_v1, %v2924_v14  ;;  %v4477_v14 = vld [vmem:[#allocation12 + $0x10] ss:$8 sps:$4 sm:$0xff]  }
0x115f   : > { %v2930_v6 = vmul.f32 %v2928_v1, %v2923_v16  ;;  %v4478_v16 = vld [vmem:[#allocation12 + $0x24] ss:$8 sps:$4 sm:$0xff]  }
0x1160   : > { %v2938_v8 = vadd.f32 %v2935_v27, %v2931_v17  ;;  %v4481_v17 = vld [vmem:[#allocation12 + $0x34] ss:$8 sps:$4 sm:$0xff]  }
0x1161   : > { %v2937_v49 = vadd.f32 %v2935_v27, %v2930_v6  ;;  %v4474_v27 = vld [vmem:[#allocation12] ss:$8 sps:$4 sm:$0xff]   ;;  %v4483_v6 = vld [vmem:[#allocation12 + $0x30] ss:$8 sps:$4 sm:$0xff]  }
0x1162   : > { %v2945_v23 = vmul.f32 %v2942_v4, %v2938_v8  ;;  %3133 = vmatpush1.bf16.msra.mxu0 %v4474_v27  ;;  %v3305_v27 = vrot.slane %v5885_v63, 5 }
0x1163   : > { %v2944_v51 = vmul.f32 %v2942_v4, %v2937_v49  ;;  %3134 = vmatprep.subr.bf16.mxu0 %v4475_v2 }
0x1164   : > { %2950 = vadd.xlane.f32.xlu0 %v2945_v23  ;;  %v4486_v23 = vld [vmem:[#allocation12 + $0x40] ss:$8 sps:$4 sm:$0xff]  }
0x1165   : > { %2948 = vadd.xlane.f32.xlu1 %v2944_v51  ;;  %v4487_v51 = vld [vmem:[#allocation12 + $0x54] ss:$8 sps:$4 sm:$0xff]  }
0x1166   : > { %3135 = vmatpush1.bf16.msra.mxu0 %v4477_v14 }
0x1167   : > { %3136 = vmatprep.subr.bf16.mxu0 %v4478_v16 }
0x116a   : > { %3137 = vmatpush1.bf16.msra.mxu0 %v4480_v46 }
0x116b   : > { %3138 = vmatprep.subr.bf16.mxu0 %v4481_v17 }
0x116e   : > { %3139 = vmatpush1.bf16.msra.mxu0 %v4483_v6 }
0x11e9   : > { %v2947_v12 = vpop.xlane.xlu0 %2946 }
0x11f1   : > { %v2951_v31 = vpop.xlane.xlu0 %2950 }
0x11f2   : > { %v2949_v26 = vpop.xlane.xlu1 %2948  ;;  %v2961_v30 = vsel %vm2958_vm7, %v2951_v31, -1e+09  ;;  %v4492_v31 = vld [vmem:[#allocation12 + $0x60] ss:$8 sps:$4 sm:$0xff]  }
0x11f3   : > { %v2962_v0 = vmax.f32 %v2947_v12, %v2949_v26 }
0x11f5   : > { %v2963_v20 = vmax.f32 %v2962_v0, %v2961_v30  ;;  %v4496_v0 = vld [vmem:[#allocation13 + $0x40] sm:$0xff]  }
0x11f6   : > { %3893 = vmatprep.subr.bf16.mxu1 %v4496_v0 }
0x11f7   : > { %v2964_v37 = vrot.slane %v2963_v20, 4 }
0x11f9   : > { %v2965_v41 = vmax.f32 %v2963_v20, %v2964_v37  ;;  %v4497_v20 = vld [vmem:[#allocation13] sm:$0xff]   ;;  %v4498_v37 = vld [vmem:[#allocation13 + $0x48] sm:$0xff]  }
0x11fa   : > { %3894 = vmatpush3.bf16.msra.mxu1 %v4497_v20 }
0x11fb   : > { %v2966_v42 = vrot.slane %v2965_v41, 2  ;;  %3895 = vmatprep.subr.bf16.mxu1 %v4498_v37 }
0x11fd   : > { %v2967_v38 = vmax.f32 %v2965_v41, %v2966_v42  ;;  %v4499_v41 = vld [vmem:[#allocation13 + $0x8] sm:$0xff]   ;;  %v4500_v42 = vld [vmem:[#allocation13 + $0x50] sm:$0xff]  }
0x11fe   : > { %3896 = vmatpush3.bf16.msra.mxu1 %v4499_v41 }
0x11ff   : > { %v2968_v43 = vrot.slane %v2967_v38, 1  ;;  %3897 = vmatprep.subr.bf16.mxu1 %v4500_v42 }
0x1201   : > { %v2969_v47 = vmax.f32 %v2967_v38, %v2968_v43  ;;  %v4501_v38 = vld [vmem:[#allocation13 + $0x10] sm:$0xff]   ;;  %v4502_v43 = vld [vmem:[#allocation13 + $0x58] sm:$0xff]  }
0x1202   : > { %3898 = vmatpush3.bf16.msra.mxu1 %v4501_v38 }
0x1203   : > { %v2970_v48 = vsub.f32 %v2947_v12, %v2969_v47  ;;  %v2971_v50 = vsub.f32 %v2949_v26, %v2969_v47  ;;  %v2972_v57 = vsub.f32 %v2961_v30, %v2969_v47  ;;  %v4490_v12 = vld [vmem:[#allocation12 + $0x64] ss:$8 sps:$4 sm:$0xff]   ;;  %v4493_v26 = vld [vmem:[#allocation12 + $0x74] ss:$8 sps:$4 sm:$0xff]   ;;  %v4495_v30 = vld [vmem:[#allocation12 + $0x70] ss:$8 sps:$4 sm:$0xff]   ;;  %3899 = vmatprep.subr.bf16.mxu1 %v4502_v43 }
0x1204   : > { %v4503_v47 = vld [vmem:[#allocation13 + $0x18] sm:$0xff]  }
0x1205   : > { %v2973_v9 = vmul.f32 1.442695, %v2970_v48  ;;  %v2975_v52 = vmul.f32 1.442695, %v2971_v50  ;;  %v2977_v28 = vmul.f32 1.442695, %v2972_v57 }
0x1206   : > { %v4504_v48 = vld [vmem:[#allocation13 + $0x60] sm:$0xff]   ;;  %3900 = vmatpush3.bf16.msra.mxu1 %v4503_v47  ;;  %v4506_v57 = vld [vmem:[#allocation13 + $0x68] sm:$0xff]  }
0x1207   : > { %4518 = vpow2.f32 %v2973_v9  ;;  %v4505_v50 = vld [vmem:[#allocation13 + $0x20] sm:$0xff]   ;;  %3901 = vmatprep.subr.bf16.mxu1 %v4504_v48  ;;  %v4507_v9 = vld [vmem:[#allocation13 + $0x28] sm:$0xff]  }
0x1208   : > { %4520 = vpow2.f32 %v2975_v52 }
0x1209   : > { %4522 = vpow2.f32 %v2977_v28 }
0x120a   : > { %3902 = vmatpush3.bf16.msra.mxu1 %v4505_v50 }
0x120b   : > { %3903 = vmatprep.subr.bf16.mxu1 %v4506_v57 }
0x120e   : > { %3904 = vmatpush3.bf16.msra.mxu1 %v4507_v9 }
0x1211   : > { %v4519_v18 = vpop.eup %4518 }
0x1212   : > { %v4521_v3 = vpop.eup %4520 }
0x1213   : > { %v2979_v29 = vadd.f32 %v4521_v3, %v4519_v18  ;;  %v4523_v32 = vpop.eup %4522 }
0x1215   : > { %v2980_v35 = vadd.f32 %v4523_v32, %v2979_v29 }
0x1217   : > { %v2981_v61 = vrot.slane %v2980_v35, 4 }
0x1219   : > { %v2982_v10 = vadd.f32 %v2981_v61, %v2980_v35 }
0x121b   : > { %v2983_v53 = vrot.slane %v2982_v10, 2 }
0x121d   : > { %v2984_v54 = vadd.f32 %v2983_v53, %v2982_v10 }
0x121f   : > { %v2985_v33 = vrot.slane %v2984_v54, 1 }
0x1221   : > { %v2986_v55 = vadd.f32 %v2985_v33, %v2984_v54  ;;  %v4508_v33 = vld [vmem:[#allocation13 + $0x70] sm:$0xff]  }
0x1222   : > { %3905 = vmatprep.subr.bf16.mxu1 %v4508_v33 }
0x1223   : > { %4524 = vrcp.f32 %v2986_v55  ;;  %v4509_v55 = vld [vmem:[#allocation13 + $0x30] sm:$0xff]  }
0x1224   : > { %3906 = vmatpush3.bf16.msra.mxu1 %v4509_v55 }
0x122d   : > { %v4525_v44 = vpop.eup %4524 }
0x122e   : > { %v2988_v21 = vmul.f32 %v4525_v44, %v4519_v18  ;;  %v2989_v56 = vmul.f32 %v4525_v44, %v4521_v3  ;;  %v2990_v36 = vmul.f32 %v4525_v44, %v4523_v32  ;;  %v3015_v32 = vrot.slane %v5885_v63, 1  ;;  %v4510_v44 = vld [vmem:[#allocation13 + $0x78] sm:$0xff]  }
0x122f   : > { %3907 = vmatprep.subr.bf16.mxu1 %v4510_v44 }
0x1230   : > { %v2991_v34 = vmul.f32 %v2988_v21, %v2936_v11  ;;  %v2992_v58 = vmul.f32 %v2989_v56, %v2937_v49  ;;  %v2993_v45 = vmul.f32 %v2990_v36, %v2938_v8  ;;  %v4484_v8 = vld [vmem:[#allocation12 + $0x44] ss:$8 sps:$4 sm:$0xff]   ;;  %v4922_v49 = vmov 0   ;;  %v4511_v21 = vld [vmem:[#allocation13 + $0x38] sm:$0xff]   ;;  %v3035_v56 = vld [vmem:[%s6081_s13] sm:$0x3] }
0x1231   : > { %3164 = vmatprep.mubr.bf16.mxu0 %v4922_v49  ;;  %3140 = vmatprep.subr.bf16.mxu0 %v4484_v8  ;;  %v3125_v36 = vrot.slane %v3035_v56, %v5462_v19 }
0x1232   : > { %v2994_v59 = vadd.f32 %v2992_v58, %v2991_v34  ;;  %3141 = vmatpush1.bf16.msra.mxu0 %v4486_v23  ;;  %3908 = vmatpush3.bf16.msra.mxu1 %v4511_v21  ;;  %v3129_v34 = vrot.slane %v3035_v56, %v5471_v24 }
0x1233   : > { %3142 = vmatprep.subr.bf16.mxu0 %v4487_v51 }
0x1234   : > { %v2995_v39 = vadd.f32 %v2994_v59, %v2993_v45 }
0x1236   : > { %v2996_v60 = vrot.slane %v2995_v39, 4  ;;  %3143 = vmatpush1.bf16.msra.mxu0 %v4489_v25 }
0x1237   : > { %3144 = vmatprep.subr.bf16.mxu0 %v4490_v12 }
0x1238   : > { %v2997_v62 = vadd.f32 %v2996_v60, %v2995_v39 }
0x123a   : > { %v2998_v40 = vrot.slane %v2997_v62, 2  ;;  %3145 = vmatpush1.bf16.msra.mxu0 %v4492_v31 }
0x123b   : > { %3146 = vmatprep.subr.bf16.mxu0 %v4493_v26 }
0x123c   : > { %v2999_v13 = vadd.f32 %v2998_v40, %v2997_v62 }
0x123e   : > { %v3000_v1 = vrot.slane %v2999_v13, 1  ;;  %3147 = vmatpush1.bf16.msra.mxu0 %v4495_v30 }
0x1240   : > { %v3001_v22 = vadd.f32 %v3000_v1, %v2999_v13 }
0x1242   : > { %3002 = vadd.xlane.f32.xlu1 %v3001_v22 }
0x12cf   : > { %v3003_v4 = vpop.xlane.xlu1 %3002 }
0x12d0   : > { %v3004_v5 = vmul.f32 0.0078125, %v3003_v4 }
0x12d2   : > { %v3005_v7 = vsub.f32 %v3001_v22, %v3004_v5 }
0x12d4   : > { %v3006_v11 = vmul.f32 %v3005_v7, %v3005_v7 }
0x12d6   : > { %3007 = vadd.xlane.f32.xlu0 %v3006_v11 }
0x1363   : > { %v3008_v52 = vpop.xlane.xlu0 %3007 }
0x1364   : > { %v3009_v28 = vmul.f32 0.0078125, %v3008_v52 }
0x1366   : > { %v3010_v18 = vadd.f32 1e-06, %v3009_v28 }
0x1368   : > { %4526 = vrsqrt.f32 %v3010_v18 }
0x1372   : > { %v4527_v3 = vpop.eup %4526 }
0x1373   : > { %v3012_v29 = vmul.f32 %v4527_v3, %v3005_v7 }
0x1375   : > { %v3013_v35 = vmul.f32 %v3012_v29, %v5885_v63 }
0x1377   : > { %v3017_v61 = vadd.f32 %v3015_v32, %v3013_v35 }
0x1379   : > { %v3018_v10 = vpack.c.bf16 %v3017_v61, %v3017_v61 }
0x137b   : > { %v3037_v53 = vshrl.u32 %v3018_v10, 16 }
0x137d   : > { %v3039_v54 = vrot.slane %v3037_v53, 1 }
0x137f   : > { %3165 = vmatmul.mubr.bf16.vlgmr.msra.gmra.mrb[0].mxu0 %v3039_v54 }
0x1452   : > { %v3166_v58 = vpop.f32.mrb[0].mxu0 }
0x1453   : > { %v3167_v45 = vadd.f32 %v3166_v58, %v3125_v36  ;;  %v3168_v59 = vpop.f32.mrb[1].mxu0 }
0x1454   : > { %v3169_v39 = vadd.f32 %v3168_v59, %v3129_v34  ;;  %v3170_v60 = vpop.f32.mrb[2].mxu0 }
0x1455   : > { %v3173_v62 = vmax.f32 %v3167_v45, 0.0  ;;  %v3171_v40 = vpop.f32.mrb[3].mxu0 }
0x1456   : > { %v3174_v13 = vmax.f32 %v3169_v39, 0.0 }
0x1457   : > { %v3175_v22 = vpack.c.bf16 %v3173_v62, %v3173_v62 }
0x1458   : > { %v3176_v1 = vpack.c.bf16 %v3174_v13, %v3174_v13 }
0x145a   : > { %3339 = vmatprep.mubr.bf16.mxu1 %v3176_v1 }
0x145b   : > { %3340 = vmatmul.mubr.bf16.vlgmr.msra.gmra.mrb[0].mxu1 %v3175_v22 }
0x152e   : > { %v3909_v15 = vpop.f32.mrb[0].mxu1 }
0x152f   : > { %v3910_v2 = vpop.f32.mrb[1].mxu1 }
0x1530   : > { %v3911_v4 = vadd.f32 %v3910_v2, %v3909_v15  ;;  %v3912_v5 = vpop.f32.mrb[2].mxu1 }
0x1531   : > { %v3913_v24 = vpop.f32.mrb[3].mxu1 }
0x1532   : > { %v3342_v7 = vadd.f32 %v3911_v4, %v3305_v27 }
0x1534   : > { %v3350_v11 = vrot.slane %v3342_v7, %v5462_v19 }
0x1536   : > { %3351 = vst [vmem:[%s680_s2] sm:$0xff] %v3350_v11 }
0x1537 PF: > { %s6082_s9 = sld [smem:[#allocation27_spill]]  ;;  %s6083_s19 = sld [smem:[#allocation23_spill]] }
0x1538   : > { %s6084_s26 = sld [smem:[#allocation29_spill]]  ;;  %s6085_s1 = sld [smem:[#allocation44_spill]] }
0x1539   : > { %s3366_s28 = sshll.u32 %s680_s2, 4  ;;  %s4923_s3 = smov [#allocation15]   ;;  %s3367_s28 = int_to_ptr.vmem [resolvable:$true] %s3366_s28 }
0x153a   : > { %s4760_s22 = scalar_lea.vmem %s3367_s28, 128  ;;  %s4764_s23 = sshll.u32 %s4923_s3, 4  ;;  %s4765_s23 = int_to_ptr.vmem [resolvable:$false] %s4764_s23 }
0x153b   : > { %p4761_p10 = scmp.ne.s32.totalorder %s3367_s28, %s4760_s22  ;;  %s4766_s17 = scalar_lea.vmem %s4765_s23, 256 }
0x153c   : > { %p4767_p11 = scmp.lt.s32.totalorder %s3367_s28, %s4765_s23  ;;  %p4768_p6 = scmp.lt.s32.totalorder %s4766_s17, %s4760_s22 }
0x153d   : > { %s3778_s21 = sshll.u32 %s6082_s9, 7  ;;  %s6086_s14 = sand.u32 1, %s6083_s19  }
0x153e   : > { %s5909_s15 = scalar_lea.hbm %s6085_s1, %s3778_s21  ;;  %s3353_s0 = scalar_lea.sflag [#allocation5], %s6086_s14 }
0x153f   : > { %p6087_p13 = scmp.ne.s32.totalorder %s6084_s26, 0  ;;  %p4769_p4 = por %p4768_p6, %p4767_p11 }
0x1541   : > { %p4762_p2 = pnand %p4761_p10, %p6087_p13 }
0x1543   : > { %p4763_p9 = pneg %p4762_p2 }
0x1545   : > { %p4770_p8 = pnand %p4769_p4, %p4763_p9 }
0x1547   : > { %4773 = shalt.err (!%p4770_p8)
}
0x1548   : > { %s4774_s2 = scalar_lea.hbm %s5909_s15, 128  ;;  %s4778_s27 = scalar_lea.hbm %s6085_s1, 256 }
0x1549   : > { %p4775_p12 = scmp.ne.s32.totalorder %s5909_s15, %s4774_s2  ;;  %p4779_p5 = scmp.lt.u32.totalorder %s5909_s15, %s6085_s1 }
0x154a   : > { %p4780_p7 = scmp.lt.u32.totalorder %s4778_s27, %s4774_s2  ;;  %p4782_p10 = scmp.lt.u32.totalorder %s4774_s2, %s5909_s15 }
0x154b   : > { %p4776_p3 = pnand %p4775_p12, %p6087_p13 }
0x154c   : > { %p4781_p1 = por %p4780_p7, %p4779_p5 }
0x154d   : > { %p4777_p0 = pneg %p4776_p3 }
0x154e   : > { %p4783_p2 = por %p4782_p10, %p4781_p1 }
0x1550   : > { %p4784_p9 = pnand %p4783_p2, %p4777_p0 }
0x1552   : > { %4787 = shalt.err (!%p4784_p9)
}
0x1553   : > { %4083 = dma.vmem_to_hbm [thread:$0]  (%p6087_p13), %s3367_s28, 128, %s5909_s15, %s3353_s0  }
0x1554 PF: > { %s6088_s30 = sld [smem:[#allocation22_spill]]  ;;  %s6089_s24 = sld [smem:[#allocation30_spill]] }
0x1555   : > { %p4124_p11 = scmp.ge.s32.totalorder %s4898_s18, 2 }
0x155a   : > { %s3378_s13 = sand.u32 1, %s6088_s30   ;;  %p6090_p6 = scmp.ne.s32.totalorder %s6089_s24, 0 }
0x155b   : > { %s3379_s9 = scalar_lea.sflag [#allocation5], %s3378_s13 }
0x155c   : > { %p4112_p4 = pnand %p4124_p11, %p6090_p6 }
0x155e   : > { %4853 = dma.done.wait (!%p4112_p4), %s3379_s9, 128  }
0x155f   : > { %4855 = vsyncadd (!%p4112_p4), %s3379_s9, 4294967168  ;;  %s29_s18 = sadd.s32 1, %s4898_s18   ;;  %s6091_s25 = sld [smem:[#allocation23_spill]] }
0x1560   : > { %p26_p8 = scmp.ge.s32.totalorder %s29_s18, 6   ;;  %s6092_s26 = sld [smem:[#allocation24_spill]] }
0x1561   : > { %s6093_s27 = sld [smem:[#allocation34_spill]]  ;;  %s6094_s19 = sld [smem:[#allocation25_spill]] }
0x1562   : > { %s6095_s30 = sld [smem:[#allocation33_spill]]  ;;  %s6096_s15 = sld [smem:[#allocation28_spill]] }
0x1563   : > { %s6097_s21 = sld [smem:[#allocation31_spill]]  ;;  %s6098_s17 = sld [smem:[#allocation32_spill]] }
0x1564   : > { %s6099_s28 = smov %s4874_s29  ;;  %s6101_s14 = smov %s4890_s16 }
0x1565   :  { %28 = sbr.rel (!%p26_p8) target bundleno = 21 (0x15), region = 182 }
0x1567   : > { %s6100_s29 = smov %s6094_s19 }
0x1569   : > { %s6102_s16 = smov %s6097_s21 }
0x156c   :  { %3384 = vsyncpa [#allocation4], 1 }
0x156d   :  { %3386 = vsyncpa [#allocation4 + $0x1], 1 }
0x156e   :  { %3387 = vsyncpa [#allocation7], 1 }
0x156f   :  { %3388 = vsyncpa [#allocation14], 1 }
0x1570   :  { %3389 = vsyncpa [#allocation5], 1 }
0x1571   :  { %3391 = vsyncpa [#allocation5 + $0x1], 1 }

</bundles_post_ra>
